<compile_context>
chip_gen: v7x
topology: tpu7x:2x2x1
jax: 0.10.0
libtpu: 0.0.40
codegen_flags: <defaults>
</compile_context>

<pallas_src>
import jax
import jax.numpy as jnp
from jax import lax
from jax.experimental import pallas as pl
from jax.experimental.pallas import tpu as pltpu

FILTER_SIZES = list(range(2, 8))   # 2..7, as in MultiConvLayer
N_TAPS = max(FILTER_SIZES)         # 7 causal taps (shifts 0..6)
HIST = 8                           # rows of history carried across T-tiles (>= 6)


def _round_up(x, m):
    return ((x + m - 1) // m) * m


# ----------------------------------------------------------------------------
# Fused kernel: 3 x (causal conv bank -> ReLU -> 1x1 -> ReLU) + LSTM x-projection
# ----------------------------------------------------------------------------
def _causal_bank(hist, cur, w_ref, b_ref, r_ref, rb_ref):
    """One MultiConvLayer on a T-tile via a single shift-major unfold matmul.

    hist: (HIST, C) previous HIST rows of this layer's input (zeros at tile 0)
    cur : (tt,   C) this tile's input rows
    w   : (7*C, NM) packed causal conv bank (shift-major row blocks, NM padded)

    Building the (tt, 7*C) unfold costs the same shifted slices the old
    7-matmul version needed anyway, but the tap accumulation now happens
    inside the MXU (K = 7*C) instead of 6 extra (tt, NM) f32 adds on the VPU,
    and the MXU does ceil(7C/256) weight passes instead of 7.
    """
    tt, c = cur.shape
    p = jnp.concatenate([hist, cur], axis=0)                  # (HIST + tt, C)
    taps = [cur] + [p[HIST - s:HIST - s + tt, :] for s in range(1, N_TAPS)]
    u = jnp.concatenate(taps, axis=1)                         # (tt, 7*C)
    acc = jnp.dot(u, w_ref[...], preferred_element_type=jnp.float32)
    mid = jnp.maximum(acc + b_ref[...], 0.0)                  # ReLU(cat(convs))
    out = jnp.dot(mid, r_ref[...], preferred_element_type=jnp.float32)
    return jnp.maximum(out + rb_ref[...], 0.0)                # ReLU(dim_red)


def fused_conv_gates_kernel(x_ref,
                            w0, b0, r0, rb0,
                            w1, b1, r1, rb1,
                            w2, b2, r2, rb2,
                            wih, bih,
                            gx_ref,
                            hist0, hist1, hist2):
    @pl.when(pl.program_id(1) == 0)
    def _():                                                  # new batch row
        hist0[...] = jnp.zeros_like(hist0)
        hist1[...] = jnp.zeros_like(hist1)
        hist2[...] = jnp.zeros_like(hist2)

    x = x_ref[0]                                              # (tt, C_in)
    tt = x.shape[0]
    a1 = _causal_bank(hist0[...], x, w0, b0, r0, rb0)         # (tt, 64) in VMEM
    a2 = _causal_bank(hist1[...], a1, w1, b1, r1, rb1)
    a3 = _causal_bank(hist2[...], a2, w2, b2, r2, rb2)

    # carry the last HIST rows of every layer input into the next T-tile
    hist0[...] = x[tt - HIST:, :]
    hist1[...] = a1[tt - HIST:, :]
    hist2[...] = a2[tt - HIST:, :]

    # fused LSTM input projection: gates_x = a3 @ W_ih^T + (b_ih + b_hh)
    gx = jnp.dot(a3, wih[...], preferred_element_type=jnp.float32) + bih[...]
    gx_ref[0] = gx.astype(gx_ref.dtype)                       # 256-lane store


def fused_conv_gates(x, packed, tt):
    """x: (B, T_pad, C_in), T_pad % tt == 0  ->  gates_x: (B, T_pad, 4H)."""
    B, T_pad, C_in = x.shape
    nt = T_pad // tt
    (w0, b0, r0, rb0), (w1, b1, r1, rb1), (w2, b2, r2, rb2) = packed["layers"]
    wih, bih = packed["wih_t"], packed["bias"]
    G = wih.shape[1]                                          # 4H

    def full(a):                                              # whole-array weight
        return pl.BlockSpec(a.shape, lambda b, t: (0, 0))

    weights = (w0, b0, r0, rb0, w1, b1, r1, rb1, w2, b2, r2, rb2, wih, bih)
    return pl.pallas_call(
        fused_conv_gates_kernel,
        out_shape=jax.ShapeDtypeStruct((B, T_pad, G), jnp.float32),
        grid_spec=pltpu.PrefetchScalarGridSpec(
            num_scalar_prefetch=0,
            grid=(B, nt),
            in_specs=[pl.BlockSpec((1, tt, C_in), lambda b, t: (b, t, 0))]
                     + [full(a) for a in weights],
            out_specs=pl.BlockSpec((1, tt, G), lambda b, t: (b, t, 0)),
            scratch_shapes=[
                pltpu.VMEM((HIST, C_in), jnp.float32),
                pltpu.VMEM((HIST, r0.shape[1]), jnp.float32),
                pltpu.VMEM((HIST, r1.shape[1]), jnp.float32),
            ],
        ),
        compiler_params=pltpu.CompilerParams(
            dimension_semantics=("parallel", "arbitrary")),
    )(x, *weights)


# ----------------------------------------------------------------------------
# LSTM recurrence kernel: streams precomputed gates through time in chunks
# ----------------------------------------------------------------------------
def lstm_last_hidden(gx_tm, whh_t, t_real, tc, unroll=8):
    """gx_tm: (T_pad, B, 4H) time-major precomputed x-gates. Returns h_{T-1}."""
    T_pad, B, G = gx_tm.shape
    H = whh_t.shape[0]
    n_chunks = T_pad // tc
    unroll = max(1, min(unroll, tc))
    needs_mask = (T_pad != t_real)        # static: skip masking when aligned

    def kernel(gx_ref, whh_ref, o_ref, h_sc, c_sc):
        ci = pl.program_id(0)

        @pl.when(ci == 0)
        def _():
            h_sc[...] = jnp.zeros_like(h_sc)
            c_sc[...] = jnp.zeros_like(c_sc)

        whh = whh_ref[...]                 # (H, 4H): load once per chunk
        base = ci * tc

        def step(i, carry):
            h, c = carry
            g = gx_ref[i] + jnp.dot(h, whh,
                                    preferred_element_type=jnp.float32)  # (B,4H)
            s_if = jax.nn.sigmoid(g[:, :2 * H])       # i|f together: 128 lanes
            i_g, f_g = s_if[:, :H], s_if[:, H:]
            g_g = jnp.tanh(g[:, 2 * H:3 * H])
            o_g = jax.nn.sigmoid(g[:, 3 * H:])
            c_new = f_g * c + i_g * g_g
            h_new = o_g * jnp.tanh(c_new)
            if needs_mask:                             # only traced when padded
                valid = (base + i) < t_real            # skip padded timesteps
                h_new = jnp.where(valid, h_new, h)
                c_new = jnp.where(valid, c_new, c)
            return (h_new, c_new)

        h, c = lax.fori_loop(0, tc, step, (h_sc[...], c_sc[...]), unroll=unroll)
        h_sc[...] = h
        c_sc[...] = c
        o_ref[...] = h.astype(o_ref.dtype)

    return pl.pallas_call(
        kernel,
        out_shape=jax.ShapeDtypeStruct((B, H), gx_tm.dtype),
        grid_spec=pltpu.PrefetchScalarGridSpec(
            num_scalar_prefetch=0,
            grid=(n_chunks,),
            in_specs=[
                pl.BlockSpec((tc, B, G), lambda ci: (ci, 0, 0)),
                pl.BlockSpec(whh_t.shape, lambda ci: (0, 0)),
            ],
            out_specs=pl.BlockSpec((B, H), lambda ci: (0, 0)),
            scratch_shapes=[pltpu.VMEM((B, H), jnp.float32),
                            pltpu.VMEM((B, H), jnp.float32)],
        ),
        compiler_params=pltpu.CompilerParams(
            dimension_semantics=("arbitrary",)),
    )(gx_tm, whh_t)


# ----------------------------------------------------------------------------
# Forward
# ----------------------------------------------------------------------------
def multiconvnet_forward(x, packed, t_tile=256):
    """x: (B, T, C_in) -> last LSTM hidden state (B, H)."""
    B, T, _ = x.shape
    tt = max(HIST, min(_round_up(t_tile, 8), _round_up(T, 8)))
    T_pad = _round_up(T, tt)
    if T_pad != T:
        x = jnp.pad(x, ((0, 0), (0, T_pad - T), (0, 0)))
    gx = fused_conv_gates(x, packed, tt)              # (B, T_pad, 4H) lane-dense
    # TODO(synk): emit gx time-major straight from the conv kernel to drop this
    # transpose; blocked today by the (8,128) rule on a (tt, 1, 4H) out block
    # (a revisit-and-merge out block would need an extra read of gx anyway).
    gx_tm = jnp.transpose(gx, (1, 0, 2))              # (T_pad, B, 4H)
    return lstm_last_hidden(gx_tm, packed["whh_t"], T, tt)


# ----------------------------------------------------------------------------
# Parameter init (PyTorch-like shapes) + one-time packing (hoisted from forward)
# ----------------------------------------------------------------------------
def init_params(key, in_channels, out_channels=64, n_layers=3):
    c_half = out_channels // 2
    layers = []
    for l in range(n_layers):
        cin = in_channels if l == 0 else out_channels
        conv_ws, conv_bs = [], []
        for f in FILTER_SIZES:
            key, k1, k2 = jax.random.split(key, 3)
            s = 1.0 / (cin * f) ** 0.5
            conv_ws.append(jax.random.uniform(k1, (c_half, cin, f), jnp.float32, -s, s))
            conv_bs.append(jax.random.uniform(k2, (c_half,), jnp.float32, -s, s))
        key, k1, k2 = jax.random.split(key, 3)
        nmid = len(FILTER_SIZES) * c_half
        s = 1.0 / nmid ** 0.5
        wred = jax.random.uniform(k1, (out_channels, nmid, 1), jnp.float32, -s, s)
        bred = jax.random.uniform(k2, (out_channels,), jnp.float32, -s, s)
        layers.append(dict(conv_ws=conv_ws, conv_bs=conv_bs, wred=wred, bred=bred))
    key, k1, k2, k3, k4 = jax.random.split(key, 5)
    H = out_channels
    s = 1.0 / H ** 0.5
    lstm = dict(
        w_ih=jax.random.uniform(k1, (4 * H, H), jnp.float32, -s, s),
        w_hh=jax.random.uniform(k2, (4 * H, H), jnp.float32, -s, s),
        b_ih=jax.random.uniform(k3, (4 * H,), jnp.float32, -s, s),
        b_hh=jax.random.uniform(k4, (4 * H,), jnp.float32, -s, s),
    )
    return dict(layers=layers, lstm=lstm)


def pack_params(params, out_channels=64, n_mid_pad=256):
    """Pack conv banks into shift-major matmul weights; pad concat dim to 256."""
    c_half = out_channels // 2
    n_mid = len(FILTER_SIZES) * c_half                        # 192
    packed_layers = []
    for layer in params["layers"]:
        cin = layer["conv_ws"][0].shape[1]
        wbig = jnp.zeros((N_TAPS * cin, n_mid_pad), jnp.float32)
        for idx, (w, f) in enumerate(zip(layer["conv_ws"], FILTER_SIZES)):
            for s in range(f):                                # shift s uses tap f-1-s
                blk = w[:, :, f - 1 - s].T                    # (C_in, c_half)
                wbig = wbig.at[s * cin:(s + 1) * cin,
                               idx * c_half:(idx + 1) * c_half].set(blk)
        bbig = jnp.zeros((1, n_mid_pad), jnp.float32)
        bbig = bbig.at[0, :n_mid].set(jnp.concatenate(layer["conv_bs"]))
        wred = jnp.zeros((n_mid_pad, out_channels), jnp.float32)
        wred = wred.at[:n_mid, :].set(layer["wred"][:, :, 0].T)
        bred = layer["bred"].reshape(1, -1)
        packed_layers.append((wbig, bbig, wred, bred))
    p = params["lstm"]
    return dict(layers=packed_layers,
                wih_t=p["w_ih"].T,                            # (H, 4H)
                whh_t=p["w_hh"].T,                            # (H, 4H)
                bias=(p["b_ih"] + p["b_hh"]).reshape(1, -1))


# ----------------------------------------------------------------------------
# Pure-JAX reference (matches the PyTorch forward semantics)
# ----------------------------------------------------------------------------
def reference_forward(x, params, out_channels=64):
    h = x
    for layer in params["layers"]:
        xn = jnp.transpose(h, (0, 2, 1))                      # (B, C, T)
        outs = []
        for w, b, f in zip(layer["conv_ws"], layer["conv_bs"], FILTER_SIZES):
            xp = jnp.pad(xn, ((0, 0), (0, 0), (f - 1, 0)))
            y = lax.conv_general_dilated(xp, w, (1,), "VALID",
                                         dimension_numbers=("NCH", "OIH", "NCH"))
            outs.append(y + b[None, :, None])
        out = jax.nn.relu(jnp.concatenate(outs, axis=1))
        out = lax.conv_general_dilated(out, layer["wred"], (1,), "VALID",
                                       dimension_numbers=("NCH", "OIH", "NCH"))
        out = jax.nn.relu(out + layer["bred"][None, :, None])
        h = jnp.transpose(out, (0, 2, 1))
    p = params["lstm"]
    H = out_channels
    B = h.shape[0]

    def step(carry, x_t):
        hs, cs = carry
        g = x_t @ p["w_ih"].T + hs @ p["w_hh"].T + p["b_ih"] + p["b_hh"]
        i_g = jax.nn.sigmoid(g[:, :H]); f_g = jax.nn.sigmoid(g[:, H:2 * H])
        g_g = jnp.tanh(g[:, 2 * H:3 * H]); o_g = jax.nn.sigmoid(g[:, 3 * H:4 * H])
        cs = f_g * cs + i_g * g_g
        hs = o_g * jnp.tanh(cs)
        return (hs, cs), None

    (hs, _), _ = lax.scan(step, (jnp.zeros((B, H)), jnp.zeros((B, H))),
                          jnp.transpose(h, (1, 0, 2)))
    return hs


if __name__ == "__main__":
    B, T, C_IN, C_OUT = 2, 30, 4, 64
    key = jax.random.PRNGKey(0)
    kx, kp = jax.random.split(key)
    x = jax.random.normal(kx, (B, T, C_IN), jnp.float32)
    params = init_params(kp, C_IN, C_OUT, n_layers=3)
    packed = pack_params(params, C_OUT)                       # packed once, reused

    fwd = jax.jit(multiconvnet_forward, static_argnames=("t_tile",))
    # t_tile=8 at this tiny T exercises the multi-tile causal carry and the
    # padded-tail masking in the LSTM; real workloads use the default 256.
    out = jax.block_until_ready(fwd(x, packed, t_tile=8))
    ref = jax.block_until_ready(reference_forward(x, params, C_OUT))

    assert out.shape == (B, C_OUT), out.shape
    assert jnp.allclose(out, ref, rtol=1e-4, atol=1e-4), (
        float(jnp.max(jnp.abs(out - ref))))
    print("KERNEL_OK")
</pallas_src>

<mosaic_0001>
module attributes {stable_mosaic.version = 11 : i64} {
  func.func @kernel(%arg0: i32, %arg1: memref<8x2x256xf32, #tpu.memory_space<vmem>>, %arg2: memref<64x256xf32, #tpu.memory_space<vmem>>, %arg3: memref<2x64xf32, #tpu.memory_space<vmem>>, %arg4: memref<2x64xf32, #tpu.memory_space<vmem>>, %arg5: memref<2x64xf32, #tpu.memory_space<vmem>>) attributes {dimension_semantics = [#tpu.dimension_semantics<arbitrary>], iteration_bounds = array<i64: 4>, scalar_prefetch = 0 : i64, scratch_operands = 2 : i64, tpu.core_type = #tpu.core_type<tc>, window_params = [{transform_indices = @transform_0, window_bounds = array<i64: 8, 2, 256>}, {pipeline_mode = #tpu.pipeline_mode<synchronous>, transform_indices = @transform_1, window_bounds = array<i64: 64, 256>}, {pipeline_mode = #tpu.pipeline_mode<synchronous>, transform_indices = @transform_2, window_bounds = array<i64: 2, 64>}]} {
    %c0_i32 = arith.constant 0 : i32
    %0 = arith.cmpi eq, %arg0, %c0_i32 : i32
    %1 = arith.extui %0 : i1 to i32
    %c0_i32_0 = arith.constant 0 : i32
    %2 = arith.cmpi ne, %1, %c0_i32_0 : i32
    scf.if %2 {
      %cst_60 = arith.constant 0.000000e+00 : f32
      %250 = vector.broadcast %cst_60 : f32 to vector<2x64xf32>
      %c0_61 = arith.constant 0 : index
      %c0_62 = arith.constant 0 : index
      %251 = vector.load %arg4[%c0_61, %c0_62] : memref<2x64xf32, #tpu.memory_space<vmem>>, vector<2x64xf32>
      tpu.vector_store %arg4[%c0_61, %c0_62], %250 {strides = array<i32>} : memref<2x64xf32, #tpu.memory_space<vmem>>, vector<2x64xf32>,
      %cst_63 = arith.constant 0.000000e+00 : f32
      %252 = vector.broadcast %cst_63 : f32 to vector<2x64xf32>
      %c0_64 = arith.constant 0 : index
      %c0_65 = arith.constant 0 : index
      %253 = vector.load %arg5[%c0_64, %c0_65] : memref<2x64xf32, #tpu.memory_space<vmem>>, vector<2x64xf32>
      tpu.vector_store %arg5[%c0_64, %c0_65], %252 {strides = array<i32>} : memref<2x64xf32, #tpu.memory_space<vmem>>, vector<2x64xf32>,
    } else {
    }
    %c0 = arith.constant 0 : index
    %c0_1 = arith.constant 0 : index
    %3 = vector.load %arg2[%c0, %c0_1] : memref<64x256xf32, #tpu.memory_space<vmem>>, vector<64x256xf32>
    %c8_i32 = arith.constant 8 : i32
    %4 = arith.muli %arg0, %c8_i32 : i32
    %c0_2 = arith.constant 0 : index
    %c0_3 = arith.constant 0 : index
    %5 = vector.load %arg4[%c0_2, %c0_3] : memref<2x64xf32, #tpu.memory_space<vmem>>, vector<2x64xf32>
    %c0_4 = arith.constant 0 : index
    %c0_5 = arith.constant 0 : index
    %6 = vector.load %arg5[%c0_4, %c0_5] : memref<2x64xf32, #tpu.memory_space<vmem>>, vector<2x64xf32>
    %c0_i32_6 = arith.constant 0 : i32
    %7 = arith.index_cast %c0_i32_6 : i32 to index
    %c0_7 = arith.constant 0 : index
    %c0_8 = arith.constant 0 : index
    %8 = vector.load %arg1[%7, %c0_7, %c0_8] : memref<8x2x256xf32, #tpu.memory_space<vmem>>, vector<1x2x256xf32>
    %9 = vector.shape_cast %8 : vector<1x2x256xf32> to vector<2x256xf32>
    %cst = arith.constant dense<0.000000e+00> : vector<2x256xf32>
    %10 = tpu.matmul %5, %3, %cst {dimension_numbers = #tpu.dot_dimension_numbers<[1], [0], [0], [1], [0, 0, 1, 1], [], []>} : vector<2x64xf32>, vector<64x256xf32>, vector<2x256xf32> -> vector<2x256xf32>
    %11 = arith.addf %9, %10 : vector<2x256xf32>
    %12 = vector.extract_strided_slice %11 {offsets = [0, 0], sizes = [2, 128], strides = [1, 1]} : vector<2x256xf32> to vector<2x128xf32>
    %13 = arith.negf %12 : vector<2x128xf32>
    %14 = math.exp %13 : vector<2x128xf32>
    %cst_9 = arith.constant 1.000000e+00 : f32
    %15 = vector.broadcast %cst_9 : f32 to vector<2x128xf32>
    %16 = arith.addf %15, %14 : vector<2x128xf32>
    %17 = arith.divf %15, %16 : vector<2x128xf32>
    %18 = vector.extract_strided_slice %17 {offsets = [0, 0], sizes = [2, 64], strides = [1, 1]} : vector<2x128xf32> to vector<2x64xf32>
    %19 = vector.extract_strided_slice %17 {offsets = [0, 64], sizes = [2, 64], strides = [1, 1]} : vector<2x128xf32> to vector<2x64xf32>
    %20 = vector.extract_strided_slice %11 {offsets = [0, 128], sizes = [2, 64], strides = [1, 1]} : vector<2x256xf32> to vector<2x64xf32>
    %21 = math.tanh %20 : vector<2x64xf32>
    %22 = vector.extract_strided_slice %11 {offsets = [0, 192], sizes = [2, 64], strides = [1, 1]} : vector<2x256xf32> to vector<2x64xf32>
    %23 = arith.negf %22 : vector<2x64xf32>
    %24 = math.exp %23 : vector<2x64xf32>
    %cst_10 = arith.constant 1.000000e+00 : f32
    %25 = vector.broadcast %cst_10 : f32 to vector<2x64xf32>
    %26 = arith.addf %25, %24 : vector<2x64xf32>
    %27 = arith.divf %25, %26 : vector<2x64xf32>
    %28 = arith.mulf %19, %6 : vector<2x64xf32>
    %29 = arith.mulf %18, %21 : vector<2x64xf32>
    %30 = arith.addf %28, %29 : vector<2x64xf32>
    %31 = math.tanh %30 : vector<2x64xf32>
    %32 = arith.mulf %27, %31 : vector<2x64xf32>
    %33 = arith.addi %4, %c0_i32_6 : i32
    %c30_i32 = arith.constant 30 : i32
    %34 = arith.cmpi slt, %33, %c30_i32 : i32
    %35 = arith.select %34, %32, %5 : vector<2x64xf32>
    %36 = arith.select %34, %30, %6 : vector<2x64xf32>
    %c1_i32 = arith.constant 1 : i32
    %37 = arith.index_cast %c1_i32 : i32 to index
    %c0_11 = arith.constant 0 : index
    %c0_12 = arith.constant 0 : index
    %38 = vector.load %arg1[%37, %c0_11, %c0_12] : memref<8x2x256xf32, #tpu.memory_space<vmem>>, vector<1x2x256xf32>
    %39 = vector.shape_cast %38 : vector<1x2x256xf32> to vector<2x256xf32>
    %cst_13 = arith.constant dense<0.000000e+00> : vector<2x256xf32>
    %40 = tpu.matmul %35, %3, %cst_13 {dimension_numbers = #tpu.dot_dimension_numbers<[1], [0], [0], [1], [0, 0, 1, 1], [], []>} : vector<2x64xf32>, vector<64x256xf32>, vector<2x256xf32> -> vector<2x256xf32>
    %41 = arith.addf %39, %40 : vector<2x256xf32>
    %42 = vector.extract_strided_slice %41 {offsets = [0, 0], sizes = [2, 128], strides = [1, 1]} : vector<2x256xf32> to vector<2x128xf32>
    %43 = arith.negf %42 : vector<2x128xf32>
    %44 = math.exp %43 : vector<2x128xf32>
    %cst_14 = arith.constant 1.000000e+00 : f32
    %45 = vector.broadcast %cst_14 : f32 to vector<2x128xf32>
    %46 = arith.addf %45, %44 : vector<2x128xf32>
    %47 = arith.divf %45, %46 : vector<2x128xf32>
    %48 = vector.extract_strided_slice %47 {offsets = [0, 0], sizes = [2, 64], strides = [1, 1]} : vector<2x128xf32> to vector<2x64xf32>
    %49 = vector.extract_strided_slice %47 {offsets = [0, 64], sizes = [2, 64], strides = [1, 1]} : vector<2x128xf32> to vector<2x64xf32>
    %50 = vector.extract_strided_slice %41 {offsets = [0, 128], sizes = [2, 64], strides = [1, 1]} : vector<2x256xf32> to vector<2x64xf32>
    %51 = math.tanh %50 : vector<2x64xf32>
    %52 = vector.extract_strided_slice %41 {offsets = [0, 192], sizes = [2, 64], strides = [1, 1]} : vector<2x256xf32> to vector<2x64xf32>
    %53 = arith.negf %52 : vector<2x64xf32>
    %54 = math.exp %53 : vector<2x64xf32>
    %cst_15 = arith.constant 1.000000e+00 : f32
    %55 = vector.broadcast %cst_15 : f32 to vector<2x64xf32>
    %56 = arith.addf %55, %54 : vector<2x64xf32>
    %57 = arith.divf %55, %56 : vector<2x64xf32>
    %58 = arith.mulf %49, %36 : vector<2x64xf32>
    %59 = arith.mulf %48, %51 : vector<2x64xf32>
    %60 = arith.addf %58, %59 : vector<2x64xf32>
    %61 = math.tanh %60 : vector<2x64xf32>
    %62 = arith.mulf %57, %61 : vector<2x64xf32>
    %63 = arith.addi %4, %c1_i32 : i32
    %c30_i32_16 = arith.constant 30 : i32
    %64 = arith.cmpi slt, %63, %c30_i32_16 : i32
    %65 = arith.select %64, %62, %35 : vector<2x64xf32>
    %66 = arith.select %64, %60, %36 : vector<2x64xf32>
    %c2_i32 = arith.constant 2 : i32
    %67 = arith.index_cast %c2_i32 : i32 to index
    %c0_17 = arith.constant 0 : index
    %c0_18 = arith.constant 0 : index
    %68 = vector.load %arg1[%67, %c0_17, %c0_18] : memref<8x2x256xf32, #tpu.memory_space<vmem>>, vector<1x2x256xf32>
    %69 = vector.shape_cast %68 : vector<1x2x256xf32> to vector<2x256xf32>
    %cst_19 = arith.constant dense<0.000000e+00> : vector<2x256xf32>
    %70 = tpu.matmul %65, %3, %cst_19 {dimension_numbers = #tpu.dot_dimension_numbers<[1], [0], [0], [1], [0, 0, 1, 1], [], []>} : vector<2x64xf32>, vector<64x256xf32>, vector<2x256xf32> -> vector<2x256xf32>
    %71 = arith.addf %69, %70 : vector<2x256xf32>
    %72 = vector.extract_strided_slice %71 {offsets = [0, 0], sizes = [2, 128], strides = [1, 1]} : vector<2x256xf32> to vector<2x128xf32>
    %73 = arith.negf %72 : vector<2x128xf32>
    %74 = math.exp %73 : vector<2x128xf32>
    %cst_20 = arith.constant 1.000000e+00 : f32
    %75 = vector.broadcast %cst_20 : f32 to vector<2x128xf32>
    %76 = arith.addf %75, %74 : vector<2x128xf32>
    %77 = arith.divf %75, %76 : vector<2x128xf32>
    %78 = vector.extract_strided_slice %77 {offsets = [0, 0], sizes = [2, 64], strides = [1, 1]} : vector<2x128xf32> to vector<2x64xf32>
    %79 = vector.extract_strided_slice %77 {offsets = [0, 64], sizes = [2, 64], strides = [1, 1]} : vector<2x128xf32> to vector<2x64xf32>
    %80 = vector.extract_strided_slice %71 {offsets = [0, 128], sizes = [2, 64], strides = [1, 1]} : vector<2x256xf32> to vector<2x64xf32>
    %81 = math.tanh %80 : vector<2x64xf32>
    %82 = vector.extract_strided_slice %71 {offsets = [0, 192], sizes = [2, 64], strides = [1, 1]} : vector<2x256xf32> to vector<2x64xf32>
    %83 = arith.negf %82 : vector<2x64xf32>
    %84 = math.exp %83 : vector<2x64xf32>
    %cst_21 = arith.constant 1.000000e+00 : f32
    %85 = vector.broadcast %cst_21 : f32 to vector<2x64xf32>
    %86 = arith.addf %85, %84 : vector<2x64xf32>
    %87 = arith.divf %85, %86 : vector<2x64xf32>
    %88 = arith.mulf %79, %66 : vector<2x64xf32>
    %89 = arith.mulf %78, %81 : vector<2x64xf32>
    %90 = arith.addf %88, %89 : vector<2x64xf32>
    %91 = math.tanh %90 : vector<2x64xf32>
    %92 = arith.mulf %87, %91 : vector<2x64xf32>
    %93 = arith.addi %4, %c2_i32 : i32
    %c30_i32_22 = arith.constant 30 : i32
    %94 = arith.cmpi slt, %93, %c30_i32_22 : i32
    %95 = arith.select %94, %92, %65 : vector<2x64xf32>
    %96 = arith.select %94, %90, %66 : vector<2x64xf32>
    %c3_i32 = arith.constant 3 : i32
    %97 = arith.index_cast %c3_i32 : i32 to index
    %c0_23 = arith.constant 0 : index
    %c0_24 = arith.constant 0 : index
    %98 = vector.load %arg1[%97, %c0_23, %c0_24] : memref<8x2x256xf32, #tpu.memory_space<vmem>>, vector<1x2x256xf32>
    %99 = vector.shape_cast %98 : vector<1x2x256xf32> to vector<2x256xf32>
    %cst_25 = arith.constant dense<0.000000e+00> : vector<2x256xf32>
    %100 = tpu.matmul %95, %3, %cst_25 {dimension_numbers = #tpu.dot_dimension_numbers<[1], [0], [0], [1], [0, 0, 1, 1], [], []>} : vector<2x64xf32>, vector<64x256xf32>, vector<2x256xf32> -> vector<2x256xf32>
    %101 = arith.addf %99, %100 : vector<2x256xf32>
    %102 = vector.extract_strided_slice %101 {offsets = [0, 0], sizes = [2, 128], strides = [1, 1]} : vector<2x256xf32> to vector<2x128xf32>
    %103 = arith.negf %102 : vector<2x128xf32>
    %104 = math.exp %103 : vector<2x128xf32>
    %cst_26 = arith.constant 1.000000e+00 : f32
    %105 = vector.broadcast %cst_26 : f32 to vector<2x128xf32>
    %106 = arith.addf %105, %104 : vector<2x128xf32>
    %107 = arith.divf %105, %106 : vector<2x128xf32>
    %108 = vector.extract_strided_slice %107 {offsets = [0, 0], sizes = [2, 64], strides = [1, 1]} : vector<2x128xf32> to vector<2x64xf32>
    %109 = vector.extract_strided_slice %107 {offsets = [0, 64], sizes = [2, 64], strides = [1, 1]} : vector<2x128xf32> to vector<2x64xf32>
    %110 = vector.extract_strided_slice %101 {offsets = [0, 128], sizes = [2, 64], strides = [1, 1]} : vector<2x256xf32> to vector<2x64xf32>
    %111 = math.tanh %110 : vector<2x64xf32>
    %112 = vector.extract_strided_slice %101 {offsets = [0, 192], sizes = [2, 64], strides = [1, 1]} : vector<2x256xf32> to vector<2x64xf32>
    %113 = arith.negf %112 : vector<2x64xf32>
    %114 = math.exp %113 : vector<2x64xf32>
    %cst_27 = arith.constant 1.000000e+00 : f32
    %115 = vector.broadcast %cst_27 : f32 to vector<2x64xf32>
    %116 = arith.addf %115, %114 : vector<2x64xf32>
    %117 = arith.divf %115, %116 : vector<2x64xf32>
    %118 = arith.mulf %109, %96 : vector<2x64xf32>
    %119 = arith.mulf %108, %111 : vector<2x64xf32>
    %120 = arith.addf %118, %119 : vector<2x64xf32>
    %121 = math.tanh %120 : vector<2x64xf32>
    %122 = arith.mulf %117, %121 : vector<2x64xf32>
    %123 = arith.addi %4, %c3_i32 : i32
    %c30_i32_28 = arith.constant 30 : i32
    %124 = arith.cmpi slt, %123, %c30_i32_28 : i32
    %125 = arith.select %124, %122, %95 : vector<2x64xf32>
    %126 = arith.select %124, %120, %96 : vector<2x64xf32>
    %c4_i32 = arith.constant 4 : i32
    %127 = arith.index_cast %c4_i32 : i32 to index
    %c0_29 = arith.constant 0 : index
    %c0_30 = arith.constant 0 : index
    %128 = vector.load %arg1[%127, %c0_29, %c0_30] : memref<8x2x256xf32, #tpu.memory_space<vmem>>, vector<1x2x256xf32>
    %129 = vector.shape_cast %128 : vector<1x2x256xf32> to vector<2x256xf32>
    %cst_31 = arith.constant dense<0.000000e+00> : vector<2x256xf32>
    %130 = tpu.matmul %125, %3, %cst_31 {dimension_numbers = #tpu.dot_dimension_numbers<[1], [0], [0], [1], [0, 0, 1, 1], [], []>} : vector<2x64xf32>, vector<64x256xf32>, vector<2x256xf32> -> vector<2x256xf32>
    %131 = arith.addf %129, %130 : vector<2x256xf32>
    %132 = vector.extract_strided_slice %131 {offsets = [0, 0], sizes = [2, 128], strides = [1, 1]} : vector<2x256xf32> to vector<2x128xf32>
    %133 = arith.negf %132 : vector<2x128xf32>
    %134 = math.exp %133 : vector<2x128xf32>
    %cst_32 = arith.constant 1.000000e+00 : f32
    %135 = vector.broadcast %cst_32 : f32 to vector<2x128xf32>
    %136 = arith.addf %135, %134 : vector<2x128xf32>
    %137 = arith.divf %135, %136 : vector<2x128xf32>
    %138 = vector.extract_strided_slice %137 {offsets = [0, 0], sizes = [2, 64], strides = [1, 1]} : vector<2x128xf32> to vector<2x64xf32>
    %139 = vector.extract_strided_slice %137 {offsets = [0, 64], sizes = [2, 64], strides = [1, 1]} : vector<2x128xf32> to vector<2x64xf32>
    %140 = vector.extract_strided_slice %131 {offsets = [0, 128], sizes = [2, 64], strides = [1, 1]} : vector<2x256xf32> to vector<2x64xf32>
    %141 = math.tanh %140 : vector<2x64xf32>
    %142 = vector.extract_strided_slice %131 {offsets = [0, 192], sizes = [2, 64], strides = [1, 1]} : vector<2x256xf32> to vector<2x64xf32>
    %143 = arith.negf %142 : vector<2x64xf32>
    %144 = math.exp %143 : vector<2x64xf32>
    %cst_33 = arith.constant 1.000000e+00 : f32
    %145 = vector.broadcast %cst_33 : f32 to vector<2x64xf32>
    %146 = arith.addf %145, %144 : vector<2x64xf32>
    %147 = arith.divf %145, %146 : vector<2x64xf32>
    %148 = arith.mulf %139, %126 : vector<2x64xf32>
    %149 = arith.mulf %138, %141 : vector<2x64xf32>
    %150 = arith.addf %148, %149 : vector<2x64xf32>
    %151 = math.tanh %150 : vector<2x64xf32>
    %152 = arith.mulf %147, %151 : vector<2x64xf32>
    %153 = arith.addi %4, %c4_i32 : i32
    %c30_i32_34 = arith.constant 30 : i32
    %154 = arith.cmpi slt, %153, %c30_i32_34 : i32
    %155 = arith.select %154, %152, %125 : vector<2x64xf32>
    %156 = arith.select %154, %150, %126 : vector<2x64xf32>
    %c5_i32 = arith.constant 5 : i32
    %157 = arith.index_cast %c5_i32 : i32 to index
    %c0_35 = arith.constant 0 : index
    %c0_36 = arith.constant 0 : index
    %158 = vector.load %arg1[%157, %c0_35, %c0_36] : memref<8x2x256xf32, #tpu.memory_space<vmem>>, vector<1x2x256xf32>
    %159 = vector.shape_cast %158 : vector<1x2x256xf32> to vector<2x256xf32>
    %cst_37 = arith.constant dense<0.000000e+00> : vector<2x256xf32>
    %160 = tpu.matmul %155, %3, %cst_37 {dimension_numbers = #tpu.dot_dimension_numbers<[1], [0], [0], [1], [0, 0, 1, 1], [], []>} : vector<2x64xf32>, vector<64x256xf32>, vector<2x256xf32> -> vector<2x256xf32>
    %161 = arith.addf %159, %160 : vector<2x256xf32>
    %162 = vector.extract_strided_slice %161 {offsets = [0, 0], sizes = [2, 128], strides = [1, 1]} : vector<2x256xf32> to vector<2x128xf32>
    %163 = arith.negf %162 : vector<2x128xf32>
    %164 = math.exp %163 : vector<2x128xf32>
    %cst_38 = arith.constant 1.000000e+00 : f32
    %165 = vector.broadcast %cst_38 : f32 to vector<2x128xf32>
    %166 = arith.addf %165, %164 : vector<2x128xf32>
    %167 = arith.divf %165, %166 : vector<2x128xf32>
    %168 = vector.extract_strided_slice %167 {offsets = [0, 0], sizes = [2, 64], strides = [1, 1]} : vector<2x128xf32> to vector<2x64xf32>
    %169 = vector.extract_strided_slice %167 {offsets = [0, 64], sizes = [2, 64], strides = [1, 1]} : vector<2x128xf32> to vector<2x64xf32>
    %170 = vector.extract_strided_slice %161 {offsets = [0, 128], sizes = [2, 64], strides = [1, 1]} : vector<2x256xf32> to vector<2x64xf32>
    %171 = math.tanh %170 : vector<2x64xf32>
    %172 = vector.extract_strided_slice %161 {offsets = [0, 192], sizes = [2, 64], strides = [1, 1]} : vector<2x256xf32> to vector<2x64xf32>
    %173 = arith.negf %172 : vector<2x64xf32>
    %174 = math.exp %173 : vector<2x64xf32>
    %cst_39 = arith.constant 1.000000e+00 : f32
    %175 = vector.broadcast %cst_39 : f32 to vector<2x64xf32>
    %176 = arith.addf %175, %174 : vector<2x64xf32>
    %177 = arith.divf %175, %176 : vector<2x64xf32>
    %178 = arith.mulf %169, %156 : vector<2x64xf32>
    %179 = arith.mulf %168, %171 : vector<2x64xf32>
    %180 = arith.addf %178, %179 : vector<2x64xf32>
    %181 = math.tanh %180 : vector<2x64xf32>
    %182 = arith.mulf %177, %181 : vector<2x64xf32>
    %183 = arith.addi %4, %c5_i32 : i32
    %c30_i32_40 = arith.constant 30 : i32
    %184 = arith.cmpi slt, %183, %c30_i32_40 : i32
    %185 = arith.select %184, %182, %155 : vector<2x64xf32>
    %186 = arith.select %184, %180, %156 : vector<2x64xf32>
    %c6_i32 = arith.constant 6 : i32
    %187 = arith.index_cast %c6_i32 : i32 to index
    %c0_41 = arith.constant 0 : index
    %c0_42 = arith.constant 0 : index
    %188 = vector.load %arg1[%187, %c0_41, %c0_42] : memref<8x2x256xf32, #tpu.memory_space<vmem>>, vector<1x2x256xf32>
    %189 = vector.shape_cast %188 : vector<1x2x256xf32> to vector<2x256xf32>
    %cst_43 = arith.constant dense<0.000000e+00> : vector<2x256xf32>
    %190 = tpu.matmul %185, %3, %cst_43 {dimension_numbers = #tpu.dot_dimension_numbers<[1], [0], [0], [1], [0, 0, 1, 1], [], []>} : vector<2x64xf32>, vector<64x256xf32>, vector<2x256xf32> -> vector<2x256xf32>
    %191 = arith.addf %189, %190 : vector<2x256xf32>
    %192 = vector.extract_strided_slice %191 {offsets = [0, 0], sizes = [2, 128], strides = [1, 1]} : vector<2x256xf32> to vector<2x128xf32>
    %193 = arith.negf %192 : vector<2x128xf32>
    %194 = math.exp %193 : vector<2x128xf32>
    %cst_44 = arith.constant 1.000000e+00 : f32
    %195 = vector.broadcast %cst_44 : f32 to vector<2x128xf32>
    %196 = arith.addf %195, %194 : vector<2x128xf32>
    %197 = arith.divf %195, %196 : vector<2x128xf32>
    %198 = vector.extract_strided_slice %197 {offsets = [0, 0], sizes = [2, 64], strides = [1, 1]} : vector<2x128xf32> to vector<2x64xf32>
    %199 = vector.extract_strided_slice %197 {offsets = [0, 64], sizes = [2, 64], strides = [1, 1]} : vector<2x128xf32> to vector<2x64xf32>
    %200 = vector.extract_strided_slice %191 {offsets = [0, 128], sizes = [2, 64], strides = [1, 1]} : vector<2x256xf32> to vector<2x64xf32>
    %201 = math.tanh %200 : vector<2x64xf32>
    %202 = vector.extract_strided_slice %191 {offsets = [0, 192], sizes = [2, 64], strides = [1, 1]} : vector<2x256xf32> to vector<2x64xf32>
    %203 = arith.negf %202 : vector<2x64xf32>
    %204 = math.exp %203 : vector<2x64xf32>
    %cst_45 = arith.constant 1.000000e+00 : f32
    %205 = vector.broadcast %cst_45 : f32 to vector<2x64xf32>
    %206 = arith.addf %205, %204 : vector<2x64xf32>
    %207 = arith.divf %205, %206 : vector<2x64xf32>
    %208 = arith.mulf %199, %186 : vector<2x64xf32>
    %209 = arith.mulf %198, %201 : vector<2x64xf32>
    %210 = arith.addf %208, %209 : vector<2x64xf32>
    %211 = math.tanh %210 : vector<2x64xf32>
    %212 = arith.mulf %207, %211 : vector<2x64xf32>
    %213 = arith.addi %4, %c6_i32 : i32
    %c30_i32_46 = arith.constant 30 : i32
    %214 = arith.cmpi slt, %213, %c30_i32_46 : i32
    %215 = arith.select %214, %212, %185 : vector<2x64xf32>
    %216 = arith.select %214, %210, %186 : vector<2x64xf32>
    %c7_i32 = arith.constant 7 : i32
    %217 = arith.index_cast %c7_i32 : i32 to index
    %c0_47 = arith.constant 0 : index
    %c0_48 = arith.constant 0 : index
    %218 = vector.load %arg1[%217, %c0_47, %c0_48] : memref<8x2x256xf32, #tpu.memory_space<vmem>>, vector<1x2x256xf32>
    %219 = vector.shape_cast %218 : vector<1x2x256xf32> to vector<2x256xf32>
    %cst_49 = arith.constant dense<0.000000e+00> : vector<2x256xf32>
    %220 = tpu.matmul %215, %3, %cst_49 {dimension_numbers = #tpu.dot_dimension_numbers<[1], [0], [0], [1], [0, 0, 1, 1], [], []>} : vector<2x64xf32>, vector<64x256xf32>, vector<2x256xf32> -> vector<2x256xf32>
    %221 = arith.addf %219, %220 : vector<2x256xf32>
    %222 = vector.extract_strided_slice %221 {offsets = [0, 0], sizes = [2, 128], strides = [1, 1]} : vector<2x256xf32> to vector<2x128xf32>
    %223 = arith.negf %222 : vector<2x128xf32>
    %224 = math.exp %223 : vector<2x128xf32>
    %cst_50 = arith.constant 1.000000e+00 : f32
    %225 = vector.broadcast %cst_50 : f32 to vector<2x128xf32>
    %226 = arith.addf %225, %224 : vector<2x128xf32>
    %227 = arith.divf %225, %226 : vector<2x128xf32>
    %228 = vector.extract_strided_slice %227 {offsets = [0, 0], sizes = [2, 64], strides = [1, 1]} : vector<2x128xf32> to vector<2x64xf32>
    %229 = vector.extract_strided_slice %227 {offsets = [0, 64], sizes = [2, 64], strides = [1, 1]} : vector<2x128xf32> to vector<2x64xf32>
    %230 = vector.extract_strided_slice %221 {offsets = [0, 128], sizes = [2, 64], strides = [1, 1]} : vector<2x256xf32> to vector<2x64xf32>
    %231 = math.tanh %230 : vector<2x64xf32>
    %232 = vector.extract_strided_slice %221 {offsets = [0, 192], sizes = [2, 64], strides = [1, 1]} : vector<2x256xf32> to vector<2x64xf32>
    %233 = arith.negf %232 : vector<2x64xf32>
    %234 = math.exp %233 : vector<2x64xf32>
    %cst_51 = arith.constant 1.000000e+00 : f32
    %235 = vector.broadcast %cst_51 : f32 to vector<2x64xf32>
    %236 = arith.addf %235, %234 : vector<2x64xf32>
    %237 = arith.divf %235, %236 : vector<2x64xf32>
    %238 = arith.mulf %229, %216 : vector<2x64xf32>
    %239 = arith.mulf %228, %231 : vector<2x64xf32>
    %240 = arith.addf %238, %239 : vector<2x64xf32>
    %241 = math.tanh %240 : vector<2x64xf32>
    %242 = arith.mulf %237, %241 : vector<2x64xf32>
    %243 = arith.addi %4, %c7_i32 : i32
    %c30_i32_52 = arith.constant 30 : i32
    %244 = arith.cmpi slt, %243, %c30_i32_52 : i32
    %245 = arith.select %244, %242, %215 : vector<2x64xf32>
    %246 = arith.select %244, %240, %216 : vector<2x64xf32>
    %c8_i32_53 = arith.constant 8 : i32
    %c0_54 = arith.constant 0 : index
    %c0_55 = arith.constant 0 : index
    %247 = vector.load %arg4[%c0_54, %c0_55] : memref<2x64xf32, #tpu.memory_space<vmem>>, vector<2x64xf32>
    tpu.vector_store %arg4[%c0_54, %c0_55], %245 {strides = array<i32>} : memref<2x64xf32, #tpu.memory_space<vmem>>, vector<2x64xf32>,
    %c0_56 = arith.constant 0 : index
    %c0_57 = arith.constant 0 : index
    %248 = vector.load %arg5[%c0_56, %c0_57] : memref<2x64xf32, #tpu.memory_space<vmem>>, vector<2x64xf32>
    tpu.vector_store %arg5[%c0_56, %c0_57], %246 {strides = array<i32>} : memref<2x64xf32, #tpu.memory_space<vmem>>, vector<2x64xf32>,
    %c0_58 = arith.constant 0 : index
    %c0_59 = arith.constant 0 : index
    %249 = vector.load %arg3[%c0_58, %c0_59] : memref<2x64xf32, #tpu.memory_space<vmem>>, vector<2x64xf32>
    tpu.vector_store %arg3[%c0_58, %c0_59], %245 {strides = array<i32>} : memref<2x64xf32, #tpu.memory_space<vmem>>, vector<2x64xf32>,
    return
  }
  func.func @transform_0(%arg0: i32) -> (i32, i32, i32) {
    %c0_i32 = arith.constant 0 : i32
    %c0_i32_0 = arith.constant 0 : i32
    %c0_i32_1 = arith.constant 0 : i32
    return %arg0, %c0_i32, %c0_i32_0 : i32, i32, i32
  }
  func.func @transform_1(%arg0: i32) -> (i32, i32) {
    %c0_i32 = arith.constant 0 : i32
    %c0_i32_0 = arith.constant 0 : i32
    %c0_i32_1 = arith.constant 0 : i32
    return %c0_i32, %c0_i32_0 : i32, i32
  }
  func.func @transform_2(%arg0: i32) -> (i32, i32) {
    %c0_i32 = arith.constant 0 : i32
    %c0_i32_0 = arith.constant 0 : i32
    %c0_i32_1 = arith.constant 0 : i32
    return %c0_i32, %c0_i32_0 : i32, i32
  }
}

module attributes {stable_mosaic.version = 11 : i64} {
  func.func @fused_conv_gates_kernel(%arg0: i32, %arg1: i32, %arg2: memref<1x8x4xf32, #tpu.memory_space<vmem>>, %arg3: memref<28x256xf32, #tpu.memory_space<vmem>>, %arg4: memref<1x256xf32, #tpu.memory_space<vmem>>, %arg5: memref<256x64xf32, #tpu.memory_space<vmem>>, %arg6: memref<1x64xf32, #tpu.memory_space<vmem>>, %arg7: memref<448x256xf32, #tpu.memory_space<vmem>>, %arg8: memref<1x256xf32, #tpu.memory_space<vmem>>, %arg9: memref<256x64xf32, #tpu.memory_space<vmem>>, %arg10: memref<1x64xf32, #tpu.memory_space<vmem>>, %arg11: memref<448x256xf32, #tpu.memory_space<vmem>>, %arg12: memref<1x256xf32, #tpu.memory_space<vmem>>, %arg13: memref<256x64xf32, #tpu.memory_space<vmem>>, %arg14: memref<1x64xf32, #tpu.memory_space<vmem>>, %arg15: memref<64x256xf32, #tpu.memory_space<vmem>>, %arg16: memref<1x256xf32, #tpu.memory_space<vmem>>, %arg17: memref<1x8x256xf32, #tpu.memory_space<vmem>>, %arg18: memref<8x4xf32, #tpu.memory_space<vmem>>, %arg19: memref<8x64xf32, #tpu.memory_space<vmem>>, %arg20: memref<8x64xf32, #tpu.memory_space<vmem>>) attributes {dimension_semantics = [#tpu.dimension_semantics<parallel>, #tpu.dimension_semantics<arbitrary>], iteration_bounds = array<i64: 2, 4>, scalar_prefetch = 0 : i64, scratch_operands = 3 : i64, tpu.core_type = #tpu.core_type<tc>, window_params = [{transform_indices = @transform_0, window_bounds = array<i64: 1, 8, 4>}, {pipeline_mode = #tpu.pipeline_mode<synchronous>, transform_indices = @transform_1, window_bounds = array<i64: 28, 256>}, {pipeline_mode = #tpu.pipeline_mode<synchronous>, transform_indices = @transform_2, window_bounds = array<i64: 1, 256>}, {pipeline_mode = #tpu.pipeline_mode<synchronous>, transform_indices = @transform_3, window_bounds = array<i64: 256, 64>}, {pipeline_mode = #tpu.pipeline_mode<synchronous>, transform_indices = @transform_4, window_bounds = array<i64: 1, 64>}, {pipeline_mode = #tpu.pipeline_mode<synchronous>, transform_indices = @transform_5, window_bounds = array<i64: 448, 256>}, {pipeline_mode = #tpu.pipeline_mode<synchronous>, transform_indices = @transform_6, window_bounds = array<i64: 1, 256>}, {pipeline_mode = #tpu.pipeline_mode<synchronous>, transform_indices = @transform_7, window_bounds = array<i64: 256, 64>}, {pipeline_mode = #tpu.pipeline_mode<synchronous>, transform_indices = @transform_8, window_bounds = array<i64: 1, 64>}, {pipeline_mode = #tpu.pipeline_mode<synchronous>, transform_indices = @transform_9, window_bounds = array<i64: 448, 256>}, {pipeline_mode = #tpu.pipeline_mode<synchronous>, transform_indices = @transform_10, window_bounds = array<i64: 1, 256>}, {pipeline_mode = #tpu.pipeline_mode<synchronous>, transform_indices = @transform_11, window_bounds = array<i64: 256, 64>}, {pipeline_mode = #tpu.pipeline_mode<synchronous>, transform_indices = @transform_12, window_bounds = array<i64: 1, 64>}, {pipeline_mode = #tpu.pipeline_mode<synchronous>, transform_indices = @transform_13, window_bounds = array<i64: 64, 256>}, {pipeline_mode = #tpu.pipeline_mode<synchronous>, transform_indices = @transform_14, window_bounds = array<i64: 1, 256>}, {transform_indices = @transform_15, window_bounds = array<i64: 1, 8, 256>}]} {
    %c0_i32 = arith.constant 0 : i32
    %0 = arith.cmpi eq, %arg1, %c0_i32 : i32
    %1 = arith.extui %0 : i1 to i32
    %c0_i32_0 = arith.constant 0 : i32
    %2 = arith.cmpi ne, %1, %c0_i32_0 : i32
    scf.if %2 {
      %cst_58 = arith.constant 0.000000e+00 : f32
      %85 = vector.broadcast %cst_58 : f32 to vector<8x4xf32>
      %c0_59 = arith.constant 0 : index
      %c0_60 = arith.constant 0 : index
      %86 = vector.load %arg18[%c0_59, %c0_60] : memref<8x4xf32, #tpu.memory_space<vmem>>, vector<8x4xf32>
      tpu.vector_store %arg18[%c0_59, %c0_60], %85 {strides = array<i32>} : memref<8x4xf32, #tpu.memory_space<vmem>>, vector<8x4xf32>,
      %cst_61 = arith.constant 0.000000e+00 : f32
      %87 = vector.broadcast %cst_61 : f32 to vector<8x64xf32>
      %c0_62 = arith.constant 0 : index
      %c0_63 = arith.constant 0 : index
      %88 = vector.load %arg19[%c0_62, %c0_63] : memref<8x64xf32, #tpu.memory_space<vmem>>, vector<8x64xf32>
      tpu.vector_store %arg19[%c0_62, %c0_63], %87 {strides = array<i32>} : memref<8x64xf32, #tpu.memory_space<vmem>>, vector<8x64xf32>,
      %cst_64 = arith.constant 0.000000e+00 : f32
      %89 = vector.broadcast %cst_64 : f32 to vector<8x64xf32>
      %c0_65 = arith.constant 0 : index
      %c0_66 = arith.constant 0 : index
      %90 = vector.load %arg20[%c0_65, %c0_66] : memref<8x64xf32, #tpu.memory_space<vmem>>, vector<8x64xf32>
      tpu.vector_store %arg20[%c0_65, %c0_66], %89 {strides = array<i32>} : memref<8x64xf32, #tpu.memory_space<vmem>>, vector<8x64xf32>,
    } else {
    }
    %c0 = arith.constant 0 : index
    %c0_1 = arith.constant 0 : index
    %c0_2 = arith.constant 0 : index
    %3 = vector.load %arg2[%c0, %c0_1, %c0_2] : memref<1x8x4xf32, #tpu.memory_space<vmem>>, vector<1x8x4xf32>
    %4 = vector.shape_cast %3 : vector<1x8x4xf32> to vector<8x4xf32>
    %c0_3 = arith.constant 0 : index
    %c0_4 = arith.constant 0 : index
    %5 = vector.load %arg18[%c0_3, %c0_4] : memref<8x4xf32, #tpu.memory_space<vmem>>, vector<8x4xf32>
    %6 = tpu.concatenate %5, %4 in 0 : vector<8x4xf32>, vector<8x4xf32> -> vector<16x4xf32>
    %7 = vector.extract_strided_slice %6 {offsets = [7, 0], sizes = [8, 4], strides = [1, 1]} : vector<16x4xf32> to vector<8x4xf32>
    %8 = vector.extract_strided_slice %6 {offsets = [6, 0], sizes = [8, 4], strides = [1, 1]} : vector<16x4xf32> to vector<8x4xf32>
    %9 = vector.extract_strided_slice %6 {offsets = [5, 0], sizes = [8, 4], strides = [1, 1]} : vector<16x4xf32> to vector<8x4xf32>
    %10 = vector.extract_strided_slice %6 {offsets = [4, 0], sizes = [8, 4], strides = [1, 1]} : vector<16x4xf32> to vector<8x4xf32>
    %11 = vector.extract_strided_slice %6 {offsets = [3, 0], sizes = [8, 4], strides = [1, 1]} : vector<16x4xf32> to vector<8x4xf32>
    %12 = vector.extract_strided_slice %6 {offsets = [2, 0], sizes = [8, 4], strides = [1, 1]} : vector<16x4xf32> to vector<8x4xf32>
    %13 = tpu.concatenate %4, %7, %8, %9, %10, %11, %12 in 1 : vector<8x4xf32>, vector<8x4xf32>, vector<8x4xf32>, vector<8x4xf32>, vector<8x4xf32>, vector<8x4xf32>, vector<8x4xf32> -> vector<8x28xf32>
    %c0_5 = arith.constant 0 : index
    %c0_6 = arith.constant 0 : index
    %14 = vector.load %arg3[%c0_5, %c0_6] : memref<28x256xf32, #tpu.memory_space<vmem>>, vector<28x256xf32>
    %cst = arith.constant dense<0.000000e+00> : vector<8x256xf32>
    %15 = tpu.matmul %13, %14, %cst {dimension_numbers = #tpu.dot_dimension_numbers<[1], [0], [0], [1], [0, 0, 1, 1], [], []>} : vector<8x28xf32>, vector<28x256xf32>, vector<8x256xf32> -> vector<8x256xf32>
    %c0_7 = arith.constant 0 : index
    %c0_8 = arith.constant 0 : index
    %16 = vector.load %arg4[%c0_7, %c0_8] : memref<1x256xf32, #tpu.memory_space<vmem>>, vector<1x256xf32>
    %17 = vector.broadcast %16 : vector<1x256xf32> to vector<8x256xf32>
    %18 = arith.addf %15, %17 : vector<8x256xf32>
    %cst_9 = arith.constant 0.000000e+00 : f32
    %19 = vector.broadcast %cst_9 : f32 to vector<8x256xf32>
    %20 = arith.maximumf %18, %19 : vector<8x256xf32>
    %c0_10 = arith.constant 0 : index
    %c0_11 = arith.constant 0 : index
    %21 = vector.load %arg5[%c0_10, %c0_11] : memref<256x64xf32, #tpu.memory_space<vmem>>, vector<256x64xf32>
    %cst_12 = arith.constant dense<0.000000e+00> : vector<8x64xf32>
    %22 = tpu.matmul %20, %21, %cst_12 {dimension_numbers = #tpu.dot_dimension_numbers<[1], [0], [0], [1], [0, 0, 1, 1], [], []>} : vector<8x256xf32>, vector<256x64xf32>, vector<8x64xf32> -> vector<8x64xf32>
    %c0_13 = arith.constant 0 : index
    %c0_14 = arith.constant 0 : index
    %23 = vector.load %arg6[%c0_13, %c0_14] : memref<1x64xf32, #tpu.memory_space<vmem>>, vector<1x64xf32>
    %24 = vector.broadcast %23 : vector<1x64xf32> to vector<8x64xf32>
    %25 = arith.addf %22, %24 : vector<8x64xf32>
    %cst_15 = arith.constant 0.000000e+00 : f32
    %26 = vector.broadcast %cst_15 : f32 to vector<8x64xf32>
    %27 = arith.maximumf %25, %26 : vector<8x64xf32>
    %c0_16 = arith.constant 0 : index
    %c0_17 = arith.constant 0 : index
    %28 = vector.load %arg19[%c0_16, %c0_17] : memref<8x64xf32, #tpu.memory_space<vmem>>, vector<8x64xf32>
    %29 = tpu.concatenate %28, %27 in 0 : vector<8x64xf32>, vector<8x64xf32> -> vector<16x64xf32>
    %30 = vector.extract_strided_slice %29 {offsets = [7, 0], sizes = [8, 64], strides = [1, 1]} : vector<16x64xf32> to vector<8x64xf32>
    %31 = vector.extract_strided_slice %29 {offsets = [6, 0], sizes = [8, 64], strides = [1, 1]} : vector<16x64xf32> to vector<8x64xf32>
    %32 = vector.extract_strided_slice %29 {offsets = [5, 0], sizes = [8, 64], strides = [1, 1]} : vector<16x64xf32> to vector<8x64xf32>
    %33 = vector.extract_strided_slice %29 {offsets = [4, 0], sizes = [8, 64], strides = [1, 1]} : vector<16x64xf32> to vector<8x64xf32>
    %34 = vector.extract_strided_slice %29 {offsets = [3, 0], sizes = [8, 64], strides = [1, 1]} : vector<16x64xf32> to vector<8x64xf32>
    %35 = vector.extract_strided_slice %29 {offsets = [2, 0], sizes = [8, 64], strides = [1, 1]} : vector<16x64xf32> to vector<8x64xf32>
    %36 = tpu.concatenate %27, %30, %31, %32, %33, %34, %35 in 1 : vector<8x64xf32>, vector<8x64xf32>, vector<8x64xf32>, vector<8x64xf32>, vector<8x64xf32>, vector<8x64xf32>, vector<8x64xf32> -> vector<8x448xf32>
    %c0_18 = arith.constant 0 : index
    %c0_19 = arith.constant 0 : index
    %37 = vector.load %arg7[%c0_18, %c0_19] : memref<448x256xf32, #tpu.memory_space<vmem>>, vector<448x256xf32>
    %cst_20 = arith.constant dense<0.000000e+00> : vector<8x256xf32>
    %38 = tpu.matmul %36, %37, %cst_20 {dimension_numbers = #tpu.dot_dimension_numbers<[1], [0], [0], [1], [0, 0, 1, 1], [], []>} : vector<8x448xf32>, vector<448x256xf32>, vector<8x256xf32> -> vector<8x256xf32>
    %c0_21 = arith.constant 0 : index
    %c0_22 = arith.constant 0 : index
    %39 = vector.load %arg8[%c0_21, %c0_22] : memref<1x256xf32, #tpu.memory_space<vmem>>, vector<1x256xf32>
    %40 = vector.broadcast %39 : vector<1x256xf32> to vector<8x256xf32>
    %41 = arith.addf %38, %40 : vector<8x256xf32>
    %cst_23 = arith.constant 0.000000e+00 : f32
    %42 = vector.broadcast %cst_23 : f32 to vector<8x256xf32>
    %43 = arith.maximumf %41, %42 : vector<8x256xf32>
    %c0_24 = arith.constant 0 : index
    %c0_25 = arith.constant 0 : index
    %44 = vector.load %arg9[%c0_24, %c0_25] : memref<256x64xf32, #tpu.memory_space<vmem>>, vector<256x64xf32>
    %cst_26 = arith.constant dense<0.000000e+00> : vector<8x64xf32>
    %45 = tpu.matmul %43, %44, %cst_26 {dimension_numbers = #tpu.dot_dimension_numbers<[1], [0], [0], [1], [0, 0, 1, 1], [], []>} : vector<8x256xf32>, vector<256x64xf32>, vector<8x64xf32> -> vector<8x64xf32>
    %c0_27 = arith.constant 0 : index
    %c0_28 = arith.constant 0 : index
    %46 = vector.load %arg10[%c0_27, %c0_28] : memref<1x64xf32, #tpu.memory_space<vmem>>, vector<1x64xf32>
    %47 = vector.broadcast %46 : vector<1x64xf32> to vector<8x64xf32>
    %48 = arith.addf %45, %47 : vector<8x64xf32>
    %cst_29 = arith.constant 0.000000e+00 : f32
    %49 = vector.broadcast %cst_29 : f32 to vector<8x64xf32>
    %50 = arith.maximumf %48, %49 : vector<8x64xf32>
    %c0_30 = arith.constant 0 : index
    %c0_31 = arith.constant 0 : index
    %51 = vector.load %arg20[%c0_30, %c0_31] : memref<8x64xf32, #tpu.memory_space<vmem>>, vector<8x64xf32>
    %52 = tpu.concatenate %51, %50 in 0 : vector<8x64xf32>, vector<8x64xf32> -> vector<16x64xf32>
    %53 = vector.extract_strided_slice %52 {offsets = [7, 0], sizes = [8, 64], strides = [1, 1]} : vector<16x64xf32> to vector<8x64xf32>
    %54 = vector.extract_strided_slice %52 {offsets = [6, 0], sizes = [8, 64], strides = [1, 1]} : vector<16x64xf32> to vector<8x64xf32>
    %55 = vector.extract_strided_slice %52 {offsets = [5, 0], sizes = [8, 64], strides = [1, 1]} : vector<16x64xf32> to vector<8x64xf32>
    %56 = vector.extract_strided_slice %52 {offsets = [4, 0], sizes = [8, 64], strides = [1, 1]} : vector<16x64xf32> to vector<8x64xf32>
    %57 = vector.extract_strided_slice %52 {offsets = [3, 0], sizes = [8, 64], strides = [1, 1]} : vector<16x64xf32> to vector<8x64xf32>
    %58 = vector.extract_strided_slice %52 {offsets = [2, 0], sizes = [8, 64], strides = [1, 1]} : vector<16x64xf32> to vector<8x64xf32>
    %59 = tpu.concatenate %50, %53, %54, %55, %56, %57, %58 in 1 : vector<8x64xf32>, vector<8x64xf32>, vector<8x64xf32>, vector<8x64xf32>, vector<8x64xf32>, vector<8x64xf32>, vector<8x64xf32> -> vector<8x448xf32>
    %c0_32 = arith.constant 0 : index
    %c0_33 = arith.constant 0 : index
    %60 = vector.load %arg11[%c0_32, %c0_33] : memref<448x256xf32, #tpu.memory_space<vmem>>, vector<448x256xf32>
    %cst_34 = arith.constant dense<0.000000e+00> : vector<8x256xf32>
    %61 = tpu.matmul %59, %60, %cst_34 {dimension_numbers = #tpu.dot_dimension_numbers<[1], [0], [0], [1], [0, 0, 1, 1], [], []>} : vector<8x448xf32>, vector<448x256xf32>, vector<8x256xf32> -> vector<8x256xf32>
    %c0_35 = arith.constant 0 : index
    %c0_36 = arith.constant 0 : index
    %62 = vector.load %arg12[%c0_35, %c0_36] : memref<1x256xf32, #tpu.memory_space<vmem>>, vector<1x256xf32>
    %63 = vector.broadcast %62 : vector<1x256xf32> to vector<8x256xf32>
    %64 = arith.addf %61, %63 : vector<8x256xf32>
    %cst_37 = arith.constant 0.000000e+00 : f32
    %65 = vector.broadcast %cst_37 : f32 to vector<8x256xf32>
    %66 = arith.maximumf %64, %65 : vector<8x256xf32>
    %c0_38 = arith.constant 0 : index
    %c0_39 = arith.constant 0 : index
    %67 = vector.load %arg13[%c0_38, %c0_39] : memref<256x64xf32, #tpu.memory_space<vmem>>, vector<256x64xf32>
    %cst_40 = arith.constant dense<0.000000e+00> : vector<8x64xf32>
    %68 = tpu.matmul %66, %67, %cst_40 {dimension_numbers = #tpu.dot_dimension_numbers<[1], [0], [0], [1], [0, 0, 1, 1], [], []>} : vector<8x256xf32>, vector<256x64xf32>, vector<8x64xf32> -> vector<8x64xf32>
    %c0_41 = arith.constant 0 : index
    %c0_42 = arith.constant 0 : index
    %69 = vector.load %arg14[%c0_41, %c0_42] : memref<1x64xf32, #tpu.memory_space<vmem>>, vector<1x64xf32>
    %70 = vector.broadcast %69 : vector<1x64xf32> to vector<8x64xf32>
    %71 = arith.addf %68, %70 : vector<8x64xf32>
    %cst_43 = arith.constant 0.000000e+00 : f32
    %72 = vector.broadcast %cst_43 : f32 to vector<8x64xf32>
    %73 = arith.maximumf %71, %72 : vector<8x64xf32>
    %c0_44 = arith.constant 0 : index
    %c0_45 = arith.constant 0 : index
    %74 = vector.load %arg18[%c0_44, %c0_45] : memref<8x4xf32, #tpu.memory_space<vmem>>, vector<8x4xf32>
    tpu.vector_store %arg18[%c0_44, %c0_45], %4 {strides = array<i32>} : memref<8x4xf32, #tpu.memory_space<vmem>>, vector<8x4xf32>,
    %c0_46 = arith.constant 0 : index
    %c0_47 = arith.constant 0 : index
    %75 = vector.load %arg19[%c0_46, %c0_47] : memref<8x64xf32, #tpu.memory_space<vmem>>, vector<8x64xf32>
    tpu.vector_store %arg19[%c0_46, %c0_47], %27 {strides = array<i32>} : memref<8x64xf32, #tpu.memory_space<vmem>>, vector<8x64xf32>,
    %c0_48 = arith.constant 0 : index
    %c0_49 = arith.constant 0 : index
    %76 = vector.load %arg20[%c0_48, %c0_49] : memref<8x64xf32, #tpu.memory_space<vmem>>, vector<8x64xf32>
    tpu.vector_store %arg20[%c0_48, %c0_49], %50 {strides = array<i32>} : memref<8x64xf32, #tpu.memory_space<vmem>>, vector<8x64xf32>,
    %c0_50 = arith.constant 0 : index
    %c0_51 = arith.constant 0 : index
    %77 = vector.load %arg15[%c0_50, %c0_51] : memref<64x256xf32, #tpu.memory_space<vmem>>, vector<64x256xf32>
    %cst_52 = arith.constant dense<0.000000e+00> : vector<8x256xf32>
    %78 = tpu.matmul %73, %77, %cst_52 {dimension_numbers = #tpu.dot_dimension_numbers<[1], [0], [0], [1], [0, 0, 1, 1], [], []>} : vector<8x64xf32>, vector<64x256xf32>, vector<8x256xf32> -> vector<8x256xf32>
    %c0_53 = arith.constant 0 : index
    %c0_54 = arith.constant 0 : index
    %79 = vector.load %arg16[%c0_53, %c0_54] : memref<1x256xf32, #tpu.memory_space<vmem>>, vector<1x256xf32>
    %80 = vector.broadcast %79 : vector<1x256xf32> to vector<8x256xf32>
    %81 = arith.addf %78, %80 : vector<8x256xf32>
    %c0_55 = arith.constant 0 : index
    %c0_56 = arith.constant 0 : index
    %c0_57 = arith.constant 0 : index
    %82 = vector.load %arg17[%c0_55, %c0_56, %c0_57] : memref<1x8x256xf32, #tpu.memory_space<vmem>>, vector<1x8x256xf32>
    %83 = vector.shape_cast %82 : vector<1x8x256xf32> to vector<8x256xf32>
    %84 = vector.shape_cast %81 : vector<8x256xf32> to vector<1x8x256xf32>
    tpu.vector_store %arg17[%c0_55, %c0_56, %c0_57], %84 {strides = array<i32>} : memref<1x8x256xf32, #tpu.memory_space<vmem>>, vector<1x8x256xf32>,
    return
  }
  func.func @transform_0(%arg0: i32, %arg1: i32) -> (i32, i32, i32) {
    %c0_i32 = arith.constant 0 : i32
    %c0_i32_0 = arith.constant 0 : i32
    return %arg0, %arg1, %c0_i32 : i32, i32, i32
  }
  func.func @transform_1(%arg0: i32, %arg1: i32) -> (i32, i32) {
    %c0_i32 = arith.constant 0 : i32
    %c0_i32_0 = arith.constant 0 : i32
    %c0_i32_1 = arith.constant 0 : i32
    return %c0_i32, %c0_i32_0 : i32, i32
  }
  func.func @transform_2(%arg0: i32, %arg1: i32) -> (i32, i32) {
    %c0_i32 = arith.constant 0 : i32
    %c0_i32_0 = arith.constant 0 : i32
    %c0_i32_1 = arith.constant 0 : i32
    return %c0_i32, %c0_i32_0 : i32, i32
  }
  func.func @transform_3(%arg0: i32, %arg1: i32) -> (i32, i32) {
    %c0_i32 = arith.constant 0 : i32
    %c0_i32_0 = arith.constant 0 : i32
    %c0_i32_1 = arith.constant 0 : i32
    return %c0_i32, %c0_i32_0 : i32, i32
  }
  func.func @transform_4(%arg0: i32, %arg1: i32) -> (i32, i32) {
    %c0_i32 = arith.constant 0 : i32
    %c0_i32_0 = arith.constant 0 : i32
    %c0_i32_1 = arith.constant 0 : i32
    return %c0_i32, %c0_i32_0 : i32, i32
  }
  func.func @transform_5(%arg0: i32, %arg1: i32) -> (i32, i32) {
    %c0_i32 = arith.constant 0 : i32
    %c0_i32_0 = arith.constant 0 : i32
    %c0_i32_1 = arith.constant 0 : i32
    return %c0_i32, %c0_i32_0 : i32, i32
  }
  func.func @transform_6(%arg0: i32, %arg1: i32) -> (i32, i32) {
    %c0_i32 = arith.constant 0 : i32
    %c0_i32_0 = arith.constant 0 : i32
    %c0_i32_1 = arith.constant 0 : i32
    return %c0_i32, %c0_i32_0 : i32, i32
  }
  func.func @transform_7(%arg0: i32, %arg1: i32) -> (i32, i32) {
    %c0_i32 = arith.constant 0 : i32
    %c0_i32_0 = arith.constant 0 : i32
    %c0_i32_1 = arith.constant 0 : i32
    return %c0_i32, %c0_i32_0 : i32, i32
  }
  func.func @transform_8(%arg0: i32, %arg1: i32) -> (i32, i32) {
    %c0_i32 = arith.constant 0 : i32
    %c0_i32_0 = arith.constant 0 : i32
    %c0_i32_1 = arith.constant 0 : i32
    return %c0_i32, %c0_i32_0 : i32, i32
  }
  func.func @transform_9(%arg0: i32, %arg1: i32) -> (i32, i32) {
    %c0_i32 = arith.constant 0 : i32
    %c0_i32_0 = arith.constant 0 : i32
    %c0_i32_1 = arith.constant 0 : i32
    return %c0_i32, %c0_i32_0 : i32, i32
  }
  func.func @transform_10(%arg0: i32, %arg1: i32) -> (i32, i32) {
    %c0_i32 = arith.constant 0 : i32
    %c0_i32_0 = arith.constant 0 : i32
    %c0_i32_1 = arith.constant 0 : i32
    return %c0_i32, %c0_i32_0 : i32, i32
  }
  func.func @transform_11(%arg0: i32, %arg1: i32) -> (i32, i32) {
    %c0_i32 = arith.constant 0 : i32
    %c0_i32_0 = arith.constant 0 : i32
    %c0_i32_1 = arith.constant 0 : i32
    return %c0_i32, %c0_i32_0 : i32, i32
  }
  func.func @transform_12(%arg0: i32, %arg1: i32) -> (i32, i32) {
    %c0_i32 = arith.constant 0 : i32
    %c0_i32_0 = arith.constant 0 : i32
    %c0_i32_1 = arith.constant 0 : i32
    return %c0_i32, %c0_i32_0 : i32, i32
  }
  func.func @transform_13(%arg0: i32, %arg1: i32) -> (i32, i32) {
    %c0_i32 = arith.constant 0 : i32
    %c0_i32_0 = arith.constant 0 : i32
    %c0_i32_1 = arith.constant 0 : i32
    return %c0_i32, %c0_i32_0 : i32, i32
  }
  func.func @transform_14(%arg0: i32, %arg1: i32) -> (i32, i32) {
    %c0_i32 = arith.constant 0 : i32
    %c0_i32_0 = arith.constant 0 : i32
    %c0_i32_1 = arith.constant 0 : i32
    return %c0_i32, %c0_i32_0 : i32, i32
  }
  func.func @transform_15(%arg0: i32, %arg1: i32) -> (i32, i32, i32) {
    %c0_i32 = arith.constant 0 : i32
    %c0_i32_0 = arith.constant 0 : i32
    return %arg0, %arg1, %c0_i32 : i32, i32, i32
  }
}

</mosaic_0001>

<bundles_post_ra>
// kernel: multiconvnet_forward.3
= control target key start
LH: loop header
LB: loop body
LE: loop exit
PB: predicated region body
PF: predicated region fallthrough
CT: control target
= control target key end

     0   :  { %7 = vsyncpa [#allocation5], 0  ;;  %s1603_s9 = smov 0   ;;  %s1869_s0 = inlined_call_operand.vmem [shape: f32[32,2,256], index: 0, kind: input, shape index: {}]   ;;  %s1870_s1 = inlined_call_operand.vmem [shape: f32[64,256], index: 1, kind: input, shape index: {}]   ;;  %s1871_s2 = inlined_call_operand.hbm [shape: f32[2,64], index: 2, kind: output, shape index: {}]  }
   0x1 LB: > { %s1609_s10 = sadd.s32 4294967295, %s1581_s9   ;;  %p1259_p0 = scmp.ge.s32.totalorder %s1581_s9, 1  ;;  %s1581_s9 = sphi %s1603_s9, %s13_s9  }
   0x2   : > { %p110_p1 = scmp.lt.s32.totalorder %s1581_s9, 5 }
   0x4   : > { %p111_p2 = pnand %p1259_p0, %p110_p1 }
   0x5   : > { %s1614_s11 = sshll.u32 (!%p111_p2), %s1609_s10, 3  ;;  %p1263_p4 = scmp.ne.s32.totalorder (!%p111_p2), %s1609_s10, 0 }
   0x6   : > { %114 = sbr.rel (%p111_p2) target bundleno = 3999 (0xf9f), region = 28  ;;  %p129_p3 = scmp.lt.s32.totalorder (!%p111_p2), %s1614_s11, 31 }
   0xd   : > { %s130_s12 = scalar_select %p129_p3, %s1614_s11, 31 }
   0xe   : > { %138 = sbr.rel (%p1263_p4) target bundleno = 21 (0x15), region = 32  ;;  %vm139_vm0 = vcmask (!%p1263_p4), 517120   ;;  %v1583_v0 = vmov (!%p1263_p4), 0.0  }
   0xf   : > { %s1301_s13 = sshll.u32 %s130_s12, 2  ;;  %140 = vst.msk [vmem:[#allocation2] sm:$0x3] (!%p1263_p4), %vm139_vm0, %v1583_v0  ;;  %141 = vst.msk [vmem:[#allocation3] sm:$0x3] (!%p1263_p4), %vm139_vm0, %v1583_v0 }
  0x10   : > { %s1621_s16 = scalar_lea.vmem %s1869_s0, %s1301_s13 }
  0x15 PF: > { %v143_v1 = vld [vmem:[%s1870_s1 + $0x8] sm:$0xff]  ;;  %v145_v2 = vld [vmem:[%s1870_s1 + $0x18] sm:$0xff]  ;;  %v142_v3 = vld [vmem:[%s1870_s1] sm:$0xff]  ;;  %v1584_v8 = vmov 0.0   ;;  %s1585_s21 = smov 64   ;;  %vm162_vm1 = vcmask 523264   ;;  %v243_v30 = vlaneseq }
  0x16   : > { %v1633_v4 = vpack.c.bf16 %v145_v2, %v143_v1  ;;  %v144_v5 = vld [vmem:[%s1870_s1 + $0x10] sm:$0xff]  ;;  %v147_v6 = vld [vmem:[%s1870_s1 + $0x28] sm:$0xff]  ;;  %v149_v7 = vld [vmem:[%s1870_s1 + $0x38] sm:$0xff]  ;;  %230 = vmatprep.mubr.f32.mxu0 %v1584_v8  ;;  %368 = vmatprep.mubr.f32.mxu1 %v1584_v8  ;;  %v1586_v28 = vmov 1983009808   ;;  %p293_p5 = scmp.lt.s32.totalorder %s1614_s11, 30 }
  0x17   : > { %v1646_v9 = vpack.c.bf16 %v144_v5, %v142_v3  ;;  %v1648_v10 = vpack.c.bf16 %v149_v7, %v147_v6  ;;  %v146_v11 = vld [vmem:[%s1870_s1 + $0x20] sm:$0xff]  ;;  %v148_v12 = vld [vmem:[%s1870_s1 + $0x30] sm:$0xff]  ;;  %v151_v13 = vld [vmem:[%s1870_s1 + $0x48] sm:$0xff]  ;;  %v241_v29 = vunpack.c.l.s4 %v1586_v28  ;;  %v244_v32 = vshrl.u32 %v243_v30, 7  ;;  %s420_s27 = sadd.s32 1, %s1614_s11  ;;  %s548_s29 = sadd.s32 2, %s1614_s11 }
  0x18   : > { %1303 = vmatprep.subr.bf16.mxu0 %v1633_v4  ;;  %v153_v14 = vld [vmem:[%s1870_s1 + $0x58] sm:$0xff]  ;;  %1319 = vmatprep.subr.bf16.mxu1 %v1633_v4  ;;  %v1665_v15 = vpack.c.bf16 %v148_v12, %v146_v11  ;;  %v150_v17 = vld [vmem:[%s1870_s1 + $0x40] sm:$0xff]  ;;  %v152_v18 = vld [vmem:[%s1870_s1 + $0x50] sm:$0xff]  ;;  %s294_s26 = scalar_select %p293_p5, 1, 0  ;;  %vm1195_vm10 = vcmask 517120  }
  0x19   : > { %1305 = vmatpush1.bf16.msra.mxu0 %v1646_v9  ;;  %1321 = vmatpush1.bf16.msra.mxu1 %v1646_v9  ;;  %v1669_v16 = vpack.c.bf16 %v153_v14, %v151_v13  ;;  %v155_v19 = vld [vmem:[%s1870_s1 + $0x68] sm:$0xff]  ;;  %v157_v20 = vld [vmem:[%s1870_s1 + $0x78] sm:$0xff]  ;;  %v1268_v21 = vld.sshfl [vmem:[#allocation3] sm:$0x3 pattern:$0x76325410]  ;;  %v1686_v22 = vpack.c.bf16 %v152_v18, %v150_v17  ;;  %v242_v31 = vunpack.c.0.s8 %v241_v29 }
  0x1a   : > { %1307 = vmatprep.subr.bf16.mxu0 %v1648_v10  ;;  %1323 = vmatprep.subr.bf16.mxu1 %v1648_v10  ;;  %v1690_v23 = vpack.c.bf16 %v157_v20, %v155_v19  ;;  %v154_v24 = vld [vmem:[%s1870_s1 + $0x60] sm:$0xff]  ;;  %v156_v25 = vld [vmem:[%s1870_s1 + $0x70] sm:$0xff]  ;;  %v295_v57 = vstv %s294_s26  ;;  %p421_p6 = scmp.lt.s32.totalorder %s420_s27, 30  ;;  %p549_p7 = scmp.lt.s32.totalorder %s548_s29, 30 }
  0x1b   : > { %277 = vrot.lane.b32.xlu0 %v1268_v21, %s1585_s21  ;;  %v1700_v26 = vpack.c.bf16 %v156_v25, %v154_v24  ;;  %v159_v27 = vld [vmem:[#allocation2] sm:$0x3]  ;;  %v1719_v34 = vsub.s32 %v242_v31, %v244_v32  ;;  %vm1727_vm2 = vcmp.eq.s32.totalorder %v295_v57, 1  ;;  %v1269_v2 = vld [vmem:[%s1621_s16 + $0x4] sm:$0xf]  ;;  %s676_s3 = sadd.s32 3, %s1614_s11 }
  0x1c   : > { %v161_v37 = vld [vmem:[%s1621_s16] sm:$0xf]  ;;  %s422_s28 = scalar_select %p421_p6, 1, 0 }
  0x1d   : > { %1309 = vmatpush1.bf16.msra.mxu0 %v1665_v15  ;;  %1325 = vmatpush1.bf16.msra.mxu1 %v1665_v15  ;;  %s550_s30 = scalar_select %p549_p7, 1, 0 }
  0x1e   : > { %1311 = vmatprep.subr.bf16.mxu0 %v1669_v16  ;;  %1327 = vmatprep.subr.bf16.mxu1 %v1669_v16  ;;  %v423_v31 = vstv %s422_s28  ;;  %p677_p8 = scmp.lt.s32.totalorder %s676_s3, 30  ;;  %s804_s5 = sadd.s32 4, %s1614_s11 }
  0x1f   : > { %vm424_vm3 = vcmp.eq.s32.totalorder %v423_v31, 1  ;;  %p805_p9 = scmp.lt.s32.totalorder %s804_s5, 30  ;;  %s932_s7 = sadd.s32 5, %s1614_s11 }
  0x20   : > { %s678_s4 = scalar_select %p677_p8, 1, 0 }
  0x21   : > { %1313 = vmatpush1.bf16.msra.mxu0 %v1686_v22  ;;  %1329 = vmatpush1.bf16.msra.mxu1 %v1686_v22  ;;  %s806_s6 = scalar_select %p805_p9, 1, 0 }
  0x22   : > { %1315 = vmatprep.subr.bf16.mxu0 %v1690_v23  ;;  %1331 = vmatprep.subr.bf16.mxu1 %v1690_v23  ;;  %p933_p10 = scmp.lt.s32.totalorder %s932_s7, 30  ;;  %s1060_s12 = sadd.s32 6, %s1614_s11 }
  0x23   : > { %p1061_p11 = scmp.lt.s32.totalorder %s1060_s12, 30  ;;  %p1434_p13 = scmp.eq.s32.totalorder %s1609_s10, 3 }
  0x24   : > { %s934_s8 = scalar_select %p933_p10, 1, 0 }
  0x25   : > { %1317 = vmatpush1.bf16.msra.mxu0 %v1700_v26  ;;  %1333 = vmatpush1.bf16.msra.mxu1 %v1700_v26  ;;  %s1062_s13 = scalar_select %p1061_p11, 1, 0 }
  0x26   : > { %1335 = vmatprep.subr.bf16.mxu0 %v1633_v4  ;;  %1351 = vmatprep.subr.bf16.mxu1 %v1633_v4 }
  0x28   : > { %1265 = vmatmul.mubr.msk.f32.vlgmr.msra.gmra.mrb[0].mxu0 %vm162_vm1, %v159_v27 }
  0x29   : > { %1337 = vmatpush1.bf16.msra.mxu0 %v1646_v9  ;;  %496 = vmatprep.mubr.f32.mxu0 %v1584_v8 }
  0x2a   : > { %1339 = vmatprep.subr.bf16.mxu0 %v1648_v10 }
  0x2d   : > { %1341 = vmatpush1.bf16.msra.mxu0 %v1665_v15 }
  0x2e   : > { %1343 = vmatprep.subr.bf16.mxu0 %v1669_v16 }
  0x31   : > { %1345 = vmatpush1.bf16.msra.mxu0 %v1686_v22 }
  0x32   : > { %1347 = vmatprep.subr.bf16.mxu0 %v1690_v23 }
  0x35   : > { %1349 = vmatpush1.bf16.msra.mxu0 %v1700_v26 }
  0x36   : > { %1367 = vmatprep.subr.bf16.mxu0 %v1633_v4 }
  0x8d   : > { %v278_v47 = vpop.permute.xlu0 %277 }
  0xfb   : > { %v232_v33 = vpop.f32.mrb[0].mxu0 }
  0xfc   : > { %v234_v35 = vpop.f32.mrb[1].mxu0 }
  0xfd   : > { %v239_v36 = vcombine.low %v232_v33, %v234_v35 }
  0xff   : > { %v246_v38 = vrot.slane %v239_v36, %v1719_v34 }
 0x101   : > { %v248_v39 = vadd.f32 %v246_v38, %v161_v37 }
 0x103   : > { %259 = vrot.lane.b32.xlu1 %v248_v39, %s1585_s21  ;;  %v1266_v40 = vmul.f32 -1.442695, %v248_v39  ;;  %v256_v41 = vrot.slane %v248_v39, 2 }
 0x105   : > { %1449 = vpow2.f32 %v1266_v40  ;;  %v1273_v40 = vld [vmem:[%s1621_s16 + $0x8] sm:$0xf] }
 0x106   : > { %1451 = vtanh.f32 %v256_v41 }
 0x10f   : > { %v1450_v42 = vpop.eup %1449 }
 0x110   : > { %v252_v43 = vadd.f32 1.0, %v1450_v42  ;;  %v1452_v44 = vpop.eup %1451 }
 0x112   : > { %1453 = vrcp.f32 %v252_v43 }
 0x11c   : > { %v1454_v45 = vpop.eup %1453 }
 0x11d   : > { %v281_v46 = vmul.f32 %v1454_v45, %v1452_v44  ;;  %v280_v48 = vmul.f32 %v1454_v45, %v278_v47 }
 0x11f   : > { %283 = vrot.lane.b32.xlu0 %v281_v46, %s1585_s21 }
 0x175   : > { %v260_v52 = vpop.permute.xlu1 %259 }
 0x176   : > { %v261_v53 = vrot.slane %v260_v52, 2 }
 0x178   : > { %v1267_v54 = vmul.f32 -1.442695, %v261_v53 }
 0x191   : > { %v284_v49 = vpop.permute.xlu0 %283 }
 0x192   : > { %v286_v50 = vadd.f32 %v284_v49, %v280_v48 }
 0x194   : > { %1455 = vtanh.f32 %v286_v50  ;;  %v298_v18 = vsel %vm1727_vm2, %v286_v50, %v278_v47 }
 0x195   : > { %1457 = vpow2.f32 %v1267_v54 }
 0x19e   : > { %v1456_v51 = vpop.eup %1455 }
 0x19f   : > { %289 = vrot.lane.b32.xlu1 %v1456_v51, %s1585_s21  ;;  %v1458_v55 = vpop.eup %1457 }
 0x1a0   : > { %v266_v56 = vadd.f32 1.0, %v1458_v55 }
 0x1a2   : > { %1459 = vrcp.f32 %v266_v56 }
 0x1ac   : > { %v1460_v58 = vpop.eup %1459 }
 0x211   : > { %v290_v59 = vpop.permute.xlu1 %289 }
 0x212   : > { %v292_v60 = vmul.f32 %v1460_v58, %v290_v59 }
 0x214   : > { %v297_v62 = vsel %vm1727_vm2, %v292_v60, %v159_v27  ;;  %v551_v60 = vstv %s550_s30 }
 0x215   : > { %1270 = vmatmul.mubr.msk.f32.vlgmr.msra.gmra.mrb[0].mxu1 %vm162_vm1, %v297_v62  ;;  %vm552_vm4 = vcmp.eq.s32.totalorder %v551_v60, 1 }
 0x216   : > { %1353 = vmatpush1.bf16.msra.mxu1 %v1646_v9  ;;  %624 = vmatprep.mubr.f32.mxu1 %v1584_v8 }
 0x217   : > { %1355 = vmatprep.subr.bf16.mxu1 %v1648_v10 }
 0x21a   : > { %1357 = vmatpush1.bf16.msra.mxu1 %v1665_v15 }
 0x21b   : > { %1359 = vmatprep.subr.bf16.mxu1 %v1669_v16 }
 0x21e   : > { %1361 = vmatpush1.bf16.msra.mxu1 %v1686_v22 }
 0x21f   : > { %1363 = vmatprep.subr.bf16.mxu1 %v1690_v23 }
 0x222   : > { %1365 = vmatpush1.bf16.msra.mxu1 %v1700_v26 }
 0x223   : > { %1383 = vmatprep.subr.bf16.mxu1 %v1633_v4 }
 0x2e8   : > { %v370_v63 = vpop.f32.mrb[0].mxu1 }
 0x2e9   : > { %v372_v0 = vpop.f32.mrb[1].mxu1 }
 0x2ea   : > { %v377_v1 = vcombine.low %v370_v63, %v372_v0 }
 0x2ec   : > { %v384_v3 = vrot.slane %v377_v1, %v1719_v34 }
 0x2ee   : > { %v386_v5 = vadd.f32 %v1269_v2, %v384_v3 }
 0x2f0   : > { %397 = vrot.lane.b32.xlu1 %v386_v5, %s1585_s21  ;;  %v1271_v6 = vmul.f32 -1.442695, %v386_v5  ;;  %v394_v7 = vrot.slane %v386_v5, 2  ;;  %v1277_v5 = vld [vmem:[%s1621_s16 + $0xc] sm:$0xf] }
 0x2f2   : > { %1461 = vpow2.f32 %v1271_v6 }
 0x2f3   : > { %1463 = vtanh.f32 %v394_v7 }
 0x2fc   : > { %v1462_v11 = vpop.eup %1461 }
 0x2fd   : > { %v390_v12 = vadd.f32 1.0, %v1462_v11  ;;  %v1464_v13 = vpop.eup %1463 }
 0x2ff   : > { %1465 = vrcp.f32 %v390_v12 }
 0x309   : > { %v1466_v14 = vpop.eup %1465 }
 0x30a   : > { %v408_v17 = vmul.f32 %v1466_v14, %v1464_v13  ;;  %v407_v19 = vmul.f32 %v1466_v14, %v298_v18 }
 0x30c   : > { %410 = vrot.lane.b32.xlu0 %v408_v17, %s1585_s21 }
 0x362   : > { %v398_v25 = vpop.permute.xlu1 %397 }
 0x363   : > { %v399_v27 = vrot.slane %v398_v25, 2 }
 0x365   : > { %v1272_v28 = vmul.f32 -1.442695, %v399_v27 }
 0x37e   : > { %v411_v20 = vpop.permute.xlu0 %410 }
 0x37f   : > { %v413_v21 = vadd.f32 %v411_v20, %v407_v19 }
 0x381   : > { %1467 = vtanh.f32 %v413_v21  ;;  %v426_v50 = vsel %vm424_vm3, %v413_v21, %v298_v18 }
 0x382   : > { %1469 = vpow2.f32 %v1272_v28 }
 0x38b   : > { %v1468_v24 = vpop.eup %1467 }
 0x38c   : > { %416 = vrot.lane.b32.xlu0 %v1468_v24, %s1585_s21  ;;  %v1470_v29 = vpop.eup %1469 }
 0x38d   : > { %v404_v30 = vadd.f32 1.0, %v1470_v29 }
 0x38f   : > { %1471 = vrcp.f32 %v404_v30 }
 0x399   : > { %v1472_v32 = vpop.eup %1471 }
 0x3fe   : > { %v417_v33 = vpop.permute.xlu0 %416 }
 0x3ff   : > { %v419_v35 = vmul.f32 %v1472_v32, %v417_v33  ;;  %v679_v32 = vstv %s678_s4 }
 0x400   : > { %vm680_vm5 = vcmp.eq.s32.totalorder %v679_v32, 1 }
 0x401   : > { %v425_v36 = vsel %vm424_vm3, %v419_v35, %v297_v62 }
 0x402   : > { %1274 = vmatmul.mubr.msk.f32.vlgmr.msra.gmra.mrb[2].mxu0 %vm162_vm1, %v425_v36 }
 0x403   : > { %1369 = vmatpush1.bf16.msra.mxu0 %v1646_v9  ;;  %752 = vmatprep.mubr.f32.mxu0 %v1584_v8 }
 0x404   : > { %1371 = vmatprep.subr.bf16.mxu0 %v1648_v10 }
 0x407   : > { %1373 = vmatpush1.bf16.msra.mxu0 %v1665_v15 }
 0x408   : > { %1375 = vmatprep.subr.bf16.mxu0 %v1669_v16 }
 0x40b   : > { %1377 = vmatpush1.bf16.msra.mxu0 %v1686_v22 }
 0x40c   : > { %1379 = vmatprep.subr.bf16.mxu0 %v1690_v23 }
 0x40f   : > { %1381 = vmatpush1.bf16.msra.mxu0 %v1700_v26 }
 0x410   : > { %1399 = vmatprep.subr.bf16.mxu0 %v1633_v4 }
 0x4d5   : > { %v498_v37 = vpop.f32.mrb[2].mxu0 }
 0x4d6   : > { %v500_v38 = vpop.f32.mrb[3].mxu0 }
 0x4d7   : > { %v505_v39 = vcombine.low %v498_v37, %v500_v38 }
 0x4d9   : > { %v512_v41 = vrot.slane %v505_v39, %v1719_v34 }
 0x4db   : > { %v514_v42 = vadd.f32 %v1273_v40, %v512_v41  ;;  %v1281_v41 = vld [vmem:[%s1621_s16 + $0x10] sm:$0xf] }
 0x4dd   : > { %525 = vrot.lane.b32.xlu0 %v514_v42, %s1585_s21  ;;  %v1275_v43 = vmul.f32 -1.442695, %v514_v42  ;;  %v522_v44 = vrot.slane %v514_v42, 2 }
 0x4df   : > { %1473 = vpow2.f32 %v1275_v43 }
 0x4e0   : > { %1475 = vtanh.f32 %v522_v44 }
 0x4e9   : > { %v1474_v45 = vpop.eup %1473 }
 0x4ea   : > { %v518_v46 = vadd.f32 1.0, %v1474_v45  ;;  %v1476_v47 = vpop.eup %1475 }
 0x4ec   : > { %1477 = vrcp.f32 %v518_v46 }
 0x4f6   : > { %v1478_v48 = vpop.eup %1477 }
 0x4f7   : > { %v536_v49 = vmul.f32 %v1478_v48, %v1476_v47  ;;  %v535_v51 = vmul.f32 %v1478_v48, %v426_v50 }
 0x4f9   : > { %538 = vrot.lane.b32.xlu1 %v536_v49, %s1585_s21 }
 0x54f   : > { %v526_v55 = vpop.permute.xlu0 %525 }
 0x550   : > { %v527_v56 = vrot.slane %v526_v55, 2 }
 0x552   : > { %v1276_v57 = vmul.f32 -1.442695, %v527_v56 }
 0x56b   : > { %v539_v52 = vpop.permute.xlu1 %538 }
 0x56c   : > { %v541_v53 = vadd.f32 %v539_v52, %v535_v51 }
 0x56e   : > { %1479 = vtanh.f32 %v541_v53  ;;  %v554_v19 = vsel %vm552_vm4, %v541_v53, %v426_v50 }
 0x56f   : > { %1481 = vpow2.f32 %v1276_v57 }
 0x578   : > { %v1480_v54 = vpop.eup %1479 }
 0x579   : > { %544 = vrot.lane.b32.xlu1 %v1480_v54, %s1585_s21  ;;  %v1482_v58 = vpop.eup %1481 }
 0x57a   : > { %v532_v59 = vadd.f32 1.0, %v1482_v58 }
 0x57c   : > { %1483 = vrcp.f32 %v532_v59 }
 0x586   : > { %v1484_v61 = vpop.eup %1483 }
 0x5eb   : > { %v545_v62 = vpop.permute.xlu1 %544 }
 0x5ec   : > { %v547_v63 = vmul.f32 %v1484_v61, %v545_v62  ;;  %v807_v61 = vstv %s806_s6 }
 0x5ed   : > { %vm808_vm6 = vcmp.eq.s32.totalorder %v807_v61, 1 }
 0x5ee   : > { %v553_v0 = vsel %vm552_vm4, %v547_v63, %v425_v36 }
 0x5ef   : > { %1278 = vmatmul.mubr.msk.f32.vlgmr.msra.gmra.mrb[2].mxu1 %vm162_vm1, %v553_v0 }
 0x5f0   : > { %1385 = vmatpush1.bf16.msra.mxu1 %v1646_v9  ;;  %880 = vmatprep.mubr.f32.mxu1 %v1584_v8 }
 0x5f1   : > { %1387 = vmatprep.subr.bf16.mxu1 %v1648_v10 }
 0x5f4   : > { %1389 = vmatpush1.bf16.msra.mxu1 %v1665_v15 }
 0x5f5   : > { %1391 = vmatprep.subr.bf16.mxu1 %v1669_v16 }
 0x5f8   : > { %1393 = vmatpush1.bf16.msra.mxu1 %v1686_v22 }
 0x5f9   : > { %1395 = vmatprep.subr.bf16.mxu1 %v1690_v23 }
 0x5fc   : > { %1397 = vmatpush1.bf16.msra.mxu1 %v1700_v26 }
 0x5fd   : > { %1415 = vmatprep.subr.bf16.mxu1 %v1633_v4 }
 0x6c2   : > { %v626_v1 = vpop.f32.mrb[2].mxu1 }
 0x6c3   : > { %v628_v2 = vpop.f32.mrb[3].mxu1 }
 0x6c4   : > { %v633_v3 = vcombine.low %v626_v1, %v628_v2 }
 0x6c6   : > { %v640_v6 = vrot.slane %v633_v3, %v1719_v34 }
 0x6c8   : > { %v642_v7 = vadd.f32 %v1277_v5, %v640_v6  ;;  %v1285_v6 = vld [vmem:[%s1621_s16 + $0x14] sm:$0xf] }
 0x6ca   : > { %653 = vrot.lane.b32.xlu1 %v642_v7, %s1585_s21  ;;  %v1279_v11 = vmul.f32 -1.442695, %v642_v7  ;;  %v650_v12 = vrot.slane %v642_v7, 2 }
 0x6cc   : > { %1485 = vpow2.f32 %v1279_v11 }
 0x6cd   : > { %1487 = vtanh.f32 %v650_v12 }
 0x6d6   : > { %v1486_v13 = vpop.eup %1485 }
 0x6d7   : > { %v646_v14 = vadd.f32 1.0, %v1486_v13  ;;  %v1488_v17 = vpop.eup %1487 }
 0x6d9   : > { %1489 = vrcp.f32 %v646_v14 }
 0x6e3   : > { %v1490_v18 = vpop.eup %1489 }
 0x6e4   : > { %v664_v4 = vmul.f32 %v1490_v18, %v1488_v17  ;;  %v663_v20 = vmul.f32 %v1490_v18, %v554_v19 }
 0x6e6   : > { %666 = vrot.lane.b32.xlu0 %v664_v4, %s1585_s21 }
 0x73c   : > { %v654_v27 = vpop.permute.xlu1 %653 }
 0x73d   : > { %v655_v28 = vrot.slane %v654_v27, 2 }
 0x73f   : > { %v1280_v29 = vmul.f32 -1.442695, %v655_v28 }
 0x758   : > { %v667_v21 = vpop.permute.xlu0 %666 }
 0x759   : > { %v669_v24 = vadd.f32 %v667_v21, %v663_v20 }
 0x75b   : > { %1491 = vtanh.f32 %v669_v24  ;;  %v682_v51 = vsel %vm680_vm5, %v669_v24, %v554_v19  ;;  %v935_v24 = vstv %s934_s8 }
 0x75c   : > { %1493 = vpow2.f32 %v1280_v29  ;;  %vm936_vm7 = vcmp.eq.s32.totalorder %v935_v24, 1 }
 0x765   : > { %v1492_v25 = vpop.eup %1491 }
 0x766   : > { %672 = vrot.lane.b32.xlu0 %v1492_v25, %s1585_s21  ;;  %v1494_v30 = vpop.eup %1493 }
 0x767   : > { %v660_v31 = vadd.f32 1.0, %v1494_v30 }
 0x769   : > { %1495 = vrcp.f32 %v660_v31 }
 0x773   : > { %v1496_v33 = vpop.eup %1495 }
 0x7d8   : > { %v673_v35 = vpop.permute.xlu0 %672 }
 0x7d9   : > { %v675_v36 = vmul.f32 %v1496_v33, %v673_v35  ;;  %v1289_v33 = vld [vmem:[%s1621_s16 + $0x18] sm:$0xf] }
 0x7db   : > { %v681_v37 = vsel %vm680_vm5, %v675_v36, %v553_v0 }
 0x7dc   : > { %1282 = vmatmul.mubr.msk.f32.vlgmr.msra.gmra.mrb[4].mxu0 %vm162_vm1, %v681_v37 }
 0x7dd   : > { %1401 = vmatpush1.bf16.msra.mxu0 %v1646_v9  ;;  %1008 = vmatprep.mubr.f32.mxu0 %v1584_v8 }
 0x7de   : > { %1403 = vmatprep.subr.bf16.mxu0 %v1648_v10 }
 0x7e1   : > { %1405 = vmatpush1.bf16.msra.mxu0 %v1665_v15 }
 0x7e2   : > { %1407 = vmatprep.subr.bf16.mxu0 %v1669_v16 }
 0x7e5   : > { %1409 = vmatpush1.bf16.msra.mxu0 %v1686_v22 }
 0x7e6   : > { %1411 = vmatprep.subr.bf16.mxu0 %v1690_v23 }
 0x7e9   : > { %1413 = vmatpush1.bf16.msra.mxu0 %v1700_v26 }
 0x8af   : > { %v754_v38 = vpop.f32.mrb[4].mxu0 }
 0x8b0   : > { %v756_v39 = vpop.f32.mrb[5].mxu0 }
 0x8b1   : > { %v761_v40 = vcombine.low %v754_v38, %v756_v39 }
 0x8b3   : > { %v768_v42 = vrot.slane %v761_v40, %v1719_v34 }
 0x8b5   : > { %v770_v43 = vadd.f32 %v1281_v41, %v768_v42 }
 0x8b7   : > { %781 = vrot.lane.b32.xlu0 %v770_v43, %s1585_s21  ;;  %v1283_v44 = vmul.f32 -1.442695, %v770_v43  ;;  %v778_v45 = vrot.slane %v770_v43, 2 }
 0x8b9   : > { %1497 = vpow2.f32 %v1283_v44 }
 0x8ba   : > { %1499 = vtanh.f32 %v778_v45 }
 0x8c3   : > { %v1498_v46 = vpop.eup %1497 }
 0x8c4   : > { %v774_v47 = vadd.f32 1.0, %v1498_v46  ;;  %v1500_v48 = vpop.eup %1499 }
 0x8c6   : > { %1501 = vrcp.f32 %v774_v47 }
 0x8d0   : > { %v1502_v49 = vpop.eup %1501 }
 0x8d1   : > { %v792_v50 = vmul.f32 %v1502_v49, %v1500_v48  ;;  %v791_v52 = vmul.f32 %v1502_v49, %v682_v51 }
 0x8d3   : > { %794 = vrot.lane.b32.xlu1 %v792_v50, %s1585_s21 }
 0x929   : > { %v782_v56 = vpop.permute.xlu0 %781 }
 0x92a   : > { %v783_v57 = vrot.slane %v782_v56, 2 }
 0x92c   : > { %v1284_v58 = vmul.f32 -1.442695, %v783_v57 }
 0x945   : > { %v795_v53 = vpop.permute.xlu1 %794 }
 0x946   : > { %v797_v54 = vadd.f32 %v795_v53, %v791_v52 }
 0x948   : > { %1503 = vtanh.f32 %v797_v54  ;;  %v810_v11 = vsel %vm808_vm6, %v797_v54, %v682_v51  ;;  %v1063_v54 = vstv %s1062_s13 }
 0x949   : > { %1505 = vpow2.f32 %v1284_v58  ;;  %vm1064_vm8 = vcmp.eq.s32.totalorder %v1063_v54, 1 }
 0x952   : > { %v1504_v55 = vpop.eup %1503 }
 0x953   : > { %800 = vrot.lane.b32.xlu1 %v1504_v55, %s1585_s21  ;;  %v1506_v59 = vpop.eup %1505 }
 0x954   : > { %v788_v60 = vadd.f32 1.0, %v1506_v59 }
 0x956   : > { %1507 = vrcp.f32 %v788_v60 }
 0x960   : > { %v1508_v62 = vpop.eup %1507 }
 0x9c5   : > { %v801_v63 = vpop.permute.xlu1 %800 }
 0x9c6   : > { %v803_v0 = vmul.f32 %v1508_v62, %v801_v63  ;;  %v1293_v62 = vld [vmem:[%s1621_s16 + $0x1c] sm:$0xf]  ;;  %s1188_s16 = sadd.s32 7, %s1614_s11  ;;  %s1587_s11 = smov [#allocation4]  }
 0x9c7   : > { %p1189_p12 = scmp.lt.s32.totalorder %s1188_s16, 30  ;;  %s1217_s15 = sshll.u32 %s1587_s11, 4  ;;  %s1218_s15 = int_to_ptr.vmem [resolvable:$true] %s1217_s15 }
 0x9c8   : > { %v809_v1 = vsel %vm808_vm6, %v803_v0, %v681_v37  ;;  %s1545_s17 = scalar_lea.vmem %s1218_s15, 32  ;;  %p1552_p3 = scmp.lt.s32.totalorder %s1218_s15, %s1218_s15 }
 0x9c9   : > { %1286 = vmatmul.mubr.msk.f32.vlgmr.msra.gmra.mrb[4].mxu1 %vm162_vm1, %v809_v1  ;;  %s1190_s14 = scalar_select %p1189_p12, 1, 0 }
 0x9ca   : > { %1417 = vmatpush1.bf16.msra.mxu1 %v1646_v9  ;;  %1136 = vmatprep.mubr.f32.mxu1 %v1584_v8  ;;  %p1546_p0 = scmp.ne.s32.totalorder %s1218_s15, %s1545_s17  ;;  %p1553_p4 = scmp.lt.s32.totalorder %s1545_s17, %s1545_s17 }
 0x9cb   : > { %1419 = vmatprep.subr.bf16.mxu1 %v1648_v10 }
 0x9cc   : > { %p1547_p1 = pnand %p1546_p0, %p1434_p13  ;;  %p1554_p5 = por %p1553_p4, %p1552_p3 }
 0x9ce   : > { %1421 = vmatpush1.bf16.msra.mxu1 %v1665_v15  ;;  %p1548_p2 = pneg %p1547_p1 }
 0x9cf   : > { %1423 = vmatprep.subr.bf16.mxu1 %v1669_v16 }
 0x9d0   : > { %p1555_p6 = pnand %p1554_p5, %p1548_p2 }
 0x9d2   : > { %1425 = vmatpush1.bf16.msra.mxu1 %v1686_v22 }
 0x9d3   : > { %1427 = vmatprep.subr.bf16.mxu1 %v1690_v23 }
 0x9d6   : > { %1429 = vmatpush1.bf16.msra.mxu1 %v1700_v26 }
 0xa9c   : > { %v882_v2 = vpop.f32.mrb[4].mxu1 }
 0xa9d   : > { %v884_v3 = vpop.f32.mrb[5].mxu1 }
 0xa9e   : > { %v889_v5 = vcombine.low %v882_v2, %v884_v3 }
 0xaa0   : > { %v896_v9 = vrot.slane %v889_v5, %v1719_v34 }
 0xaa2   : > { %v898_v7 = vadd.f32 %v1285_v6, %v896_v9 }
 0xaa4   : > { %909 = vrot.lane.b32.xlu1 %v898_v7, %s1585_s21  ;;  %v1287_v8 = vmul.f32 -1.442695, %v898_v7  ;;  %v906_v10 = vrot.slane %v898_v7, 2 }
 0xaa6   : > { %1509 = vpow2.f32 %v1287_v8 }
 0xaa7   : > { %1511 = vtanh.f32 %v906_v10 }
 0xab0   : > { %v1510_v15 = vpop.eup %1509 }
 0xab1   : > { %v902_v16 = vadd.f32 1.0, %v1510_v15  ;;  %v1512_v22 = vpop.eup %1511  ;;  %v1191_v15 = vstv %s1190_s14 }
 0xab2   : > { %vm1192_vm9 = vcmp.eq.s32.totalorder %v1191_v15, 1 }
 0xab3   : > { %1513 = vrcp.f32 %v902_v16 }
 0xabd   : > { %v1514_v23 = vpop.eup %1513 }
 0xabe   : > { %v920_v26 = vmul.f32 %v1514_v23, %v1512_v22  ;;  %v919_v12 = vmul.f32 %v1514_v23, %v810_v11 }
 0xac0   : > { %922 = vrot.lane.b32.xlu0 %v920_v26, %s1585_s21 }
 0xb16   : > { %v910_v18 = vpop.permute.xlu1 %909 }
 0xb17   : > { %v911_v4 = vrot.slane %v910_v18, 2 }
 0xb19   : > { %v1288_v19 = vmul.f32 -1.442695, %v911_v4 }
 0xb32   : > { %v923_v13 = vpop.permute.xlu0 %922 }
 0xb33   : > { %v925_v14 = vadd.f32 %v923_v13, %v919_v12 }
 0xb35   : > { %1515 = vtanh.f32 %v925_v14  ;;  %v938_v44 = vsel %vm936_vm7, %v925_v14, %v810_v11 }
 0xb36   : > { %1517 = vpow2.f32 %v1288_v19 }
 0xb3f   : > { %v1516_v17 = vpop.eup %1515 }
 0xb40   : > { %928 = vrot.lane.b32.xlu0 %v1516_v17, %s1585_s21  ;;  %v1518_v20 = vpop.eup %1517 }
 0xb41   : > { %v916_v21 = vadd.f32 1.0, %v1518_v20 }
 0xb43   : > { %1519 = vrcp.f32 %v916_v21 }
 0xb4d   : > { %v1520_v25 = vpop.eup %1519 }
 0xbb2   : > { %v929_v27 = vpop.permute.xlu0 %928 }
 0xbb3   : > { %v931_v28 = vmul.f32 %v1520_v25, %v929_v27 }
 0xbb5   : > { %v937_v29 = vsel %vm936_vm7, %v931_v28, %v809_v1 }
 0xbb6   : > { %1290 = vmatmul.mubr.msk.f32.vlgmr.msra.gmra.mrb[6].mxu0 %vm162_vm1, %v937_v29 }
 0xc89   : > { %v1010_v30 = vpop.f32.mrb[6].mxu0 }
 0xc8a   : > { %v1012_v31 = vpop.f32.mrb[7].mxu0 }
 0xc8b   : > { %v1017_v32 = vcombine.low %v1010_v30, %v1012_v31 }
 0xc8d   : > { %v1024_v35 = vrot.slane %v1017_v32, %v1719_v34 }
 0xc8f   : > { %v1026_v36 = vadd.f32 %v1289_v33, %v1024_v35 }
 0xc91   : > { %1037 = vrot.lane.b32.xlu0 %v1026_v36, %s1585_s21  ;;  %v1291_v37 = vmul.f32 -1.442695, %v1026_v36  ;;  %v1034_v38 = vrot.slane %v1026_v36, 2 }
 0xc93   : > { %1521 = vpow2.f32 %v1291_v37 }
 0xc94   : > { %1523 = vtanh.f32 %v1034_v38 }
 0xc9d   : > { %v1522_v39 = vpop.eup %1521 }
 0xc9e   : > { %v1030_v40 = vadd.f32 1.0, %v1522_v39  ;;  %v1524_v41 = vpop.eup %1523 }
 0xca0   : > { %1525 = vrcp.f32 %v1030_v40 }
 0xcaa   : > { %v1526_v42 = vpop.eup %1525 }
 0xcab   : > { %v1048_v43 = vmul.f32 %v1526_v42, %v1524_v41  ;;  %v1047_v45 = vmul.f32 %v1526_v42, %v938_v44 }
 0xcad   : > { %1050 = vrot.lane.b32.xlu1 %v1048_v43, %s1585_s21 }
 0xd03   : > { %v1038_v49 = vpop.permute.xlu0 %1037 }
 0xd04   : > { %v1039_v50 = vrot.slane %v1038_v49, 2 }
 0xd06   : > { %v1292_v51 = vmul.f32 -1.442695, %v1039_v50 }
 0xd1f   : > { %v1051_v46 = vpop.permute.xlu1 %1050 }
 0xd20   : > { %v1053_v47 = vadd.f32 %v1051_v46, %v1047_v45 }
 0xd22   : > { %1527 = vtanh.f32 %v1053_v47  ;;  %v1066_v7 = vsel %vm1064_vm8, %v1053_v47, %v938_v44 }
 0xd23   : > { %1529 = vpow2.f32 %v1292_v51 }
 0xd2c   : > { %v1528_v48 = vpop.eup %1527 }
 0xd2d   : > { %1056 = vrot.lane.b32.xlu1 %v1528_v48, %s1585_s21  ;;  %v1530_v52 = vpop.eup %1529 }
 0xd2e   : > { %v1044_v53 = vadd.f32 1.0, %v1530_v52 }
 0xd30   : > { %1531 = vrcp.f32 %v1044_v53 }
 0xd3a   : > { %v1532_v55 = vpop.eup %1531 }
 0xd9f   : > { %v1057_v56 = vpop.permute.xlu1 %1056 }
 0xda0   : > { %v1059_v57 = vmul.f32 %v1532_v55, %v1057_v56 }
 0xda2   : > { %v1065_v58 = vsel %vm1064_vm8, %v1059_v57, %v937_v29 }
 0xda3   : > { %1294 = vmatmul.mubr.msk.f32.vlgmr.msra.gmra.mrb[6].mxu1 %vm162_vm1, %v1065_v58 }
 0xe76   : > { %v1138_v59 = vpop.f32.mrb[6].mxu1 }
 0xe77   : > { %v1140_v60 = vpop.f32.mrb[7].mxu1 }
 0xe78   : > { %v1145_v61 = vcombine.low %v1138_v59, %v1140_v60 }
 0xe7a   : > { %v1152_v63 = vrot.slane %v1145_v61, %v1719_v34 }
 0xe7c   : > { %v1154_v0 = vadd.f32 %v1293_v62, %v1152_v63 }
 0xe7e   : > { %1165 = vrot.lane.b32.xlu1 %v1154_v0, %s1585_s21  ;;  %v1295_v1 = vmul.f32 -1.442695, %v1154_v0  ;;  %v1162_v2 = vrot.slane %v1154_v0, 2 }
 0xe80   : > { %1533 = vpow2.f32 %v1295_v1 }
 0xe81   : > { %1535 = vtanh.f32 %v1162_v2 }
 0xe8a   : > { %v1534_v3 = vpop.eup %1533 }
 0xe8b   : > { %v1158_v5 = vadd.f32 1.0, %v1534_v3  ;;  %v1536_v6 = vpop.eup %1535 }
 0xe8d   : > { %1537 = vrcp.f32 %v1158_v5 }
 0xe97   : > { %v1538_v9 = vpop.eup %1537 }
 0xe98   : > { %v1176_v8 = vmul.f32 %v1538_v9, %v1536_v6  ;;  %v1175_v10 = vmul.f32 %v1538_v9, %v1066_v7 }
 0xe9a   : > { %1178 = vrot.lane.b32.xlu0 %v1176_v8, %s1585_s21 }
 0xef0   : > { %v1166_v12 = vpop.permute.xlu1 %1165 }
 0xef1   : > { %v1167_v13 = vrot.slane %v1166_v12, 2 }
 0xef3   : > { %v1296_v14 = vmul.f32 -1.442695, %v1167_v13 }
 0xf0c   : > { %v1179_v16 = vpop.permute.xlu0 %1178 }
 0xf0d   : > { %v1181_v22 = vadd.f32 %v1179_v16, %v1175_v10 }
 0xf0f   : > { %1539 = vtanh.f32 %v1181_v22  ;;  %v1194_v23 = vsel %vm1192_vm9, %v1181_v22, %v1066_v7 }
 0xf10   : > { %v1204_v26 = vrot.slane %v1194_v23, %v1719_v34  ;;  %1541 = vpow2.f32 %v1296_v14 }
 0xf12   : > { %1205 = vrot.lane.b32.xlu1 %v1204_v26, %s1585_s21 }
 0xf19   : > { %v1540_v11 = vpop.eup %1539 }
 0xf1a   : > { %1184 = vrot.lane.b32.xlu0 %v1540_v11, %s1585_s21  ;;  %v1542_v17 = vpop.eup %1541 }
 0xf1b   : > { %v1172_v18 = vadd.f32 1.0, %v1542_v17 }
 0xf1d   : > { %1543 = vrcp.f32 %v1172_v18 }
 0xf27   : > { %v1544_v34 = vpop.eup %1543 }
 0xf84   : > { %v1206_v4 = vpop.permute.xlu1 %1205 }
 0xf85   : > { %1208 = vst.msk [vmem:[#allocation3] sm:$0x3] %vm1195_vm10, %v1206_v4 }
 0xf8c   : > { %v1185_v19 = vpop.permute.xlu0 %1184 }
 0xf8d   : > { %v1187_v20 = vmul.f32 %v1544_v34, %v1185_v19 }
 0xf8f   : > { %v1193_v21 = vsel %vm1192_vm9, %v1187_v20, %v1065_v58 }
 0xf90   : > { %1196 = vst.msk [vmem:[#allocation2] sm:$0x3] %vm1195_vm10, %v1193_v21  ;;  %1209 = vst.msk [vmem:[#allocation4] sm:$0x3] %vm1195_vm10, %v1193_v21 }
 0xf91   : > { %1558 = shalt.err (!%p1555_p6)
}
 0xf92   : > { %s1559_s20 = scalar_lea.hbm %s1871_s2, 32 }
 0xf93   : > { %p1560_p7 = scmp.ne.s32.totalorder %s1871_s2, %s1559_s20  ;;  %p1565_p10 = scmp.lt.u32.totalorder %s1559_s20, %s1871_s2 }
 0xf95   : > { %p1561_p8 = pnand %p1560_p7, %p1434_p13 }
 0xf97   : > { %p1562_p9 = pneg %p1561_p8 }
 0xf99   : > { %p1567_p11 = pnand %p1565_p10, %p1562_p9 }
 0xf9b   : > { %1570 = shalt.err (!%p1567_p11)
}
 0xf9c   : > { %1431 = dma.vmem_to_hbm [thread:$0]  (%p1434_p13), %s1218_s15, 32, %s1871_s2, [#allocation5]  }
 0xf9d   : > { %1576 = dma.done.wait (%p1434_p13), [#allocation5], 32  }
 0xf9e   : > { %1578 = vsyncadd (%p1434_p13), [#allocation5], 4294967264 }
 0xf9f PF: > { %s13_s9 = sadd.s32 1, %s1581_s9  }
 0xfa0   : > { %p10_p12 = scmp.ge.s32.totalorder %s13_s9, 6  }
 0xfa2   :  { %12 = sbr.rel (!%p10_p12) target bundleno = 1 (0x1), region = 66 }
 0xfa9   :  { %1230 = vsyncpa [#allocation5], 1 }
 0xfaa   :  { %1232 = vsyncpa [#allocation5 + $0x1], 1 }

// kernel: multiconvnet_forward.2
= control target key start
LH: loop header
LB: loop body
LE: loop exit
PB: predicated region body
PF: predicated region fallthrough
CT: control target
= control target key end

     0   :  { %s3511_s0 = inlined_call_operand.vmem [shape: f32[2,32,4], index: 0, kind: input, shape index: {}]   ;;  %s3512_s1 = inlined_call_operand.vmem [shape: f32[28,256], index: 1, kind: input, shape index: {}]   ;;  %s3513_s2 = inlined_call_operand.vmem [shape: f32[1,256], index: 2, kind: input, shape index: {}]   ;;  %s3514_s3 = inlined_call_operand.vmem [shape: f32[256,64], index: 3, kind: input, shape index: {}]   ;;  %s3515_s4 = inlined_call_operand.vmem [shape: f32[1,64], index: 4, kind: input, shape index: {}]   ;;  %s3516_s5 = inlined_call_operand.vmem [shape: f32[448,256], index: 5, kind: input, shape index: {}]   ;;  %s3517_s6 = inlined_call_operand.vmem [shape: f32[1,256], index: 6, kind: input, shape index: {}]   ;;  %s3518_s7 = inlined_call_operand.vmem [shape: f32[256,64], index: 7, kind: input, shape index: {}]   ;;  %s3519_s8 = inlined_call_operand.vmem [shape: f32[1,64], index: 8, kind: input, shape index: {}]   ;;  %s3520_s9 = inlined_call_operand.hbm [shape: f32[448,256], index: 9, kind: input, shape index: {}]   ;;  %s3521_s10 = inlined_call_operand.vmem [shape: f32[1,256], index: 10, kind: input, shape index: {}]   ;;  %s3522_s11 = inlined_call_operand.vmem [shape: f32[256,64], index: 11, kind: input, shape index: {}]   ;;  %s3523_s12 = inlined_call_operand.vmem [shape: f32[1,64], index: 12, kind: input, shape index: {}]   ;;  %s3524_s13 = inlined_call_operand.vmem [shape: f32[64,256], index: 13, kind: input, shape index: {}]   ;;  %s3525_s14 = inlined_call_operand.vmem [shape: f32[1,256], index: 14, kind: input, shape index: {}]   ;;  %s3526_s15 = inlined_call_operand.vmem [shape: f32[2,32,256], index: 15, kind: output, shape index: {}]  }
   0x1   :  { %3533 = sst [smem:[#allocation13_spill]] %s3520_s9 }
   0x2   :  { %20 = vsyncpa [#allocation6], 0  ;;  %s2587_s18 = smov 0   ;;  %s2589_s19 = smov 0  }
   0x3   :  { %s2591_s20 = smov 0   ;;  %s2593_s21 = smov 0  }
   0x4   :  { %s2595_s22 = smov 0  }
   0x5 LB: > { %3534 = sst [smem:[#allocation8_spill]] %s2484_s20  ;;  %s1866_s23 = sadd.s32 4294967295, %s2492_s22   ;;  %s2492_s22 = sphi %s2595_s22, %s26_s22   ;;  %s2488_s21 = sphi %s2593_s21, %s3551_s21   ;;  %s2484_s20 = sphi %s2591_s20, %s3550_s20   ;;  %s2480_s19 = sphi %s2589_s19, %s3549_s19   ;;  %s2476_s18 = sphi %s2587_s18, %s3548_s18  }
   0x6   : > { %3535 = sst [smem:[#allocation9_spill]] %s2488_s21  ;;  %s35_s24 = sadd.s32 1, %s2484_s20 }
   0x7   : > { %3536 = sst [smem:[#allocation10_spill]] %s2492_s22  ;;  %p36_p0 = scmp.ge.s32.totalorder %s35_s24, 4 }
   0x8   : > { %s38_s25 = sadd.s32 1, %s2488_s21  ;;  %p1868_p1 = scmp.ge.s32.totalorder %s2492_s22, 1 }
   0x9   : > { %p393_p2 = scmp.lt.s32.totalorder %s2492_s22, 9  ;;  %s3553_s24 = smov (%p36_p0, %s35_s24), 0 }
   0xa   : > { %3537 = sst [smem:[#allocation11_spill]] %s3553_s24  ;;  %s3555_s25 = smov (!%p36_p0, %s38_s25), %s2488_s21 }
   0xb   : > { %p2620_p3 = pnand %p1868_p1, %p393_p2  ;;  %p40_p4 = scmp.ge.s32.totalorder %s3555_s25, 2 }
   0xc   : > { %p2624_p5 = scmp.eq.s32.totalorder %s1866_s23, 0  ;;  %s2494_s28 = smov [#allocation5]  }
   0xd   : > { %s3538_s26 = scalar_select %p2620_p3, 1, 0 }
   0xe   : > { %s3539_s27 = scalar_select %p2624_p5, 1, 0 }
   0xf   : > { %p2353_p6 = pneg %p2620_p3  ;;  %s3557_s25 = smov (%p40_p4, %s3555_s25), 0 }
  0x10   : > { %3540 = sst [smem:[#allocation12_spill]] %s3557_s25  ;;  %s429_s29 = sshll.u32 %s2494_s28, 4  ;;  %s430_s29 = int_to_ptr.vmem [resolvable:$true] %s429_s29 }
  0x11   : > { %p2634_p7 = pnand %p2624_p5, %p2353_p6  ;;  %s3542_s9 = sld [smem:[#allocation13_spill]] }
  0x13   : > { %p2424_p9 = pneg %p2634_p7 }
  0x17   : > { %s2422_s23 = scalar_lea.hbm %s3542_s9, 14336 }
  0x18   : > { %p2423_p8 = scmp.ne.s32.totalorder %s3542_s9, %s2422_s23  ;;  %p2429_p12 = scmp.lt.u32.totalorder %s2422_s23, %s3542_s9 }
  0x1a   : > { %p2425_p10 = pnand %p2424_p9, %p2423_p8 }
  0x1c   : > { %p2426_p11 = pneg %p2425_p10 }
  0x1e   : > { %p2431_p13 = pnand %p2429_p12, %p2426_p11 }
  0x20   : > { %2434 = shalt.err (!%p2431_p13)
}
  0x21   : > { %s2435_s20 = scalar_lea.vmem %s430_s29, 14336  ;;  %p2443_p4 = scmp.lt.s32.totalorder %s430_s29, %s430_s29 }
  0x22   : > { %p2436_p0 = scmp.ne.s32.totalorder %s430_s29, %s2435_s20  ;;  %p2444_p6 = scmp.lt.s32.totalorder %s2435_s20, %s2435_s20 }
  0x24   : > { %p2438_p1 = pnand %p2436_p0, %p2424_p9  ;;  %p2445_p5 = por %p2444_p6, %p2443_p4 }
  0x26   : > { %p2439_p2 = pneg %p2438_p1 }
  0x28   : > { %p2446_p3 = pnand %p2445_p5, %p2439_p2 }
  0x2a   : > { %2449 = shalt.err (!%p2446_p3)
}
  0x2b   : > { %s2495_s21 = smov 256   ;;  %s2496_s24 = smov 16  }
  0x2c   : > { %2356 = dma.hbm_to_vmem [thread:$0]  (!%p2634_p7), %s3542_s9, 14336, %s430_s29, [#allocation6], %s2495_s21, %s2495_s21, %s2496_s24  }
  0x2d   : > { %p3543_p8 = scmp.ne.s32.totalorder %s3538_s26, 0 }
  0x2e   : > { %p3544_p10 = scmp.ne.s32.totalorder (!%p3543_p8), %s3539_s27, 0 }
  0x2f   : > { %471 = sbr.rel (%p3543_p8) target bundleno = 2071 (0x817), region = 80 }
  0x36   : > { %2471 = dma.done.wait (%p3544_p10), [#allocation6], 14336  }
  0x37   : > { %2473 = vsyncadd (%p3544_p10), [#allocation6], 4294952960  ;;  %p526_p3 = scmp.lt.s32.totalorder %s2480_s19, 1  ;;  %p528_p5 = scmp.lt.s32.totalorder %s2476_s18, 3 }
  0x38   : > { %p1878_p7 = scmp.ne.s32.totalorder %s2476_s18, 0 }
  0x39   : > { %s3559_s19 = smov (!%p526_p3, %s2480_s19), 1  ;;  %vm547_vm0 = vcmask (!%p1878_p7), 31744   ;;  %vm549_vm1 = vcmask (!%p1878_p7), 523264   ;;  %v2497_v0 = vmov (!%p1878_p7), 0.0  }
  0x3a   : > { %s529_s20 = scalar_select %p528_p5, %s2476_s18, 3 }
  0x3b   : > { %s1873_s25 = sshll.u32 %s3559_s19, 2  ;;  %s1876_s30 = sshll.u32 %s3559_s19, 3  ;;  %548 = vst.msk [vmem:[#allocation2] sm:$0xff] (!%p1878_p7), %vm547_vm0, %v2497_v0 }
  0x3c   : > { %s531_s29 = sadd.s32 %s1873_s25, %s529_s20  ;;  %s1875_s23 = sshll.u32 %s529_s20, 1  ;;  %550 = vst.msk [vmem:[#allocation3] sm:$0xff] (!%p1878_p7), %vm549_vm1, %v2497_v0  ;;  %551 = vst.msk [vmem:[#allocation4] sm:$0xff] (!%p1878_p7), %vm549_vm1, %v2497_v0 }
  0x3d   : > { %s1874_s26 = sshll.u32 %s531_s29, 3  ;;  %s540_s28 = sadd.s32 %s1876_s30, %s1875_s23 }
  0x3e   : > { %s533_s16 = scalar_lea.vmem %s3511_s0, %s1874_s26  ;;  %s1877_s27 = sshll.u32 %s540_s28, 3 }
  0x3f   : > { %s2670_s22 = scalar_lea.vmem %s3526_s15, %s1877_s27  ;;  %546 = sbr.rel (%p1878_p7) target bundleno = 70 (0x46), region = 88 }
  0x46 PF: > { %v2673_v1 = vld [vmem:[%s533_s16] sm:$0xff]  ;;  %vm556_vm2 = vcmask 1040384   ;;  %vm570_vm3 = vcmask 1042432   ;;  %vm563_vm4 = vcmask 1041408   ;;  %vm577_vm5 = vcmask 1043456   ;;  %v611_v13 = vld [vmem:[%s3512_s1 + $0x8] sm:$0xff] }
  0x47   : > { %v553_v2 = vld [vmem:[#allocation2] sm:$0xff]  ;;  %v558_v4 = vrot.slane %v2673_v1, 7  ;;  %v572_v6 = vrot.slane %v2673_v1, 5  ;;  %v565_v8 = vrot.slane %v2673_v1, 6  ;;  %v579_v12 = vrot.slane %v2673_v1, 4  ;;  %v613_v14 = vld [vmem:[%s3512_s1 + $0x18] sm:$0xff] }
  0x48   : > { %v557_v3 = vrot.slane %v553_v2, 7  ;;  %v571_v5 = vrot.slane %v553_v2, 5  ;;  %v564_v7 = vrot.slane %v553_v2, 6  ;;  %v578_v11 = vrot.slane %v553_v2, 4  ;;  %v610_v15 = vld [vmem:[%s3512_s1] sm:$0xff]  ;;  %s2498_s29 = smov 4  }
  0x49   : > { %s2499_s23 = smov 12   ;;  %vm584_vm6 = vcmask 1044480   ;;  %v585_v16 = vrot.slane %v553_v2, 3  ;;  %v586_v17 = vrot.slane %v2673_v1, 3  ;;  %v612_v18 = vld [vmem:[%s3512_s1 + $0x10] sm:$0xff]  ;;  %v592_v21 = vrot.slane %v553_v2, 2 }
  0x4a   : > { %v559_v9 = vsel %vm556_vm2, %v557_v3, %v558_v4  ;;  %v573_v10 = vsel %vm570_vm3, %v571_v5, %v572_v6  ;;  %v566_v19 = vsel %vm563_vm4, %v564_v7, %v565_v8  ;;  %v580_v20 = vsel %vm577_vm5, %v578_v11, %v579_v12  ;;  %v615_v23 = vld [vmem:[%s3512_s1 + $0x28] sm:$0xff]  ;;  %v617_v24 = vld [vmem:[%s3512_s1 + $0x38] sm:$0xf]  ;;  %v614_v25 = vld [vmem:[%s3512_s1 + $0x20] sm:$0xff]  ;;  %s2500_s27 = smov 8   ;;  %s2501_s17 = smov 16  }
  0x4b   : > { %560 = vrot.lane.b32.xlu0 %v559_v9, %s2498_s29  ;;  %574 = vrot.lane.b32.xlu1 %v573_v10, %s2499_s23  ;;  %v593_v22 = vrot.slane %v2673_v1, 2  ;;  %vm591_vm7 = vcmask 1045504   ;;  %vm598_vm8 = vcmask 31744   ;;  %v1995_v26 = vpack.c.bf16 %v613_v14, %v611_v13  ;;  %v616_v28 = vld [vmem:[%s3512_s1 + $0x30] sm:$0xf]  ;;  %v729_v29 = vld [vmem:[%s3514_s3 + $0x80] sm:$0xff] }
  0x4c   : > { %v1997_v27 = vpack.c.bf16 %v612_v18, %v610_v15  ;;  %v730_v30 = vld [vmem:[%s3514_s3 + $0x88] sm:$0xff]  ;;  %1654 = vst.msk [vmem:[#allocation2] sm:$0xff] %vm598_vm8, %v2673_v1  ;;  %v713_v31 = vld [vmem:[%s3514_s3] sm:$0xff]  ;;  %v731_v33 = vld [vmem:[%s3514_s3 + $0x90] sm:$0xff]  ;;  %v1999_v34 = vpack.c.bf16 %v617_v24, %v615_v23  ;;  %v587_v36 = vsel %vm584_vm6, %v585_v16, %v586_v17  ;;  %vm2502_vm9 = vmmov 1   ;;  %s2504_s21 = smov 20  }
  0x4d   : > { %v714_v32 = vld [vmem:[%s3514_s3 + $0x8] sm:$0xff]  ;;  %v732_v35 = vld [vmem:[%s3514_s3 + $0x98] sm:$0xff]  ;;  %v594_v37 = vsel %vm591_vm7, %v592_v21, %v593_v22  ;;  %1996 = vmatprep.subr.bf16.mxu0 %v1995_v26  ;;  %vm2732_vm10 = vmpackc.low %vm577_vm5, %vm2502_vm9  ;;  %v2005_v39 = vpack.c.bf16 %v730_v30, %v729_v29  ;;  %v2002_v40 = vpack.c.bf16 %v616_v28, %v614_v25  ;;  %v2503_v41 = vmov 0.0   ;;  %s2505_s24 = smov 24   ;;  %s2506_s16 = smov 64  }
  0x4e   : > { %1998 = vmatpush1.bf16.msra.mxu0 %v1997_v27  ;;  %704 = vmatprep.mubr.f32.mxu0 %v2503_v41  ;;  %v2007_v42 = vpack.c.bf16 %v714_v32, %v713_v31  ;;  %v2009_v43 = vpack.c.bf16 %v732_v35, %v731_v33  ;;  %v715_v44 = vld [vmem:[%s3514_s3 + $0x10] sm:$0xff]  ;;  %v716_v45 = vld [vmem:[%s3514_s3 + $0x18] sm:$0xff]  ;;  %v733_v46 = vld [vmem:[%s3514_s3 + $0xa0] sm:$0xff]  ;;  %vm600_vm11 = vcmask 64512   ;;  %vm602_vm12 = vcmask 97280  }
  0x4f   : > { %567 = vrot.lane.b32.xlu0 %v566_v19, %s2500_s27  ;;  %581 = vrot.lane.b32.xlu1 %v580_v20, %s2501_s17  ;;  %v734_v47 = vld [vmem:[%s3514_s3 + $0xa8] sm:$0xff]  ;;  %v2011_v48 = vpack.c.bf16 %v716_v45, %v715_v44  ;;  %v717_v50 = vld [vmem:[%s3514_s3 + $0x20] sm:$0xff]  ;;  %vm604_vm13 = vcmask 130048   ;;  %vm606_vm14 = vcmask 162816   ;;  %vm608_vm15 = vcmask 195584  }
  0x50   : > { %2001 = vmatprep.subr.msk.bf16.mxu0 %vm2732_vm10, %v1999_v34  ;;  %2006 = vmatprep.subr.bf16.mxu1 %v2005_v39  ;;  %v2013_v49 = vpack.c.bf16 %v734_v47, %v733_v46  ;;  %v718_v51 = vld [vmem:[%s3514_s3 + $0x28] sm:$0xff]  ;;  %v735_v52 = vld [vmem:[%s3514_s3 + $0xb0] sm:$0xff]  ;;  %v736_v53 = vld [vmem:[%s3514_s3 + $0xb8] sm:$0xff]  ;;  %vm630_vm0 = vcmask 228352   ;;  %v620_v31 = vlaneseq  ;;  %vm855_vm1 = vcmask 523264  }
  0x51   : > { %2008 = vmatpush3.bf16.msra.mxu1 %v2007_v42  ;;  %v2015_v54 = vpack.c.bf16 %v718_v51, %v717_v50  ;;  %v2017_v55 = vpack.c.bf16 %v736_v53, %v735_v52  ;;  %v719_v56 = vld [vmem:[%s3514_s3 + $0x30] sm:$0xff]  ;;  %v720_v57 = vld [vmem:[%s3514_s3 + $0x38] sm:$0xff]  ;;  %v737_v58 = vld [vmem:[%s3514_s3 + $0xc0] sm:$0xff] }
  0x52   : > { %2004 = vmatpush1.bf16.msk.msra.mxu0 %vm2732_vm10, %v2002_v40  ;;  %2010 = vmatprep.subr.bf16.mxu1 %v2009_v43  ;;  %v738_v59 = vld [vmem:[%s3514_s3 + $0xc8] sm:$0xff]  ;;  %v2019_v60 = vpack.c.bf16 %v720_v57, %v719_v56  ;;  %v721_v62 = vld [vmem:[%s3514_s3 + $0x40] sm:$0xff]  ;;  %v739_v0 = vld [vmem:[%s3514_s3 + $0xd0] sm:$0xff]  ;;  %v621_v32 = vshrl.u32 %v620_v31, 7 }
  0x53   : > { %588 = vrot.lane.b32.xlu0 %v587_v36, %s2504_s21  ;;  %595 = vrot.lane.b32.xlu1 %v594_v37, %s2505_s24  ;;  %v2021_v61 = vpack.c.bf16 %v738_v59, %v737_v58  ;;  %v722_v63 = vld [vmem:[%s3514_s3 + $0x48] sm:$0xff]  ;;  %v740_v2 = vld [vmem:[%s3514_s3 + $0xd8] sm:$0xff] }
  0x54   : > { %v2023_v3 = vpack.c.bf16 %v722_v63, %v721_v62  ;;  %v2025_v4 = vpack.c.bf16 %v740_v2, %v739_v0  ;;  %v723_v5 = vld [vmem:[%s3514_s3 + $0x50] sm:$0xff]  ;;  %v724_v6 = vld [vmem:[%s3514_s3 + $0x58] sm:$0xff]  ;;  %v741_v7 = vld [vmem:[%s3514_s3 + $0xe0] sm:$0xff]  ;;  %v2821_v33 = vsub.s32 0, %v621_v32  ;;  %v2826_v35 = vsub.s32 1, %v621_v32 }
  0x55   : > { %2012 = vmatpush3.bf16.msra.mxu1 %v2011_v48  ;;  %v742_v8 = vld [vmem:[%s3514_s3 + $0xe8] sm:$0xff]  ;;  %v2027_v9 = vpack.c.bf16 %v724_v6, %v723_v5  ;;  %v725_v23 = vld [vmem:[%s3514_s3 + $0x60] sm:$0xff]  ;;  %v743_v25 = vld [vmem:[%s3514_s3 + $0xf0] sm:$0xff] }
  0x56   : > { %2014 = vmatprep.subr.bf16.mxu1 %v2013_v49  ;;  %v2029_v10 = vpack.c.bf16 %v742_v8, %v741_v7  ;;  %v744_v26 = vld [vmem:[%s3514_s3 + $0xf8] sm:$0xff]  ;;  %v727_v28 = vld [vmem:[%s3514_s3 + $0x70] sm:$0xff]  ;;  %v618_v34 = vld [vmem:[%s3513_s2] sm:$0x3] }
  0x57   : > { %v2033_v27 = vpack.c.bf16 %v744_v26, %v743_v25  ;;  %v728_v29 = vld [vmem:[%s3514_s3 + $0x78] sm:$0xff]  ;;  %v623_v36 = vrot.slane %v618_v34, %v2821_v33  ;;  %v627_v37 = vrot.slane %v618_v34, %v2826_v35  ;;  %v860_v45 = vld [vmem:[%s3516_s5 + $0x8] sm:$0xff]  ;;  %v859_v47 = vld [vmem:[%s3516_s5] sm:$0xff] }
  0x58   : > { %v2035_v30 = vpack.c.bf16 %v728_v29, %v727_v28  ;;  %v862_v46 = vld [vmem:[%s3516_s5 + $0x18] sm:$0xff]  ;;  %v861_v49 = vld [vmem:[%s3516_s5 + $0x10] sm:$0xff]  ;;  %v864_v50 = vld [vmem:[%s3516_s5 + $0x28] sm:$0xff] }
  0x59   : > { %2016 = vmatpush3.bf16.msra.mxu1 %v2015_v54  ;;  %v2037_v48 = vpack.c.bf16 %v862_v46, %v860_v45  ;;  %v866_v51 = vld [vmem:[%s3516_s5 + $0x38] sm:$0xff]  ;;  %v2039_v52 = vpack.c.bf16 %v861_v49, %v859_v47  ;;  %v863_v54 = vld [vmem:[%s3516_s5 + $0x20] sm:$0xff]  ;;  %v868_v56 = vld [vmem:[%s3516_s5 + $0x48] sm:$0xff] }
  0x5a   : > { %2018 = vmatprep.subr.bf16.mxu1 %v2017_v55  ;;  %v2041_v53 = vpack.c.bf16 %v866_v51, %v864_v50  ;;  %v865_v55 = vld [vmem:[%s3516_s5 + $0x30] sm:$0xff]  ;;  %v870_v57 = vld [vmem:[%s3516_s5 + $0x58] sm:$0xff]  ;;  %v872_v62 = vld [vmem:[%s3516_s5 + $0x68] sm:$0xff] }
  0x5b   : > { %2038 = vmatprep.subr.bf16.mxu0 %v2037_v48  ;;  %v2043_v58 = vpack.c.bf16 %v865_v55, %v863_v54  ;;  %v2045_v59 = vpack.c.bf16 %v870_v57, %v868_v56  ;;  %v874_v63 = vld [vmem:[%s3516_s5 + $0x78] sm:$0xff]  ;;  %v876_v5 = vld [vmem:[%s3516_s5 + $0x88] sm:$0xff]  ;;  %v887_v26 = vld [vmem:[%s3516_s5 + $0xe0] sm:$0xff] }
  0x5c   : > { %v2049_v2 = vpack.c.bf16 %v874_v63, %v872_v62  ;;  %v878_v6 = vld [vmem:[%s3516_s5 + $0x98] sm:$0xff]  ;;  %v892_v28 = vld [vmem:[%s3516_s5 + $0x108] sm:$0xff]  ;;  %v891_v32 = vld [vmem:[%s3516_s5 + $0x100] sm:$0xff] }
  0x5d   : > { %2020 = vmatpush3.bf16.msra.mxu1 %v2019_v60  ;;  %v867_v60 = vld [vmem:[%s3516_s5 + $0x40] sm:$0xff]  ;;  %v2053_v8 = vpack.c.bf16 %v878_v6, %v876_v5  ;;  %v894_v29 = vld [vmem:[%s3516_s5 + $0x118] sm:$0xff]  ;;  %v893_v34 = vld [vmem:[%s3516_s5 + $0x110] sm:$0xff] }
  0x5e   : > { %2022 = vmatprep.subr.bf16.mxu1 %v2021_v61  ;;  %v869_v61 = vld [vmem:[%s3516_s5 + $0x50] sm:$0xff]  ;;  %v2069_v31 = vpack.c.bf16 %v894_v29, %v892_v28  ;;  %v899_v47 = vld [vmem:[%s3516_s5 + $0x140] sm:$0xff]  ;;  %v904_v49 = vld [vmem:[%s3516_s5 + $0x168] sm:$0xff] }
  0x5f   : > { %v2047_v0 = vpack.c.bf16 %v869_v61, %v867_v60  ;;  %v901_v48 = vld [vmem:[%s3516_s5 + $0x150] sm:$0xff]  ;;  %v906_v50 = vld [vmem:[%s3516_s5 + $0x178] sm:$0xff]  ;;  %v908_v55 = vld [vmem:[%s3516_s5 + $0x188] sm:$0xff] }
  0x60   : > { %v2079_v51 = vpack.c.bf16 %v901_v48, %v899_v47  ;;  %v905_v54 = vld [vmem:[%s3516_s5 + $0x170] sm:$0xff]  ;;  %v910_v56 = vld [vmem:[%s3516_s5 + $0x198] sm:$0xff]  ;;  %v912_v61 = vld [vmem:[%s3516_s5 + $0x1a8] sm:$0xff] }
  0x61   : > { %2024 = vmatpush3.bf16.msra.mxu1 %v2023_v3  ;;  %v871_v3 = vld [vmem:[%s3516_s5 + $0x60] sm:$0xff]  ;;  %v909_v60 = vld [vmem:[%s3516_s5 + $0x190] sm:$0xff]  ;;  %v914_v62 = vld [vmem:[%s3516_s5 + $0x1b8] sm:$0xff] }
  0x62   : > { %2026 = vmatprep.subr.bf16.mxu1 %v2025_v4  ;;  %v873_v4 = vld [vmem:[%s3516_s5 + $0x70] sm:$0xff]  ;;  %v918_v5 = vld [vmem:[%s3516_s5 + $0x1d8] sm:$0xff] }
  0x63   : > { %v2051_v7 = vpack.c.bf16 %v873_v4, %v871_v3  ;;  %v913_v3 = vld [vmem:[%s3516_s5 + $0x1b0] sm:$0xff]  ;;  %v916_v4 = vld [vmem:[%s3516_s5 + $0x1c8] sm:$0xff] }
  0x64   : > { %v1131_v48 = vld [vmem:[%s3518_s7 + $0x10] sm:$0xff] }
  0x65   : > { %2028 = vmatpush3.bf16.msra.mxu1 %v2027_v9  ;;  %v875_v9 = vld [vmem:[%s3516_s5 + $0x80] sm:$0xff] }
  0x66   : > { %2030 = vmatprep.subr.bf16.mxu1 %v2029_v10  ;;  %v877_v10 = vld [vmem:[%s3516_s5 + $0x90] sm:$0xff] }
  0xbd   : > { %v561_v11 = vpop.permute.xlu0 %560  ;;  %v575_v12 = vpop.permute.xlu1 %574 }
  0xbe   : > { %v599_v13 = vsel %vm598_vm8, %v2673_v1, %v561_v11  ;;  %v726_v1 = vld [vmem:[%s3514_s3 + $0x68] sm:$0xff] }
  0xbf   : > { %v2031_v24 = vpack.c.bf16 %v726_v1, %v725_v23  ;;  %v880_v11 = vld [vmem:[%s3516_s5 + $0xa8] sm:$0xff]  ;;  %v890_v1 = vld [vmem:[%s3516_s5 + $0xf8] sm:$0xff] }
  0xc0   : > { %v888_v23 = vld [vmem:[%s3516_s5 + $0xe8] sm:$0xff] }
  0xc1   : > { %v568_v14 = vpop.permute.xlu0 %567  ;;  %v582_v15 = vpop.permute.xlu1 %581  ;;  %2032 = vmatpush3.bf16.msra.mxu1 %v2031_v24  ;;  %v2065_v25 = vpack.c.bf16 %v890_v1, %v888_v23  ;;  %v3031_v1 = vld [vmem:[#allocation3] sm:$0xff] }
  0xc2   : > { %v601_v16 = vsel %vm600_vm11, %v599_v13, %v568_v14  ;;  %2034 = vmatprep.subr.bf16.mxu1 %v2033_v27  ;;  %v2055_v13 = vpack.c.bf16 %v877_v10, %v875_v9  ;;  %v889_v27 = vld [vmem:[%s3516_s5 + $0xf0] sm:$0xff]  ;;  %v836_v28 = vrot.slane %v3031_v1, 5 }
  0xc3   : > { %v603_v17 = vsel %vm602_vm12, %v601_v16, %v575_v12  ;;  %v882_v12 = vld [vmem:[%s3516_s5 + $0xb8] sm:$0xff]  ;;  %v881_v16 = vld [vmem:[%s3516_s5 + $0xb0] sm:$0xff] }
  0xc4   : > { %v605_v18 = vsel %vm604_vm13, %v603_v17, %v582_v15  ;;  %v2057_v14 = vpack.c.bf16 %v882_v12, %v880_v11  ;;  %v879_v15 = vld [vmem:[%s3516_s5 + $0xa0] sm:$0xff]  ;;  %v884_v17 = vld [vmem:[%s3516_s5 + $0xc8] sm:$0xff]  ;;  %v917_v9 = vld [vmem:[%s3516_s5 + $0x1d0] sm:$0xff] }
  0xc5   : > { %v589_v19 = vpop.permute.xlu0 %588  ;;  %v596_v20 = vpop.permute.xlu1 %595  ;;  %2036 = vmatpush3.bf16.msra.mxu1 %v2035_v30  ;;  %v2067_v30 = vpack.c.bf16 %v889_v27, %v887_v26  ;;  %v920_v11 = vld [vmem:[%s3516_s5 + $0x1e8] sm:$0xff]  ;;  %v922_v12 = vld [vmem:[%s3516_s5 + $0x1f8] sm:$0xff]  ;;  %v846_v26 = vrot.slane %v3031_v1, 3  ;;  %v826_v27 = vrot.slane %v3031_v1, 7 }
  0xc6   : > { %v607_v21 = vsel %vm606_vm14, %v605_v18, %v589_v19  ;;  %v886_v18 = vld [vmem:[%s3516_s5 + $0xd8] sm:$0xff]  ;;  %v2059_v19 = vpack.c.bf16 %v881_v16, %v879_v15  ;;  %v921_v15 = vld [vmem:[%s3516_s5 + $0x1f0] sm:$0xff] }
  0xc7   : > { %v609_v22 = vsel %vm608_vm15, %v607_v21, %v596_v20  ;;  %v2061_v20 = vpack.c.bf16 %v886_v18, %v884_v17  ;;  %v883_v21 = vld [vmem:[%s3516_s5 + $0xc0] sm:$0xff] }
  0xc8   : > { %1881 = vmatmul.mubr.msk.f32.vlgmr.msra.gmra.mrb[0].mxu0 %vm630_vm0, %v609_v22  ;;  %v885_v22 = vld [vmem:[%s3516_s5 + $0xd0] sm:$0xff]  ;;  %v1882_v18 = vld [vmem:[%s3515_s4] ss:$0 sm:$0xff] }
  0xc9   : > { %2040 = vmatpush1.bf16.msra.mxu0 %v2039_v52  ;;  %v2063_v24 = vpack.c.bf16 %v885_v22, %v883_v21  ;;  %v2081_v52 = vpack.c.bf16 %v906_v50, %v904_v49  ;;  %v926_v21 = vld [vmem:[%s3516_s5 + $0x218] sm:$0xff]  ;;  %v1149_v50 = vld [vmem:[%s3518_s7 + $0xa0] sm:$0xff] }
  0xca   : > { %2042 = vmatprep.subr.bf16.mxu0 %v2041_v53  ;;  %v903_v53 = vld [vmem:[%s3516_s5 + $0x160] sm:$0xff]  ;;  %v1132_v49 = vld [vmem:[%s3518_s7 + $0x18] sm:$0xff] }
  0xcb   : > { %v2083_v57 = vpack.c.bf16 %v905_v54, %v903_v53  ;;  %v1133_v54 = vld [vmem:[%s3518_s7 + $0x20] sm:$0xff] }
  0xcd   : > { %2044 = vmatpush1.bf16.msra.mxu0 %v2043_v58  ;;  %v2085_v58 = vpack.c.bf16 %v910_v56, %v908_v55  ;;  %v1134_v55 = vld [vmem:[%s3518_s7 + $0x28] sm:$0xff]  ;;  %v1151_v56 = vld [vmem:[%s3518_s7 + $0xb0] sm:$0xff] }
  0xce   : > { %2046 = vmatprep.subr.bf16.mxu0 %v2045_v59  ;;  %v907_v59 = vld [vmem:[%s3516_s5 + $0x180] sm:$0xff] }
  0xcf   : > { %v2087_v63 = vpack.c.bf16 %v909_v60, %v907_v59  ;;  %v1135_v60 = vld [vmem:[%s3518_s7 + $0x30] sm:$0xff] }
  0xd1   : > { %2048 = vmatpush1.bf16.msra.mxu0 %v2047_v0  ;;  %v2089_v0 = vpack.c.bf16 %v914_v62, %v912_v61  ;;  %v1136_v61 = vld [vmem:[%s3518_s7 + $0x38] sm:$0xff]  ;;  %v1153_v62 = vld [vmem:[%s3518_s7 + $0xc0] sm:$0xff] }
  0xd2   : > { %2050 = vmatprep.subr.bf16.mxu0 %v2049_v2  ;;  %v911_v2 = vld [vmem:[%s3516_s5 + $0x1a0] sm:$0xff] }
  0xd3   : > { %v2091_v6 = vpack.c.bf16 %v913_v3, %v911_v2  ;;  %v1137_v3 = vld [vmem:[%s3518_s7 + $0x40] sm:$0xff] }
  0xd5   : > { %2052 = vmatpush1.bf16.msra.mxu0 %v2051_v7  ;;  %v2093_v7 = vpack.c.bf16 %v918_v5, %v916_v4  ;;  %v1138_v4 = vld [vmem:[%s3518_s7 + $0x48] sm:$0xff]  ;;  %v1155_v5 = vld [vmem:[%s3518_s7 + $0xd0] sm:$0xff] }
  0xd6   : > { %2054 = vmatprep.subr.bf16.mxu0 %v2053_v8  ;;  %v915_v8 = vld [vmem:[%s3516_s5 + $0x1c0] sm:$0xff] }
  0xd7   : > { %v2095_v10 = vpack.c.bf16 %v917_v9, %v915_v8  ;;  %v1139_v9 = vld [vmem:[%s3518_s7 + $0x50] sm:$0xff] }
  0xd9   : > { %2056 = vmatpush1.bf16.msra.mxu0 %v2055_v13  ;;  %v2097_v13 = vpack.c.bf16 %v922_v12, %v920_v11  ;;  %v1157_v11 = vld [vmem:[%s3518_s7 + $0xe0] sm:$0xff]  ;;  %v1158_v12 = vld [vmem:[%s3518_s7 + $0xe8] sm:$0xff] }
  0xda   : > { %2058 = vmatprep.subr.bf16.mxu0 %v2057_v14  ;;  %v919_v14 = vld [vmem:[%s3516_s5 + $0x1e0] sm:$0xff] }
  0xdb   : > { %v2099_v16 = vpack.c.bf16 %v921_v15, %v919_v14  ;;  %v2173_v14 = vpack.c.bf16 %v1158_v12, %v1157_v11  ;;  %v832_v15 = vrot.slane %v3031_v1, 6  ;;  %v956_v11 = vld [vmem:[%s3516_s5 + $0x308] sm:$0xff]  ;;  %v958_v12 = vld [vmem:[%s3516_s5 + $0x318] sm:$0xff] }
  0xdd   : > { %2060 = vmatpush1.bf16.msra.mxu0 %v2059_v19 }
  0xde   : > { %2062 = vmatprep.subr.bf16.mxu0 %v2061_v20  ;;  %v924_v20 = vld [vmem:[%s3516_s5 + $0x208] sm:$0xff] }
  0xdf   : > { %v2101_v23 = vpack.c.bf16 %v926_v21, %v924_v20  ;;  %v928_v20 = vld [vmem:[%s3516_s5 + $0x228] sm:$0xff]  ;;  %v930_v21 = vld [vmem:[%s3516_s5 + $0x238] sm:$0xff] }
  0xe1   : > { %2064 = vmatpush1.bf16.msra.mxu0 %v2063_v24 }
  0xe2   : > { %2066 = vmatprep.subr.bf16.mxu0 %v2065_v25 }
  0xe5   : > { %2068 = vmatpush1.bf16.msra.mxu0 %v2067_v30 }
  0xe6   : > { %2070 = vmatprep.subr.bf16.mxu0 %v2069_v31 }
 0x19b   : > { %v706_v38 = vpop.f32.mrb[0].mxu0 }
 0x19c   : > { %v707_v39 = vadd.f32 %v706_v38, %v623_v36  ;;  %v708_v40 = vpop.f32.mrb[1].mxu0  ;;  %v896_v36 = vld [vmem:[%s3516_s5 + $0x128] sm:$0xff]  ;;  %v2071_v38 = vpack.c.bf16 %v893_v34, %v891_v32 }
 0x19d   : > { %v709_v42 = vadd.f32 %v708_v40, %v627_v37  ;;  %v898_v37 = vld [vmem:[%s3516_s5 + $0x138] sm:$0xff]  ;;  %v895_v40 = vld [vmem:[%s3516_s5 + $0x120] sm:$0xff] }
 0x19e   : > { %v711_v44 = vmax.f32 %v707_v39, 0.0  ;;  %v2073_v39 = vpack.c.bf16 %v898_v37, %v896_v36  ;;  %2072 = vmatpush1.bf16.msra.mxu0 %v2071_v38  ;;  %v1145_v38 = vld [vmem:[%s3518_s7 + $0x80] sm:$0xff] }
 0x19f   : > { %v712_v43 = vmax.f32 %v709_v42, 0.0  ;;  %v897_v42 = vld [vmem:[%s3516_s5 + $0x130] sm:$0xff] }
 0x1a0   : > { %v2075_v45 = vpack.c.bf16 %v897_v42, %v895_v40  ;;  %2074 = vmatprep.subr.bf16.mxu0 %v2073_v39  ;;  %v1146_v39 = vld [vmem:[%s3518_s7 + $0x88] sm:$0xff]  ;;  %v1129_v40 = vld [vmem:[%s3518_s7] sm:$0xff] }
 0x1a1   : > { %816 = vmatprep.mubr.f32.mxu1 %v712_v43  ;;  %v900_v43 = vld [vmem:[%s3516_s5 + $0x148] sm:$0xff]  ;;  %v2149_v42 = vpack.c.bf16 %v1146_v39, %v1145_v38 }
 0x1a2   : > { %817 = vmatmul.mubr.f32.vlgmr.msra.gmra.mrb[0].mxu1 %v711_v44  ;;  %v902_v44 = vld [vmem:[%s3516_s5 + $0x158] sm:$0xff]  ;;  %2076 = vmatpush1.bf16.msra.mxu0 %v2075_v45 }
 0x1a3   : > { %v2077_v46 = vpack.c.bf16 %v902_v44, %v900_v43  ;;  %v1130_v43 = vld [vmem:[%s3518_s7 + $0x8] sm:$0xff]  ;;  %v1147_v44 = vld [vmem:[%s3518_s7 + $0x90] sm:$0xff]  ;;  %v1148_v45 = vld [vmem:[%s3518_s7 + $0x98] sm:$0xff]  ;;  %2150 = vmatprep.subr.bf16.mxu1 %v2149_v42 }
 0x1a4   : > { %v2153_v47 = vpack.c.bf16 %v1148_v45, %v1147_v44  ;;  %v931_v42 = vld [vmem:[%s3516_s5 + $0x240] sm:$0xff]  ;;  %v936_v44 = vld [vmem:[%s3516_s5 + $0x268] sm:$0xff]  ;;  %v938_v45 = vld [vmem:[%s3516_s5 + $0x278] sm:$0xff] }
 0x1a5   : > { %2078 = vmatprep.subr.bf16.mxu0 %v2077_v46  ;;  %v2151_v46 = vpack.c.bf16 %v1130_v43, %v1129_v40  ;;  %v933_v43 = vld [vmem:[%s3516_s5 + $0x250] sm:$0xff] }
 0x1a6   : > { %2080 = vmatpush1.bf16.msra.mxu0 %v2079_v51  ;;  %v1150_v51 = vld [vmem:[%s3518_s7 + $0xa8] sm:$0xff] }
 0x1a7   : > { %2082 = vmatprep.subr.bf16.mxu0 %v2081_v52  ;;  %2152 = vmatpush3.bf16.msra.mxu1 %v2151_v46  ;;  %v2155_v52 = vpack.c.bf16 %v1132_v49, %v1131_v48  ;;  %v2157_v53 = vpack.c.bf16 %v1150_v51, %v1149_v50  ;;  %v2111_v46 = vpack.c.bf16 %v933_v43, %v931_v42  ;;  %v935_v48 = vld [vmem:[%s3516_s5 + $0x260] sm:$0xff]  ;;  %v937_v49 = vld [vmem:[%s3516_s5 + $0x270] sm:$0xff]  ;;  %v940_v50 = vld [vmem:[%s3516_s5 + $0x288] sm:$0xff] }
 0x1a8   : > { %2154 = vmatprep.subr.bf16.mxu1 %v2153_v47  ;;  %v2113_v47 = vpack.c.bf16 %v938_v45, %v936_v44  ;;  %v942_v51 = vld [vmem:[%s3516_s5 + $0x298] sm:$0xff]  ;;  %v1141_v45 = vld [vmem:[%s3518_s7 + $0x60] sm:$0xff] }
 0x1aa   : > { %2084 = vmatpush1.bf16.msra.mxu0 %v2083_v57  ;;  %v1152_v57 = vld [vmem:[%s3518_s7 + $0xb8] sm:$0xff] }
 0x1ab   : > { %2086 = vmatprep.subr.bf16.mxu0 %v2085_v58  ;;  %2156 = vmatpush3.bf16.msra.mxu1 %v2155_v52  ;;  %v2159_v58 = vpack.c.bf16 %v1134_v55, %v1133_v54  ;;  %v2161_v59 = vpack.c.bf16 %v1152_v57, %v1151_v56  ;;  %v2115_v52 = vpack.c.bf16 %v937_v49, %v935_v48  ;;  %v939_v54 = vld [vmem:[%s3516_s5 + $0x280] sm:$0xff]  ;;  %v941_v55 = vld [vmem:[%s3516_s5 + $0x290] sm:$0xff]  ;;  %v944_v56 = vld [vmem:[%s3516_s5 + $0x2a8] sm:$0xff] }
 0x1ac   : > { %2158 = vmatprep.subr.bf16.mxu1 %v2157_v53  ;;  %v2117_v53 = vpack.c.bf16 %v942_v51, %v940_v50  ;;  %v946_v57 = vld [vmem:[%s3516_s5 + $0x2b8] sm:$0xff]  ;;  %v1143_v49 = vld [vmem:[%s3518_s7 + $0x70] sm:$0xff] }
 0x1ad   : > { %v1144_v50 = vld [vmem:[%s3518_s7 + $0x78] sm:$0xff] }
 0x1ae   : > { %2088 = vmatpush1.bf16.msra.mxu0 %v2087_v63  ;;  %v1154_v63 = vld [vmem:[%s3518_s7 + $0xc8] sm:$0xff]  ;;  %v2179_v51 = vpack.c.bf16 %v1144_v50, %v1143_v49 }
 0x1af   : > { %2090 = vmatprep.subr.bf16.mxu0 %v2089_v0  ;;  %2160 = vmatpush3.bf16.msra.mxu1 %v2159_v58  ;;  %v2163_v0 = vpack.c.bf16 %v1136_v61, %v1135_v60  ;;  %v2165_v2 = vpack.c.bf16 %v1154_v63, %v1153_v62  ;;  %v2119_v58 = vpack.c.bf16 %v941_v55, %v939_v54  ;;  %v943_v60 = vld [vmem:[%s3516_s5 + $0x2a0] sm:$0xff]  ;;  %v945_v61 = vld [vmem:[%s3516_s5 + $0x2b0] sm:$0xff]  ;;  %v948_v62 = vld [vmem:[%s3516_s5 + $0x2c8] sm:$0xff] }
 0x1b0   : > { %2162 = vmatprep.subr.bf16.mxu1 %v2161_v59  ;;  %v2121_v59 = vpack.c.bf16 %v946_v57, %v944_v56  ;;  %v950_v63 = vld [vmem:[%s3516_s5 + $0x2d8] sm:$0xff] }
 0x1b2   : > { %2092 = vmatpush1.bf16.msra.mxu0 %v2091_v6  ;;  %v1156_v6 = vld [vmem:[%s3518_s7 + $0xd8] sm:$0xff] }
 0x1b3   : > { %2094 = vmatprep.subr.bf16.mxu0 %v2093_v7  ;;  %2164 = vmatpush3.bf16.msra.mxu1 %v2163_v0  ;;  %v2167_v7 = vpack.c.bf16 %v1138_v4, %v1137_v3  ;;  %v2169_v8 = vpack.c.bf16 %v1156_v6, %v1155_v5  ;;  %v2123_v0 = vpack.c.bf16 %v945_v61, %v943_v60  ;;  %v947_v3 = vld [vmem:[%s3516_s5 + $0x2c0] sm:$0xff]  ;;  %v949_v4 = vld [vmem:[%s3516_s5 + $0x2d0] sm:$0xff]  ;;  %v952_v5 = vld [vmem:[%s3516_s5 + $0x2e8] sm:$0xff] }
 0x1b4   : > { %2166 = vmatprep.subr.bf16.mxu1 %v2165_v2  ;;  %v2125_v2 = vpack.c.bf16 %v950_v63, %v948_v62  ;;  %v954_v6 = vld [vmem:[%s3516_s5 + $0x2f8] sm:$0xff]  ;;  %v1275_v61 = vld [vmem:[#allocation5 + $0x8] sm:$0xff]  ;;  %v1277_v62 = vld [vmem:[#allocation5 + $0x18] sm:$0xff] }
 0x1b5   : > { %v1274_v63 = vld [vmem:[#allocation5] sm:$0xff] }
 0x1b6   : > { %2096 = vmatpush1.bf16.msra.mxu0 %v2095_v10  ;;  %v1140_v10 = vld [vmem:[%s3518_s7 + $0x58] sm:$0xff] }
 0x1b7   : > { %2098 = vmatprep.subr.bf16.mxu0 %v2097_v13  ;;  %2168 = vmatpush3.bf16.msra.mxu1 %v2167_v7  ;;  %v2171_v13 = vpack.c.bf16 %v1140_v10, %v1139_v9  ;;  %v2127_v7 = vpack.c.bf16 %v949_v4, %v947_v3  ;;  %v951_v9 = vld [vmem:[%s3516_s5 + $0x2e0] sm:$0xff]  ;;  %v953_v10 = vld [vmem:[%s3516_s5 + $0x2f0] sm:$0xff] }
 0x1b8   : > { %2170 = vmatprep.subr.bf16.mxu1 %v2169_v8  ;;  %v2129_v8 = vpack.c.bf16 %v954_v6, %v952_v5  ;;  %v1279_v3 = vld [vmem:[#allocation5 + $0x28] sm:$0xff]  ;;  %v1281_v4 = vld [vmem:[#allocation5 + $0x38] sm:$0xff] }
 0x1b9   : > { %v2185_v6 = vpack.c.bf16 %v1281_v4, %v1279_v3  ;;  %v1321_v3 = vld [vmem:[#allocation5 + $0x178] sm:$0xff] }
 0x1ba   : > { %2100 = vmatpush1.bf16.msra.mxu0 %v2099_v16 }
 0x1bb   : > { %2102 = vmatprep.subr.bf16.mxu0 %v2101_v23  ;;  %2172 = vmatpush3.bf16.msra.mxu1 %v2171_v13  ;;  %v2131_v13 = vpack.c.bf16 %v953_v10, %v951_v9  ;;  %v1283_v9 = vld [vmem:[#allocation5 + $0x48] sm:$0xff]  ;;  %v1285_v10 = vld [vmem:[#allocation5 + $0x58] sm:$0xff] }
 0x1bc   : > { %2174 = vmatprep.subr.bf16.mxu1 %v2173_v14  ;;  %v2133_v14 = vpack.c.bf16 %v958_v12, %v956_v11  ;;  %v2189_v12 = vpack.c.bf16 %v1285_v10, %v1283_v9  ;;  %v1325_v9 = vld [vmem:[#allocation5 + $0x198] sm:$0xff] }
 0x275   : > { %v1922_v17 = vpop.f32.mrb[0].mxu1 }
 0x276   : > { %v1923_v19 = vpop.f32.mrb[1].mxu1 }
 0x277   : > { %v1924_v22 = vadd.f32 %v1923_v19, %v1922_v17  ;;  %v923_v17 = vld [vmem:[%s3516_s5 + $0x200] sm:$0xff] }
 0x279   : > { %v819_v24 = vadd.f32 %v1924_v22, %v1882_v18  ;;  %v925_v18 = vld [vmem:[%s3516_s5 + $0x210] sm:$0xff] }
 0x27b   : > { %v3033_v25 = vmax.f32 %v819_v24, 0.0  ;;  %v852_v24 = vrot.slane %v3031_v1, 2 }
 0x27d   : > { %v847_v29 = vrot.slane %v3033_v25, 3  ;;  %1655 = vst.msk [vmem:[#allocation3] sm:$0xff] %vm855_vm1, %v3033_v25  ;;  %v827_v30 = vrot.slane %v3033_v25, 7  ;;  %v837_v31 = vrot.slane %v3033_v25, 5  ;;  %v833_v16 = vrot.slane %v3033_v25, 6 }
 0x27f   : > { %v848_v32 = vsel %vm584_vm6, %v846_v26, %v847_v29  ;;  %v828_v34 = vsel %vm556_vm2, %v826_v27, %v827_v30  ;;  %v838_v36 = vsel %vm570_vm3, %v836_v28, %v837_v31  ;;  %v853_v26 = vrot.slane %v3033_v25, 2 }
 0x280   : > { %849 = vrot.lane.b32.xlu1 %v848_v32, %s2506_s16  ;;  %v2412_v37 = vpack.i.bf16 %v828_v34, %v838_v36  ;;  %v834_v27 = vsel %vm563_vm4, %v832_v15, %v833_v16  ;;  %v2103_v28 = vpack.c.bf16 %v925_v18, %v923_v17  ;;  %v2105_v31 = vpack.c.bf16 %v930_v21, %v928_v20  ;;  %v927_v32 = vld [vmem:[%s3516_s5 + $0x220] sm:$0xff]  ;;  %v929_v34 = vld [vmem:[%s3516_s5 + $0x230] sm:$0xff]  ;;  %v932_v36 = vld [vmem:[%s3516_s5 + $0x248] sm:$0xff] }
 0x281   : > { %v854_v38 = vsel %vm591_vm7, %v852_v24, %v853_v26  ;;  %v2107_v39 = vpack.c.bf16 %v929_v34, %v927_v32  ;;  %v955_v15 = vld [vmem:[%s3516_s5 + $0x300] sm:$0xff]  ;;  %v957_v16 = vld [vmem:[%s3516_s5 + $0x310] sm:$0xff]  ;;  %v960_v17 = vld [vmem:[%s3516_s5 + $0x328] sm:$0xff] }
 0x282   : > { %2413 = vrot.lane.b32.xlu0 %v2412_v37, %s2506_s16  ;;  %v934_v37 = vld [vmem:[%s3516_s5 + $0x258] sm:$0xff]  ;;  %v959_v21 = vld [vmem:[%s3516_s5 + $0x320] sm:$0xff] }
 0x283   : > { %v2109_v40 = vpack.c.bf16 %v934_v37, %v932_v36  ;;  %v962_v18 = vld [vmem:[%s3516_s5 + $0x338] sm:$0xff]  ;;  %v967_v36 = vld [vmem:[%s3516_s5 + $0x360] sm:$0xff]  ;;  %v969_v37 = vld [vmem:[%s3516_s5 + $0x370] sm:$0xff] }
 0x284   : > { %v2137_v20 = vpack.c.bf16 %v962_v18, %v960_v17  ;;  %v966_v24 = vld [vmem:[%s3516_s5 + $0x358] sm:$0xff] }
 0x2f2   : > { %v850_v42 = vpop.permute.xlu1 %849 }
 0x2f4   : > { %v2414_v19 = vpop.permute.xlu0 %2413 }
 0x2f5   : > { %v2416_v22 = vunpack.i.h.bf16 %v2414_v19  ;;  %v2415_v23 = vunpack.i.l.bf16 %v2414_v19  ;;  %v2135_v19 = vpack.c.bf16 %v957_v16, %v955_v15  ;;  %v1287_v15 = vld [vmem:[#allocation5 + $0x68] sm:$0xff]  ;;  %v1289_v16 = vld [vmem:[#allocation5 + $0x78] sm:$0xff] }
 0x2f6   : > { %v2193_v18 = vpack.c.bf16 %v1289_v16, %v1287_v15  ;;  %v1329_v15 = vld [vmem:[#allocation5 + $0x1b8] sm:$0xff] }
 0x2f7   : > { %v857_v29 = vsel %vm855_vm1, %v834_v27, %v2415_v23  ;;  %v856_v30 = vsel %vm855_vm1, %v3033_v25, %v2416_v22  ;;  %v961_v22 = vld [vmem:[%s3516_s5 + $0x330] sm:$0xff]  ;;  %v964_v23 = vld [vmem:[%s3516_s5 + $0x348] sm:$0xff] }
 0x2f8   : > { %1049 = vmatprep.mubr.f32.mxu0 %v857_v29  ;;  %v2139_v26 = vpack.c.bf16 %v961_v22, %v959_v21  ;;  %v2141_v27 = vpack.c.bf16 %v966_v24, %v964_v23  ;;  %v965_v29 = vld [vmem:[%s3516_s5 + $0x350] sm:$0xff]  ;;  %v1291_v21 = vld [vmem:[#allocation5 + $0x88] sm:$0xff] }
 0x2f9   : > { %1050 = vmatmul.mubr.f32.vlgmr.msra.gmra.mrb[2].mxu0 %v856_v30  ;;  %v968_v30 = vld [vmem:[%s3516_s5 + $0x368] sm:$0xff]  ;;  %v1293_v22 = vld [vmem:[#allocation5 + $0x98] sm:$0xff] }
 0x2fa   : > { %2104 = vmatpush1.bf16.msra.mxu0 %v2103_v28  ;;  %1883 = vmatprep.mubr.msk.f32.mxu0 %vm855_vm1, %v854_v38  ;;  %v963_v28 = vld [vmem:[%s3516_s5 + $0x340] sm:$0xff]  ;;  %v2147_v38 = vpack.c.bf16 %v969_v37, %v967_v36  ;;  %v2197_v24 = vpack.c.bf16 %v1293_v22, %v1291_v21  ;;  %v1301_v37 = vld [vmem:[#allocation5 + $0xd8] sm:$0xff] }
 0x2fb   : > { %2106 = vmatprep.subr.bf16.mxu0 %v2105_v31  ;;  %v970_v31 = vld [vmem:[%s3516_s5 + $0x378] sm:$0xff]  ;;  %v2143_v32 = vpack.c.bf16 %v965_v29, %v963_v28  ;;  %v1295_v28 = vld [vmem:[#allocation5 + $0xa8] sm:$0xff]  ;;  %v1297_v29 = vld [vmem:[#allocation5 + $0xb8] sm:$0xff] }
 0x2fc   : > { %v2145_v34 = vpack.c.bf16 %v970_v31, %v968_v30  ;;  %v2201_v31 = vpack.c.bf16 %v1297_v29, %v1295_v28  ;;  %v1299_v36 = vld [vmem:[#allocation5 + $0xc8] sm:$0xff]  ;;  %v1333_v21 = vld [vmem:[#allocation5 + $0x1d8] sm:$0xff] }
 0x2fd   : > { %v1335_v28 = vld [vmem:[#allocation5 + $0x1e8] sm:$0xff]  ;;  %v1337_v29 = vld [vmem:[#allocation5 + $0x1f8] sm:$0xff] }
 0x2fe   : > { %2108 = vmatpush1.bf16.msra.mxu0 %v2107_v39  ;;  %v842_v39 = vrot.slane %v3031_v1, 4  ;;  %v1159_v1 = vld [vmem:[%s3518_s7 + $0xf0] sm:$0xff] }
 0x2ff   : > { %2110 = vmatprep.subr.bf16.mxu0 %v2109_v40  ;;  %v843_v40 = vrot.slane %v3033_v25, 4  ;;  %v1160_v25 = vld [vmem:[%s3518_s7 + $0xf8] sm:$0xff] }
 0x300   : > { %v2177_v48 = vpack.c.bf16 %v1160_v25, %v1159_v1  ;;  %v1304_v1 = vld [vmem:[#allocation5 + $0xf0] sm:$0xff]  ;;  %v1307_v25 = vld [vmem:[#allocation5 + $0x108] sm:$0xff] }
 0x301   : > { %v844_v43 = vsel %vm577_vm5, %v842_v39, %v843_v40  ;;  %v2205_v39 = vpack.c.bf16 %v1301_v37, %v1299_v36  ;;  %v1298_v40 = vld [vmem:[#allocation5 + $0xc0] sm:$0xff]  ;;  %v1884_v37 = vld [vmem:[%s3519_s8] ss:$0 sm:$0xff] }
 0x302   : > { %2112 = vmatpush1.bf16.msra.mxu0 %v2111_v46  ;;  %v858_v44 = vsel %vm855_vm1, %v844_v43, %v850_v42  ;;  %v1142_v46 = vld [vmem:[%s3518_s7 + $0x68] sm:$0xff]  ;;  %v1303_v43 = vld [vmem:[#allocation5 + $0xe8] sm:$0xff] }
 0x303   : > { %2114 = vmatprep.subr.bf16.mxu0 %v2113_v47  ;;  %v2175_v47 = vpack.c.bf16 %v1142_v46, %v1141_v45  ;;  %v1300_v42 = vld [vmem:[#allocation5 + $0xd0] sm:$0xff] }
 0x304   : > { %v2207_v45 = vpack.c.bf16 %v1300_v42, %v1298_v40  ;;  %v1341_v40 = vld [vmem:[#allocation5 + $0x218] sm:$0xff] }
 0x305   : > { %2176 = vmatpush3.bf16.msra.mxu1 %v2175_v47  ;;  %v1302_v47 = vld [vmem:[#allocation5 + $0xe0] sm:$0xff] }
 0x306   : > { %2116 = vmatpush1.bf16.msra.mxu0 %v2115_v52  ;;  %2178 = vmatprep.subr.bf16.mxu1 %v2177_v48  ;;  %v971_v52 = vld [vmem:[%s3517_s6] sm:$0x3]  ;;  %v1309_v48 = vld [vmem:[#allocation5 + $0x118] sm:$0xff]  ;;  %v2211_v49 = vpack.c.bf16 %v1304_v1, %v1302_v47 }
 0x307   : > { %2118 = vmatprep.subr.bf16.mxu0 %v2117_v53  ;;  %v976_v53 = vrot.slane %v971_v52, %v2821_v33  ;;  %v980_v54 = vrot.slane %v971_v52, %v2826_v35  ;;  %v2213_v50 = vpack.c.bf16 %v1309_v48, %v1307_v25  ;;  %v1308_v52 = vld [vmem:[#allocation5 + $0x110] sm:$0xff] }
 0x309   : > { %2180 = vmatpush3.bf16.msra.mxu1 %v2179_v51  ;;  %v1306_v51 = vld [vmem:[#allocation5 + $0x100] sm:$0xff] }
 0x30a   : > { %2120 = vmatpush1.bf16.msra.mxu0 %v2119_v58 }
 0x30b   : > { %2122 = vmatprep.subr.bf16.mxu0 %v2121_v59 }
 0x30e   : > { %2124 = vmatpush1.bf16.msra.mxu0 %v2123_v0  ;;  %v2181_v0 = vpack.c.bf16 %v1277_v62, %v1275_v61 }
 0x30f   : > { %2126 = vmatprep.subr.bf16.mxu0 %v2125_v2  ;;  %v1276_v2 = vld [vmem:[#allocation5 + $0x10] sm:$0xff] }
 0x310   : > { %v2183_v5 = vpack.c.bf16 %v1276_v2, %v1274_v63  ;;  %2182 = vmatprep.subr.bf16.mxu1 %v2181_v0  ;;  %v1314_v63 = vld [vmem:[#allocation5 + $0x140] sm:$0xff]  ;;  %v1316_v0 = vld [vmem:[#allocation5 + $0x150] sm:$0xff]  ;;  %v1319_v2 = vld [vmem:[#allocation5 + $0x168] sm:$0xff] }
 0x311   : > { %v2223_v4 = vpack.c.bf16 %v1316_v0, %v1314_v63  ;;  %v1546_v0 = vld [vmem:[%s3522_s11 + $0x10] sm:$0xff] }
 0x312   : > { %2128 = vmatpush1.bf16.msra.mxu0 %v2127_v7  ;;  %v1278_v7 = vld [vmem:[#allocation5 + $0x20] sm:$0xff] }
 0x313   : > { %2130 = vmatprep.subr.bf16.mxu0 %v2129_v8  ;;  %v1280_v8 = vld [vmem:[#allocation5 + $0x30] sm:$0xff] }
 0x314   : > { %v2187_v11 = vpack.c.bf16 %v1280_v8, %v1278_v7  ;;  %v1320_v7 = vld [vmem:[#allocation5 + $0x170] sm:$0xff]  ;;  %v1323_v8 = vld [vmem:[#allocation5 + $0x188] sm:$0xff] }
 0x316   : > { %2132 = vmatpush1.bf16.msra.mxu0 %v2131_v13  ;;  %v1282_v13 = vld [vmem:[#allocation5 + $0x40] sm:$0xff] }
 0x317   : > { %2134 = vmatprep.subr.bf16.mxu0 %v2133_v14  ;;  %v1284_v14 = vld [vmem:[#allocation5 + $0x50] sm:$0xff] }
 0x318   : > { %v2191_v17 = vpack.c.bf16 %v1284_v14, %v1282_v13  ;;  %v1324_v13 = vld [vmem:[#allocation5 + $0x190] sm:$0xff]  ;;  %v1327_v14 = vld [vmem:[#allocation5 + $0x1a8] sm:$0xff] }
 0x31a   : > { %2136 = vmatpush1.bf16.msra.mxu0 %v2135_v19  ;;  %v1286_v19 = vld [vmem:[#allocation5 + $0x60] sm:$0xff] }
 0x31b   : > { %2138 = vmatprep.subr.bf16.mxu0 %v2137_v20  ;;  %v1288_v20 = vld [vmem:[#allocation5 + $0x70] sm:$0xff] }
 0x31c   : > { %v2195_v23 = vpack.c.bf16 %v1288_v20, %v1286_v19  ;;  %v1328_v19 = vld [vmem:[#allocation5 + $0x1b0] sm:$0xff]  ;;  %v1331_v20 = vld [vmem:[#allocation5 + $0x1c8] sm:$0xff] }
 0x31e   : > { %2140 = vmatpush1.bf16.msra.mxu0 %v2139_v26  ;;  %v1290_v26 = vld [vmem:[#allocation5 + $0x80] sm:$0xff] }
 0x31f   : > { %2142 = vmatprep.subr.bf16.mxu0 %v2141_v27  ;;  %v1292_v27 = vld [vmem:[#allocation5 + $0x90] sm:$0xff] }
 0x320   : > { %v2199_v30 = vpack.c.bf16 %v1292_v27, %v1290_v26  ;;  %v1332_v26 = vld [vmem:[#allocation5 + $0x1d0] sm:$0xff] }
 0x322   : > { %2144 = vmatpush1.bf16.msra.mxu0 %v2143_v32  ;;  %v1294_v32 = vld [vmem:[#allocation5 + $0xa0] sm:$0xff] }
 0x323   : > { %2146 = vmatprep.subr.bf16.mxu0 %v2145_v34  ;;  %v1296_v34 = vld [vmem:[#allocation5 + $0xb0] sm:$0xff] }
 0x326   : > { %2148 = vmatpush1.bf16.msra.mxu0 %v2147_v38  ;;  %v2203_v38 = vpack.c.bf16 %v1296_v34, %v1294_v32  ;;  %v1336_v32 = vld [vmem:[#allocation5 + $0x1f0] sm:$0xff] }
 0x329   : > { %1121 = vmatmul.mubr.f32.vlgmr.msra.gmra.mrb[2].mxu0 %v858_v44  ;;  %v1305_v44 = vld [vmem:[#allocation5 + $0xf8] sm:$0xff] }
 0x32a   : > { %v2209_v46 = vpack.c.bf16 %v1305_v44, %v1303_v43  ;;  %v3304_v44 = vld [vmem:[#allocation4] sm:$0xff] }
 0x32b   : > { %v1262_v47 = vrot.slane %v3304_v44, 3  ;;  %v1242_v1 = vrot.slane %v3304_v44, 7  ;;  %v1252_v25 = vrot.slane %v3304_v44, 5 }
 0x3fc   : > { %v1122_v55 = vpop.f32.mrb[2].mxu0 }
 0x3fd   : > { %v2341_v56 = vadd.f32 %v1122_v55, %v976_v53  ;;  %v1124_v57 = vpop.f32.mrb[3].mxu0  ;;  %v1311_v53 = vld [vmem:[#allocation5 + $0x128] sm:$0xff]  ;;  %v2215_v55 = vpack.c.bf16 %v1308_v52, %v1306_v51 }
 0x3fe   : > { %v2342_v58 = vadd.f32 %v1124_v57, %v980_v54  ;;  %v1313_v54 = vld [vmem:[#allocation5 + $0x138] sm:$0xff]  ;;  %v1310_v57 = vld [vmem:[#allocation5 + $0x120] sm:$0xff] }
 0x3ff   : > { %v1127_v60 = vmax.f32 %v2341_v56, 0.0  ;;  %v2217_v56 = vpack.c.bf16 %v1313_v54, %v1311_v53 }
 0x400   : > { %v1128_v59 = vmax.f32 %v2342_v58, 0.0  ;;  %v1312_v58 = vld [vmem:[#allocation5 + $0x130] sm:$0xff] }
 0x401   : > { %v2219_v61 = vpack.c.bf16 %v1312_v58, %v1310_v57  ;;  %v1544_v57 = vld [vmem:[%s3522_s11] sm:$0xff] }
 0x402   : > { %1232 = vmatprep.mubr.f32.mxu1 %v1128_v59  ;;  %v1315_v59 = vld [vmem:[#allocation5 + $0x148] sm:$0xff] }
 0x403   : > { %1233 = vmatmul.mubr.f32.vlgmr.msra.gmra.mrb[2].mxu1 %v1127_v60  ;;  %v1317_v60 = vld [vmem:[#allocation5 + $0x158] sm:$0xff] }
 0x404   : > { %2184 = vmatpush1.bf16.msra.mxu1 %v2183_v5  ;;  %v2221_v62 = vpack.c.bf16 %v1317_v60, %v1315_v59  ;;  %v2225_v5 = vpack.c.bf16 %v1321_v3, %v1319_v2  ;;  %v1545_v59 = vld [vmem:[%s3522_s11 + $0x8] sm:$0xff]  ;;  %v1562_v60 = vld [vmem:[%s3522_s11 + $0x90] sm:$0xff]  ;;  %v1547_v2 = vld [vmem:[%s3522_s11 + $0x18] sm:$0xff] }
 0x405   : > { %2186 = vmatprep.subr.bf16.mxu1 %v2185_v6  ;;  %v1318_v6 = vld [vmem:[#allocation5 + $0x160] sm:$0xff]  ;;  %v1564_v3 = vld [vmem:[%s3522_s11 + $0xa0] sm:$0xff] }
 0x406   : > { %v2227_v10 = vpack.c.bf16 %v1320_v7, %v1318_v6  ;;  %v1548_v7 = vld [vmem:[%s3522_s11 + $0x20] sm:$0xff] }
 0x408   : > { %2188 = vmatpush1.bf16.msra.mxu1 %v2187_v11  ;;  %v2229_v11 = vpack.c.bf16 %v1325_v9, %v1323_v8  ;;  %v1549_v8 = vld [vmem:[%s3522_s11 + $0x28] sm:$0xff]  ;;  %v1566_v9 = vld [vmem:[%s3522_s11 + $0xb0] sm:$0xff] }
 0x409   : > { %2190 = vmatprep.subr.bf16.mxu1 %v2189_v12  ;;  %v1322_v12 = vld [vmem:[#allocation5 + $0x180] sm:$0xff] }
 0x40a   : > { %v2231_v16 = vpack.c.bf16 %v1324_v13, %v1322_v12  ;;  %v1550_v13 = vld [vmem:[%s3522_s11 + $0x30] sm:$0xff] }
 0x40c   : > { %2192 = vmatpush1.bf16.msra.mxu1 %v2191_v17  ;;  %v2233_v17 = vpack.c.bf16 %v1329_v15, %v1327_v14  ;;  %v1551_v14 = vld [vmem:[%s3522_s11 + $0x38] sm:$0xff]  ;;  %v1568_v15 = vld [vmem:[%s3522_s11 + $0xc0] sm:$0xff] }
 0x40d   : > { %2194 = vmatprep.subr.bf16.mxu1 %v2193_v18  ;;  %v1326_v18 = vld [vmem:[#allocation5 + $0x1a0] sm:$0xff] }
 0x40e   : > { %v2235_v22 = vpack.c.bf16 %v1328_v19, %v1326_v18  ;;  %v1552_v19 = vld [vmem:[%s3522_s11 + $0x40] sm:$0xff] }
 0x410   : > { %2196 = vmatpush1.bf16.msra.mxu1 %v2195_v23  ;;  %v2237_v23 = vpack.c.bf16 %v1333_v21, %v1331_v20  ;;  %v1553_v20 = vld [vmem:[%s3522_s11 + $0x48] sm:$0xff]  ;;  %v1570_v21 = vld [vmem:[%s3522_s11 + $0xd0] sm:$0xff] }
 0x411   : > { %2198 = vmatprep.subr.bf16.mxu1 %v2197_v24  ;;  %v1330_v24 = vld [vmem:[#allocation5 + $0x1c0] sm:$0xff] }
 0x412   : > { %v2239_v27 = vpack.c.bf16 %v1332_v26, %v1330_v24  ;;  %v1554_v26 = vld [vmem:[%s3522_s11 + $0x50] sm:$0xff] }
 0x414   : > { %2200 = vmatpush1.bf16.msra.mxu1 %v2199_v30  ;;  %v2241_v30 = vpack.c.bf16 %v1337_v29, %v1335_v28  ;;  %v1572_v28 = vld [vmem:[%s3522_s11 + $0xe0] sm:$0xff]  ;;  %v1573_v29 = vld [vmem:[%s3522_s11 + $0xe8] sm:$0xff] }
 0x415   : > { %2202 = vmatprep.subr.bf16.mxu1 %v2201_v31  ;;  %v1334_v31 = vld [vmem:[#allocation5 + $0x1e0] sm:$0xff] }
 0x416   : > { %v2243_v34 = vpack.c.bf16 %v1336_v32, %v1334_v31  ;;  %v2317_v31 = vpack.c.bf16 %v1573_v29, %v1572_v28  ;;  %v1248_v32 = vrot.slane %v3304_v44, 6  ;;  %v1371_v28 = vld [vmem:[#allocation5 + $0x308] sm:$0xff]  ;;  %v1373_v29 = vld [vmem:[#allocation5 + $0x318] sm:$0xff] }
 0x418   : > { %2204 = vmatpush1.bf16.msra.mxu1 %v2203_v38 }
 0x419   : > { %2206 = vmatprep.subr.bf16.mxu1 %v2205_v39  ;;  %v1339_v39 = vld [vmem:[#allocation5 + $0x208] sm:$0xff] }
 0x41a   : > { %v2245_v43 = vpack.c.bf16 %v1341_v40, %v1339_v39  ;;  %v1343_v39 = vld [vmem:[#allocation5 + $0x228] sm:$0xff]  ;;  %v1345_v40 = vld [vmem:[#allocation5 + $0x238] sm:$0xff] }
 0x41c   : > { %2208 = vmatpush1.bf16.msra.mxu1 %v2207_v45 }
 0x41d   : > { %2210 = vmatprep.subr.bf16.mxu1 %v2209_v46 }
 0x420   : > { %2212 = vmatpush1.bf16.msra.mxu1 %v2211_v49 }
 0x421   : > { %2214 = vmatprep.subr.bf16.mxu1 %v2213_v50 }
 0x424   : > { %2216 = vmatpush1.bf16.msra.mxu1 %v2215_v55  ;;  %v1560_v55 = vld [vmem:[%s3522_s11 + $0x80] sm:$0xff] }
 0x425   : > { %2218 = vmatprep.subr.bf16.mxu1 %v2217_v56  ;;  %v1561_v56 = vld [vmem:[%s3522_s11 + $0x88] sm:$0xff] }
 0x426   : > { %v2293_v58 = vpack.c.bf16 %v1561_v56, %v1560_v55 }
 0x428   : > { %2220 = vmatpush1.bf16.msra.mxu1 %v2219_v61  ;;  %v1563_v61 = vld [vmem:[%s3522_s11 + $0x98] sm:$0xff]  ;;  %2294 = vmatprep.subr.bf16.mxu0 %v2293_v58 }
 0x429   : > { %2222 = vmatprep.subr.bf16.mxu1 %v2221_v62  ;;  %v2295_v62 = vpack.c.bf16 %v1545_v59, %v1544_v57  ;;  %v2297_v63 = vpack.c.bf16 %v1563_v61, %v1562_v60  ;;  %v1346_v58 = vld [vmem:[#allocation5 + $0x240] sm:$0xff]  ;;  %v1348_v59 = vld [vmem:[#allocation5 + $0x250] sm:$0xff]  ;;  %v1351_v60 = vld [vmem:[#allocation5 + $0x268] sm:$0xff] }
 0x42a   : > { %v1353_v61 = vld [vmem:[#allocation5 + $0x278] sm:$0xff] }
 0x42b   : > { %2296 = vmatpush3.bf16.msra.mxu0 %v2295_v62  ;;  %v2255_v62 = vpack.c.bf16 %v1348_v59, %v1346_v58 }
 0x42c   : > { %2224 = vmatpush1.bf16.msra.mxu1 %v2223_v4  ;;  %v1565_v4 = vld [vmem:[%s3522_s11 + $0xa8] sm:$0xff]  ;;  %2298 = vmatprep.subr.bf16.mxu0 %v2297_v63  ;;  %v2257_v63 = vpack.c.bf16 %v1353_v61, %v1351_v60  ;;  %v1556_v61 = vld [vmem:[%s3522_s11 + $0x60] sm:$0xff] }
 0x42d   : > { %2226 = vmatprep.subr.bf16.mxu1 %v2225_v5  ;;  %v2299_v5 = vpack.c.bf16 %v1547_v2, %v1546_v0  ;;  %v2301_v6 = vpack.c.bf16 %v1565_v4, %v1564_v3  ;;  %v1350_v0 = vld [vmem:[#allocation5 + $0x260] sm:$0xff]  ;;  %v1352_v2 = vld [vmem:[#allocation5 + $0x270] sm:$0xff]  ;;  %v1355_v3 = vld [vmem:[#allocation5 + $0x288] sm:$0xff] }
 0x42e   : > { %v1357_v4 = vld [vmem:[#allocation5 + $0x298] sm:$0xff] }
 0x42f   : > { %2300 = vmatpush3.bf16.msra.mxu0 %v2299_v5  ;;  %v2259_v5 = vpack.c.bf16 %v1352_v2, %v1350_v0  ;;  %v1558_v2 = vld [vmem:[%s3522_s11 + $0x70] sm:$0xff] }
 0x430   : > { %2228 = vmatpush1.bf16.msra.mxu1 %v2227_v10  ;;  %v1567_v10 = vld [vmem:[%s3522_s11 + $0xb8] sm:$0xff]  ;;  %2302 = vmatprep.subr.bf16.mxu0 %v2301_v6  ;;  %v2261_v6 = vpack.c.bf16 %v1357_v4, %v1355_v3 }
 0x431   : > { %2230 = vmatprep.subr.bf16.mxu1 %v2229_v11  ;;  %v2303_v11 = vpack.c.bf16 %v1549_v8, %v1548_v7  ;;  %v2305_v12 = vpack.c.bf16 %v1567_v10, %v1566_v9  ;;  %v1354_v7 = vld [vmem:[#allocation5 + $0x280] sm:$0xff]  ;;  %v1356_v8 = vld [vmem:[#allocation5 + $0x290] sm:$0xff]  ;;  %v1359_v9 = vld [vmem:[#allocation5 + $0x2a8] sm:$0xff] }
 0x432   : > { %v1361_v10 = vld [vmem:[#allocation5 + $0x2b8] sm:$0xff]  ;;  %v1559_v3 = vld [vmem:[%s3522_s11 + $0x78] sm:$0xff] }
 0x433   : > { %2304 = vmatpush3.bf16.msra.mxu0 %v2303_v11  ;;  %v2263_v11 = vpack.c.bf16 %v1356_v8, %v1354_v7  ;;  %v2323_v4 = vpack.c.bf16 %v1559_v3, %v1558_v2  ;;  %v1386_v8 = vld [vmem:[%s3521_s10] sm:$0x3] }
 0x434   : > { %2232 = vmatpush1.bf16.msra.mxu1 %v2231_v16  ;;  %v1569_v16 = vld [vmem:[%s3522_s11 + $0xc8] sm:$0xff]  ;;  %2306 = vmatprep.subr.bf16.mxu0 %v2305_v12  ;;  %v2265_v12 = vpack.c.bf16 %v1361_v10, %v1359_v9  ;;  %v1391_v9 = vrot.slane %v1386_v8, %v2821_v33  ;;  %v1395_v10 = vrot.slane %v1386_v8, %v2826_v35 }
 0x435   : > { %2234 = vmatprep.subr.bf16.mxu1 %v2233_v17  ;;  %v2307_v17 = vpack.c.bf16 %v1551_v14, %v1550_v13  ;;  %v2309_v18 = vpack.c.bf16 %v1569_v16, %v1568_v15  ;;  %v1358_v13 = vld [vmem:[#allocation5 + $0x2a0] sm:$0xff]  ;;  %v1360_v14 = vld [vmem:[#allocation5 + $0x2b0] sm:$0xff]  ;;  %v1363_v15 = vld [vmem:[#allocation5 + $0x2c8] sm:$0xff] }
 0x436   : > { %v1365_v16 = vld [vmem:[#allocation5 + $0x2d8] sm:$0xff] }
 0x437   : > { %2308 = vmatpush3.bf16.msra.mxu0 %v2307_v17  ;;  %v2267_v17 = vpack.c.bf16 %v1360_v14, %v1358_v13  ;;  %v1657_v14 = vld [vmem:[%s3524_s13] sm:$0xff] }
 0x438   : > { %2236 = vmatpush1.bf16.msra.mxu1 %v2235_v22  ;;  %v1571_v22 = vld [vmem:[%s3522_s11 + $0xd8] sm:$0xff]  ;;  %2310 = vmatprep.subr.bf16.mxu0 %v2309_v18  ;;  %v2269_v18 = vpack.c.bf16 %v1365_v16, %v1363_v15  ;;  %v1659_v15 = vld [vmem:[%s3524_s13 + $0x10] sm:$0xff] }
 0x439   : > { %2238 = vmatprep.subr.bf16.mxu1 %v2237_v23  ;;  %v2311_v23 = vpack.c.bf16 %v1553_v20, %v1552_v19  ;;  %v2313_v24 = vpack.c.bf16 %v1571_v22, %v1570_v21  ;;  %v1362_v19 = vld [vmem:[#allocation5 + $0x2c0] sm:$0xff]  ;;  %v1364_v20 = vld [vmem:[#allocation5 + $0x2d0] sm:$0xff]  ;;  %v1367_v21 = vld [vmem:[#allocation5 + $0x2e8] sm:$0xff] }
 0x43a   : > { %v1369_v22 = vld [vmem:[#allocation5 + $0x2f8] sm:$0xff] }
 0x43b   : > { %2312 = vmatpush3.bf16.msra.mxu0 %v2311_v23  ;;  %v2271_v23 = vpack.c.bf16 %v1364_v20, %v1362_v19  ;;  %v2327_v20 = vpack.c.bf16 %v1659_v15, %v1657_v14 }
 0x43c   : > { %2240 = vmatpush1.bf16.msra.mxu1 %v2239_v27  ;;  %v1555_v27 = vld [vmem:[%s3522_s11 + $0x58] sm:$0xff]  ;;  %2314 = vmatprep.subr.bf16.mxu0 %v2313_v24  ;;  %v2273_v24 = vpack.c.bf16 %v1369_v22, %v1367_v21 }
 0x43d   : > { %2242 = vmatprep.subr.bf16.mxu1 %v2241_v30  ;;  %v2315_v30 = vpack.c.bf16 %v1555_v27, %v1554_v26  ;;  %v1366_v26 = vld [vmem:[#allocation5 + $0x2e0] sm:$0xff]  ;;  %v1368_v27 = vld [vmem:[#allocation5 + $0x2f0] sm:$0xff] }
 0x43f   : > { %2316 = vmatpush3.bf16.msra.mxu0 %v2315_v30  ;;  %v2275_v30 = vpack.c.bf16 %v1368_v27, %v1366_v26  ;;  %v1666_v27 = vld [vmem:[%s3524_s13 + $0x48] sm:$0xff] }
 0x440   : > { %2244 = vmatpush1.bf16.msra.mxu1 %v2243_v34  ;;  %2318 = vmatprep.subr.bf16.mxu0 %v2317_v31  ;;  %v2277_v31 = vpack.c.bf16 %v1373_v29, %v1371_v28  ;;  %v1668_v28 = vld [vmem:[%s3524_s13 + $0x58] sm:$0xff] }
 0x441   : > { %2246 = vmatprep.subr.bf16.mxu1 %v2245_v43  ;;  %v2333_v29 = vpack.c.bf16 %v1668_v28, %v1666_v27 }
 0x4d6   : > { %v1957_v36 = vpop.f32.mrb[2].mxu1 }
 0x4d7   : > { %v1958_v38 = vpop.f32.mrb[3].mxu1 }
 0x4d8   : > { %v1959_v42 = vadd.f32 %v1958_v38, %v1957_v36  ;;  %v1338_v36 = vld [vmem:[#allocation5 + $0x200] sm:$0xff] }
 0x4da   : > { %v1235_v45 = vadd.f32 %v1959_v42, %v1884_v37  ;;  %v1340_v37 = vld [vmem:[#allocation5 + $0x210] sm:$0xff] }
 0x4dc   : > { %v3306_v46 = vmax.f32 %v1235_v45, 0.0  ;;  %v1268_v45 = vrot.slane %v3304_v44, 2 }
 0x4de   : > { %v1263_v48 = vrot.slane %v3306_v46, 3  ;;  %1656 = vst.msk [vmem:[#allocation4] sm:$0xff] %vm855_vm1, %v3306_v46  ;;  %v1243_v49 = vrot.slane %v3306_v46, 7  ;;  %v1253_v50 = vrot.slane %v3306_v46, 5  ;;  %v1249_v34 = vrot.slane %v3306_v46, 6 }
 0x4e0   : > { %v1264_v51 = vsel %vm584_vm6, %v1262_v47, %v1263_v48  ;;  %v1244_v52 = vsel %vm556_vm2, %v1242_v1, %v1243_v49  ;;  %v1254_v53 = vsel %vm570_vm3, %v1252_v25, %v1253_v50  ;;  %v1269_v47 = vrot.slane %v3306_v46, 2 }
 0x4e1   : > { %1265 = vrot.lane.b32.xlu1 %v1264_v51, %s2506_s16  ;;  %v2417_v54 = vpack.i.bf16 %v1244_v52, %v1254_v53  ;;  %v1250_v1 = vsel %vm563_vm4, %v1248_v32, %v1249_v34  ;;  %v2247_v25 = vpack.c.bf16 %v1340_v37, %v1338_v36  ;;  %v2249_v50 = vpack.c.bf16 %v1345_v40, %v1343_v39  ;;  %v1342_v51 = vld [vmem:[#allocation5 + $0x220] sm:$0xff]  ;;  %v1344_v52 = vld [vmem:[#allocation5 + $0x230] sm:$0xff]  ;;  %v1347_v53 = vld [vmem:[#allocation5 + $0x248] sm:$0xff] }
 0x4e2   : > { %v1270_v55 = vsel %vm591_vm7, %v1268_v45, %v1269_v47  ;;  %v2251_v56 = vpack.c.bf16 %v1344_v52, %v1342_v51  ;;  %v1370_v32 = vld [vmem:[#allocation5 + $0x300] sm:$0xff]  ;;  %v1372_v34 = vld [vmem:[#allocation5 + $0x310] sm:$0xff]  ;;  %v1375_v36 = vld [vmem:[#allocation5 + $0x328] sm:$0xff] }
 0x4e3   : > { %2418 = vrot.lane.b32.xlu0 %v2417_v54, %s2506_s16  ;;  %v1349_v54 = vld [vmem:[#allocation5 + $0x258] sm:$0xff]  ;;  %v1374_v40 = vld [vmem:[#allocation5 + $0x320] sm:$0xff] }
 0x4e4   : > { %v2253_v57 = vpack.c.bf16 %v1349_v54, %v1347_v53  ;;  %v1377_v37 = vld [vmem:[#allocation5 + $0x338] sm:$0xff]  ;;  %v1382_v53 = vld [vmem:[#allocation5 + $0x360] sm:$0xff]  ;;  %v1384_v54 = vld [vmem:[#allocation5 + $0x370] sm:$0xff] }
 0x4e5   : > { %v2281_v39 = vpack.c.bf16 %v1377_v37, %v1375_v36  ;;  %v1381_v45 = vld [vmem:[#allocation5 + $0x358] sm:$0xff]  ;;  %v1669_v37 = vld [vmem:[%s3524_s13 + $0x60] sm:$0xff] }
 0x553   : > { %v1266_v58 = vpop.permute.xlu1 %1265 }
 0x555   : > { %v2419_v38 = vpop.permute.xlu0 %2418 }
 0x556   : > { %v2421_v42 = vunpack.i.h.bf16 %v2419_v38  ;;  %v2420_v43 = vunpack.i.l.bf16 %v2419_v38  ;;  %v2279_v38 = vpack.c.bf16 %v1372_v34, %v1370_v32  ;;  %v1670_v32 = vld [vmem:[%s3524_s13 + $0x68] sm:$0xff]  ;;  %v1672_v34 = vld [vmem:[%s3524_s13 + $0x78] sm:$0xff] }
 0x557   : > { %v2337_v36 = vpack.c.bf16 %v1672_v34, %v1670_v32 }
 0x558   : > { %v1272_v48 = vsel %vm855_vm1, %v1250_v1, %v2420_v43  ;;  %v1271_v49 = vsel %vm855_vm1, %v3306_v46, %v2421_v42  ;;  %v1376_v42 = vld [vmem:[#allocation5 + $0x330] sm:$0xff]  ;;  %v1379_v43 = vld [vmem:[#allocation5 + $0x348] sm:$0xff] }
 0x559   : > { %1464 = vmatprep.mubr.f32.mxu1 %v1272_v48  ;;  %v2283_v47 = vpack.c.bf16 %v1376_v42, %v1374_v40  ;;  %v2285_v1 = vpack.c.bf16 %v1381_v45, %v1379_v43  ;;  %v1380_v48 = vld [vmem:[#allocation5 + $0x350] sm:$0xff]  ;;  %v1886_v42 = vld [vmem:[%s3523_s12] ss:$0 sm:$0xff] }
 0x55a   : > { %1465 = vmatmul.mubr.f32.vlgmr.msra.gmra.mrb[4].mxu1 %v1271_v49  ;;  %v1383_v49 = vld [vmem:[#allocation5 + $0x368] sm:$0xff] }
 0x55b   : > { %2248 = vmatpush1.bf16.msra.mxu1 %v2247_v25  ;;  %1885 = vmatprep.mubr.msk.f32.mxu1 %vm855_vm1, %v1270_v55  ;;  %v1378_v25 = vld [vmem:[#allocation5 + $0x340] sm:$0xff]  ;;  %v2291_v55 = vpack.c.bf16 %v1384_v54, %v1382_v53 }
 0x55c   : > { %2250 = vmatprep.subr.bf16.mxu1 %v2249_v50  ;;  %v1385_v50 = vld [vmem:[#allocation5 + $0x378] sm:$0xff]  ;;  %v2287_v51 = vpack.c.bf16 %v1380_v48, %v1378_v25  ;;  %v1673_v25 = vld [vmem:[%s3525_s14] sm:$0x3] }
 0x55d   : > { %v2289_v52 = vpack.c.bf16 %v1385_v50, %v1383_v49  ;;  %v1678_v48 = vrot.slane %v1673_v25, %v2821_v33  ;;  %v1682_v49 = vrot.slane %v1673_v25, %v2826_v35 }
 0x55f   : > { %2252 = vmatpush1.bf16.msra.mxu1 %v2251_v56  ;;  %v1258_v56 = vrot.slane %v3304_v44, 4  ;;  %v1574_v44 = vld [vmem:[%s3522_s11 + $0xf0] sm:$0xff] }
 0x560   : > { %2254 = vmatprep.subr.bf16.mxu1 %v2253_v57  ;;  %v1259_v57 = vrot.slane %v3306_v46, 4  ;;  %v1575_v46 = vld [vmem:[%s3522_s11 + $0xf8] sm:$0xff] }
 0x561   : > { %v2321_v0 = vpack.c.bf16 %v1575_v46, %v1574_v44 }
 0x562   : > { %v1260_v59 = vsel %vm577_vm5, %v1258_v56, %v1259_v57 }
 0x563   : > { %2256 = vmatpush1.bf16.msra.mxu1 %v2255_v62  ;;  %v1273_v60 = vsel %vm855_vm1, %v1260_v59, %v1266_v58  ;;  %v1557_v62 = vld [vmem:[%s3522_s11 + $0x68] sm:$0xff] }
 0x564   : > { %2258 = vmatprep.subr.bf16.mxu1 %v2257_v63  ;;  %v2319_v63 = vpack.c.bf16 %v1557_v62, %v1556_v61 }
 0x566   : > { %2320 = vmatpush3.bf16.msra.mxu0 %v2319_v63 }
 0x567   : > { %2260 = vmatpush1.bf16.msra.mxu1 %v2259_v5  ;;  %2322 = vmatprep.subr.bf16.mxu0 %v2321_v0  ;;  %v1658_v5 = vld [vmem:[%s3524_s13 + $0x8] sm:$0xff] }
 0x568   : > { %2262 = vmatprep.subr.bf16.mxu1 %v2261_v6  ;;  %v1660_v6 = vld [vmem:[%s3524_s13 + $0x18] sm:$0xff] }
 0x569   : > { %v2325_v7 = vpack.c.bf16 %v1660_v6, %v1658_v5 }
 0x56a   : > { %2324 = vmatpush3.bf16.msra.mxu0 %v2323_v4 }
 0x56b   : > { %2264 = vmatpush1.bf16.msra.mxu1 %v2263_v11  ;;  %2326 = vmatprep.subr.bf16.mxu0 %v2325_v7 }
 0x56c   : > { %2266 = vmatprep.subr.bf16.mxu1 %v2265_v12 }
 0x56f   : > { %2268 = vmatpush1.bf16.msra.mxu1 %v2267_v17  ;;  %v1662_v17 = vld [vmem:[%s3524_s13 + $0x28] sm:$0xff] }
 0x570   : > { %2270 = vmatprep.subr.bf16.mxu1 %v2269_v18  ;;  %v1664_v18 = vld [vmem:[%s3524_s13 + $0x38] sm:$0xff] }
 0x571   : > { %v2329_v22 = vpack.c.bf16 %v1664_v18, %v1662_v17 }
 0x573   : > { %2272 = vmatpush1.bf16.msra.mxu1 %v2271_v23  ;;  %v1661_v23 = vld [vmem:[%s3524_s13 + $0x20] sm:$0xff] }
 0x574   : > { %2274 = vmatprep.subr.bf16.mxu1 %v2273_v24  ;;  %v1663_v24 = vld [vmem:[%s3524_s13 + $0x30] sm:$0xff] }
 0x575   : > { %v2331_v26 = vpack.c.bf16 %v1663_v24, %v1661_v23 }
 0x577   : > { %2276 = vmatpush1.bf16.msra.mxu1 %v2275_v30  ;;  %v1665_v30 = vld [vmem:[%s3524_s13 + $0x40] sm:$0xff] }
 0x578   : > { %2278 = vmatprep.subr.bf16.mxu1 %v2277_v31  ;;  %v1667_v31 = vld [vmem:[%s3524_s13 + $0x50] sm:$0xff] }
 0x57b   : > { %2280 = vmatpush1.bf16.msra.mxu1 %v2279_v38  ;;  %v1671_v38 = vld [vmem:[%s3524_s13 + $0x70] sm:$0xff] }
 0x57c   : > { %2282 = vmatprep.subr.bf16.mxu1 %v2281_v39  ;;  %v2339_v39 = vpack.c.bf16 %v1671_v38, %v1669_v37 }
 0x57f   : > { %2284 = vmatpush1.bf16.msra.mxu1 %v2283_v47 }
 0x580   : > { %2286 = vmatprep.subr.bf16.mxu1 %v2285_v1 }
 0x583   : > { %2288 = vmatpush1.bf16.msra.mxu1 %v2287_v51 }
 0x584   : > { %2290 = vmatprep.subr.bf16.mxu1 %v2289_v52 }
 0x587   : > { %2292 = vmatpush1.bf16.msra.mxu1 %v2291_v55 }
 0x58a   : > { %1536 = vmatmul.mubr.f32.vlgmr.msra.gmra.mrb[4].mxu1 %v1273_v60 }
 0x65d   : > { %v1537_v11 = vpop.f32.mrb[4].mxu1 }
 0x65e   : > { %v2343_v12 = vadd.f32 %v1537_v11, %v1391_v9  ;;  %v1539_v13 = vpop.f32.mrb[5].mxu1 }
 0x65f   : > { %v2344_v16 = vadd.f32 %v1539_v13, %v1395_v10 }
 0x660   : > { %v1542_v21 = vmax.f32 %v2343_v12, 0.0 }
 0x661   : > { %v1543_v19 = vmax.f32 %v2344_v16, 0.0 }
 0x663   : > { %1647 = vmatprep.mubr.f32.mxu0 %v1543_v19 }
 0x664   : > { %1648 = vmatmul.mubr.f32.vlgmr.msra.gmra.mrb[4].mxu0 %v1542_v21 }
 0x665   : > { %2328 = vmatpush1.bf16.msra.mxu0 %v2327_v20  ;;  %1752 = vmatprep.mubr.f32.mxu0 %v2503_v41  ;;  %v2335_v41 = vpack.c.bf16 %v1667_v31, %v1665_v30 }
 0x666   : > { %2330 = vmatprep.subr.bf16.mxu0 %v2329_v22 }
 0x669   : > { %2332 = vmatpush1.bf16.msra.mxu0 %v2331_v26 }
 0x66a   : > { %2334 = vmatprep.subr.bf16.mxu0 %v2333_v29 }
 0x66d   : > { %2336 = vmatpush1.bf16.msra.mxu0 %v2335_v41 }
 0x66e   : > { %2338 = vmatprep.subr.bf16.mxu0 %v2337_v36 }
 0x671   : > { %2340 = vmatpush1.bf16.msra.mxu0 %v2339_v39 }
 0x737   : > { %v1992_v40 = vpop.f32.mrb[4].mxu0 }
 0x738   : > { %v1993_v43 = vpop.f32.mrb[5].mxu0 }
 0x739   : > { %v1994_v45 = vadd.f32 %v1993_v43, %v1992_v40 }
 0x73b   : > { %v1650_v47 = vadd.f32 %v1994_v45, %v1886_v42 }
 0x73d   : > { %v1653_v1 = vmax.f32 %v1650_v47, 0.0 }
 0x73f   : > { %1887 = vmatmul.mubr.msk.f32.vlgmr.msra.gmra.mrb[6].mxu0 %vm855_vm1, %v1653_v1 }
 0x812   : > { %v1754_v50 = vpop.f32.mrb[6].mxu0 }
 0x813   : > { %v1755_v51 = vadd.f32 %v1754_v50, %v1678_v48  ;;  %v1756_v52 = vpop.f32.mrb[7].mxu0 }
 0x814   : > { %v1757_v53 = vadd.f32 %v1756_v52, %v1682_v49 }
 0x815   : > { %1759 = vst [vmem:[%s2670_s22] sm:$0xff] %v1755_v51 }
 0x816   : > { %1760 = vst [vmem:[%s2670_s22 + $0x8] sm:$0xff] %v1757_v53 }
 0x817 PF: > { %s3547_s18 = sld [smem:[#allocation10_spill]]  ;;  %s3549_s19 = sld [smem:[#allocation9_spill]] }
 0x818   : > { %s3550_s20 = sld [smem:[#allocation11_spill]]  ;;  %s3551_s21 = sld [smem:[#allocation12_spill]] }
 0x81d   : > { %s26_s22 = sadd.s32 1, %s3547_s18   ;;  %s3548_s18 = sld [smem:[#allocation8_spill]] }
 0x81e   : > { %p23_p9 = scmp.ge.s32.totalorder %s26_s22, 10  }
 0x820   :  { %25 = sbr.rel (!%p23_p9) target bundleno = 5 (0x5), region = 119 }
 0x827   :  { %1790 = vsyncpa [#allocation6], 1 }
 0x828   :  { %1792 = vsyncpa [#allocation6 + $0x1], 1 }

</bundles_post_ra>
